<compile_context>
chip_gen: v7x
topology: tpu7x:2x2x1
jax: 0.10.0
libtpu: 0.0.40
codegen_flags: <defaults>
</compile_context>

<pallas_src>
import functools
import math

import jax
import jax.numpy as jnp
from jax.experimental import pallas as pl
from jax.experimental.pallas import tpu as pltpu


# ----------------------------------------------------------------------------
# small helpers
# ----------------------------------------------------------------------------
def _round_up(n, m):
    return ((n + m - 1) // m) * m


def conv_out_size(n, k, s, p):
    return math.floor((n + 2 * p - k) / s) + 1


# ----------------------------------------------------------------------------
# Parameter preparation (one-time): lower each conv / conv-transpose to a dense
# GEMM matrix over (C,H,W)-order flattened activations, pad everything to
# lane-aligned shapes, cast matmul operands to bf16.
# ----------------------------------------------------------------------------
def _conv_as_matrix(w_oihw, stride, padding, cin, hin, lhs_dilation=1):
    """Unrolled-conv matrix M with  out_flat = in_flat @ M  ((C,H,W)-order flattening)."""
    in_dim = cin * hin * hin
    basis = jnp.eye(in_dim, dtype=jnp.float32).reshape(in_dim, cin, hin, hin)
    out = jax.lax.conv_general_dilated(
        basis, w_oihw.astype(jnp.float32),
        window_strides=(stride, stride),
        padding=[(padding, padding), (padding, padding)],
        lhs_dilation=(lhs_dilation, lhs_dilation),
        dimension_numbers=("NCHW", "OIHW", "NCHW"))
    _, cout, hout, wout = out.shape
    return out.reshape(in_dim, cout * hout * wout)


def prepare_packed(params, *, in_shape, F, k, stride, padding, latent_dim, num_classes):
    C, H, W = in_shape
    assert H == W
    if H > 28:
        # TODO(synk): tap-wise accumulating conv matmuls for large images (dense matrices are
        # O(H^4) and would exceed v7x's 64 MiB VMEM well before v5e/v6e's 128 MiB).
        raise NotImplementedError("dense unrolled-conv lowering only supported for H, W <= 28")

    # layer geometry (matches the PyTorch module)
    H1 = conv_out_size(H, k, stride, padding)            # conv1
    H2 = conv_out_size(H1, k, stride, padding)           # conv2 (== _conv_output_size)
    H5 = (H2 - 1) * stride + k                            # ConvTranspose2d(k, stride, pad=0)
    k2 = k - 1
    H6 = (H5 - 1) * stride + k2 - 2 * 1                   # ConvTranspose2d(k-1, stride, pad=1)

    d_in, d1, d2 = C * H * W, F * H1 * H1, 2 * F * H2 * H2
    d5, d6 = F * H5 * H5, C * H6 * H6
    D_in, D1, D2 = (_round_up(v, 128) for v in (d_in, d1, d2))
    DL, DC = _round_up(latent_dim, 128), _round_up(num_classes, 128)
    D5, D6 = _round_up(d5, 128), _round_up(d6, 128)

    # encoder convs
    M1 = _conv_as_matrix(params["conv1_w"], stride, padding, C, H)
    M2 = _conv_as_matrix(params["conv2_w"], stride, padding, F, H1)
    # decoder transposed convs: dilate input by `stride`, flip kernel, swap in/out channels
    wT1 = jnp.transpose(jnp.flip(params["convT1_w"], (2, 3)), (1, 0, 2, 3))
    M5 = _conv_as_matrix(wT1, 1, k - 1 - 0, 2 * F, H2, lhs_dilation=stride)
    wT2 = jnp.transpose(jnp.flip(params["convT2_w"], (2, 3)), (1, 0, 2, 3))
    M6 = _conv_as_matrix(wT2, 1, k2 - 1 - 1, F, H5, lhs_dilation=stride)

    assert M1.shape == (d_in, d1) and M2.shape == (d1, d2)
    assert M5.shape == (d2, d5) and M6.shape == (d5, d6)

    def padm(m, kk, nn):  # zero-pad reduction (K) and output (N) dims, cast to bf16
        return jnp.pad(m, ((0, kk - m.shape[0]), (0, nn - m.shape[1]))).astype(jnp.bfloat16)

    def padb(b, nn, fill=0.0):  # biases stay f32 (added after f32 accumulation)
        return jnp.pad(b, (0, nn - b.shape[0]),
                       constant_values=fill).astype(jnp.float32).reshape(1, nn)

    # Classifier + dec_fc share the latent as LHS -> fuse along N (128 + 256 = 384 lanes).
    m_cls = padm(params["cls_w"].T, DL, DC)          # PyTorch Linear stores (out, in)
    m_dec = padm(params["dec_fc_w"].T, DL, D2)
    m_cd = jnp.concatenate([m_cls, m_dec], axis=1)
    b_cls = padb(params["cls_b"], DC, fill=-1e30)    # padded class lanes -> exp() == 0
    b_dec = padb(params["dec_fc_b"], D2)
    b_cd = jnp.concatenate([b_cls, b_dec], axis=1)

    mats = (
        padm(M1, D_in, D1),
        padm(M2, D1, D2),
        padm(params["enc_fc_w"].T, D2, DL),
        m_cd,
        padm(M5, D2, D5),
        padm(M6, D5, D6),
    )
    biases = (
        padb(jnp.repeat(params["conv1_b"], H1 * H1), D1),
        padb(jnp.repeat(params["conv2_b"], H2 * H2), D2),
        padb(params["enc_fc_b"], DL),
        b_cd,
        padb(jnp.repeat(params["convT1_b"], H5 * H5), D5),
        padb(jnp.repeat(params["convT2_b"], H6 * H6), D6),
    )
    cfg = dict(C=C, H_out=H6, W_out=H6, d_in=d_in, d6=d6,
               D_in=D_in, D1=D1, D2=D2, D5=D5, D6=D6, DL=DL, DC=DC,
               latent_dim=latent_dim, num_classes=num_classes)
    return mats, biases, cfg


# ----------------------------------------------------------------------------
# Fused Pallas kernels: lane-dense bf16 GEMMs + fused activations.
# ----------------------------------------------------------------------------
def _dense(a_bf16, m_ref, b_ref):
    return jnp.dot(a_bf16, m_ref[...], preferred_element_type=jnp.float32) + b_ref[...]


def _encode(x_ref, m1, m2, me, mcd, b1, b2, be, bcd, dc):
    """conv1+ReLU, conv2+ReLU, enc_fc, then fused (classifier | dec_fc) GEMM on the latent."""
    h = jnp.maximum(_dense(x_ref[...], m1, b1), 0.0).astype(jnp.bfloat16)
    h = jnp.maximum(_dense(h, m2, b2), 0.0).astype(jnp.bfloat16)
    lat = _dense(h, me, be)
    cd = _dense(lat.astype(jnp.bfloat16), mcd, bcd)
    zc = cd[:, :dc]
    zc = zc - jnp.max(zc, axis=-1, keepdims=True)
    ez = jnp.exp(zc)
    probs = ez / jnp.sum(ez, axis=-1, keepdims=True)   # exact div: rows sum to 1
    return lat, probs, cd[:, dc:]


def _fused_full_kernel(x_ref, m1, m2, me, mcd, m5, m6,
                       b1, b2, be, bcd, b5, b6,
                       latent_ref, probs_ref, recon_ref, *, dc):
    lat, probs, d_pre = _encode(x_ref, m1, m2, me, mcd, b1, b2, be, bcd, dc)
    latent_ref[...] = lat
    probs_ref[...] = probs
    # ---- decoder: dec_fc(+bias already applied)+ReLU, convT1+ReLU, convT2+Sigmoid ----
    d = jnp.maximum(d_pre, 0.0).astype(jnp.bfloat16)
    d = jnp.maximum(_dense(d, m5, b5), 0.0).astype(jnp.bfloat16)
    r = _dense(d, m6, b6)
    recon_ref[...] = 1.0 / (1.0 + jnp.exp(-r))          # exact sigmoid: stays in [0, 1]


def _fused_encoder_kernel(x_ref, m1, m2, me, mcd,
                          b1, b2, be, bcd,
                          latent_ref, probs_ref, *, dc):
    lat, probs, _ = _encode(x_ref, m1, m2, me, mcd, b1, b2, be, bcd, dc)
    latent_ref[...] = lat
    probs_ref[...] = probs


# ----------------------------------------------------------------------------
# Wrapper: tile selection, VMEM budget, pallas_call plumbing.
# ----------------------------------------------------------------------------
def _pick_tile_m(batch):
    """bf16 LHS min-tile is (16,128); cap at the 256 MXU M dim; once the padded batch reaches
    256, halve the tile so grid >= 2 steps and 'parallel' shards across v7x's two TCs."""
    b16 = _round_up(max(batch, 1), 16)
    if b16 < 256:
        return b16
    return min(256, _round_up((b16 + 1) // 2, 16))


def _vmem_limit_bytes(mats, biases, tm, cfg, with_decoder):
    weights = sum(int(m.size) * m.dtype.itemsize for m in mats)        # Buffered(1) -> x1
    bias_b = sum(int(b.size) * b.dtype.itemsize for b in biases)
    io = tm * cfg["D_in"] * 2 * 2                                       # bf16 input, 2 buffers
    out_lanes = cfg["DL"] + cfg["DC"] + (cfg["D6"] if with_decoder else 0)
    io += tm * out_lanes * 4 * 2                                         # f32 outputs, 2 buffers
    act = 4 * tm * max(cfg["D1"], cfg["D2"], cfg["D5"], cfg["D6"]) * 4   # live f32 intermediates
    total = weights + bias_b + io + act
    return int(min(max(int(total * 1.5), 16 * 2 ** 20), 56 * 2 ** 20))   # stay under v7x 64 MiB


def conv_autoencoder_forward(mats, biases, x, cfg, return_latent=False):
    C = cfg["C"]
    B = x.shape[0]
    TM = _pick_tile_m(B)
    Bp = _round_up(B, TM)

    # Only layout work outside the kernel: a free NCHW flatten + zero-pad of batch/features.
    xf = x.reshape(B, -1).astype(jnp.float32)
    xf = jnp.pad(xf, ((0, Bp - B), (0, cfg["D_in"] - cfg["d_in"]))).astype(jnp.bfloat16)

    row_spec = lambda n: pl.BlockSpec((TM, n), lambda i: (i, 0))
    # Grid-invariant weights/biases: single pipeline buffer (constant index_map never re-DMAs).
    const_spec = lambda shape: pl.BlockSpec(shape, lambda i: (0, 0),
                                            pipeline_mode=pl.Buffered(1))

    if return_latent:
        kmats, kbiases = mats[:4], biases[:4]
        kernel = functools.partial(_fused_encoder_kernel, dc=cfg["DC"])
        out_specs = (row_spec(cfg["DL"]), row_spec(cfg["DC"]))
        out_shape = (jax.ShapeDtypeStruct((Bp, cfg["DL"]), jnp.float32),
                     jax.ShapeDtypeStruct((Bp, cfg["DC"]), jnp.float32))
    else:
        kmats, kbiases = mats, biases
        kernel = functools.partial(_fused_full_kernel, dc=cfg["DC"])
        out_specs = (row_spec(cfg["DL"]), row_spec(cfg["DC"]), row_spec(cfg["D6"]))
        out_shape = (jax.ShapeDtypeStruct((Bp, cfg["DL"]), jnp.float32),
                     jax.ShapeDtypeStruct((Bp, cfg["DC"]), jnp.float32),
                     jax.ShapeDtypeStruct((Bp, cfg["D6"]), jnp.float32))

    in_specs = ([row_spec(cfg["D_in"])]
                + [const_spec(m.shape) for m in kmats]
                + [const_spec(b.shape) for b in kbiases])

    outs = pl.pallas_call(
        kernel,
        out_shape=out_shape,
        grid=(Bp // TM,),
        in_specs=in_specs,
        out_specs=out_specs,
        compiler_params=pltpu.CompilerParams(
            dimension_semantics=("parallel",),   # batch tiles shard across v7x's 2 TCs
            vmem_limit_bytes=_vmem_limit_bytes(kmats, kbiases, TM, cfg,
                                               with_decoder=not return_latent)),
    )(xf, *kmats, *kbiases)

    latent_p, probs_p = outs[0], outs[1]
    latent = latent_p[:B, :cfg["latent_dim"]]
    logits = probs_p[:B, :cfg["num_classes"]]
    if return_latent:
        return latent, logits
    recon = outs[2][:B, :cfg["d6"]].reshape(B, C, cfg["H_out"], cfg["W_out"])
    return recon, logits


# ----------------------------------------------------------------------------
# Pure-JAX f32 reference (PyTorch semantics) for a correctness cross-check.
# ----------------------------------------------------------------------------
def _ref_conv(x, w, b, stride, padding):
    out = jax.lax.conv_general_dilated(
        x, w, window_strides=(stride, stride),
        padding=[(padding, padding)] * 2,
        dimension_numbers=("NCHW", "OIHW", "NCHW"))
    return out + b[None, :, None, None]


def _ref_conv_transpose(x, w_t, b, stride, padding):
    k = w_t.shape[-1]
    w = jnp.transpose(jnp.flip(w_t, (2, 3)), (1, 0, 2, 3))
    out = jax.lax.conv_general_dilated(
        x, w, window_strides=(1, 1),
        padding=[(k - 1 - padding, k - 1 - padding)] * 2,
        lhs_dilation=(stride, stride),
        dimension_numbers=("NCHW", "OIHW", "NCHW"))
    return out + b[None, :, None, None]


def reference_forward(params, x, *, F, k, stride, padding, conv_out):
    relu = lambda v: jnp.maximum(v, 0.0)
    h = relu(_ref_conv(x, params["conv1_w"], params["conv1_b"], stride, padding))
    h = relu(_ref_conv(h, params["conv2_w"], params["conv2_b"], stride, padding))
    B = x.shape[0]
    latent = h.reshape(B, -1) @ params["enc_fc_w"].T + params["enc_fc_b"]
    logits = jax.nn.softmax(latent @ params["cls_w"].T + params["cls_b"], axis=-1)
    d = relu(latent @ params["dec_fc_w"].T + params["dec_fc_b"])
    d = d.reshape(B, 2 * F, conv_out, conv_out)
    d = relu(_ref_conv_transpose(d, params["convT1_w"], params["convT1_b"], stride, 0))
    recon = jax.nn.sigmoid(_ref_conv_transpose(d, params["convT2_w"], params["convT2_b"],
                                               stride, 1))
    return recon, logits, latent


# ----------------------------------------------------------------------------
# Random parameters in PyTorch layouts.
# ----------------------------------------------------------------------------
def make_params(key, in_shape, F, k, latent_dim, num_classes, conv_out):
    C = in_shape[0]
    flat = conv_out * conv_out * 2 * F
    keys = jax.random.split(key, 14)

    def rnd(kk, shape, scale=0.1):
        return (scale * jax.random.normal(kk, shape)).astype(jnp.float32)

    return {
        "conv1_w": rnd(keys[0], (F, C, k, k)),
        "conv1_b": rnd(keys[1], (F,)),
        "conv2_w": rnd(keys[2], (2 * F, F, k, k)),
        "conv2_b": rnd(keys[3], (2 * F,)),
        "enc_fc_w": rnd(keys[4], (latent_dim, flat)),       # Linear: (out, in)
        "enc_fc_b": rnd(keys[5], (latent_dim,)),
        "cls_w": rnd(keys[6], (num_classes, latent_dim)),
        "cls_b": rnd(keys[7], (num_classes,)),
        "dec_fc_w": rnd(keys[8], (flat, latent_dim)),
        "dec_fc_b": rnd(keys[9], (flat,)),
        "convT1_w": rnd(keys[10], (2 * F, F, k, k)),         # ConvTranspose: (Cin, Cout, k, k)
        "convT1_b": rnd(keys[11], (F,)),
        "convT2_w": rnd(keys[12], (F, C, k - 1, k - 1)),
        "convT2_b": rnd(keys[13], (C,)),
    }


if __name__ == "__main__":
    B = 2
    in_shape = (3, 16, 16)   # (C, H, W)
    F = 8                    # initial_filter_num
    k = 3                    # kernel_size
    stride = 2
    padding = 1
    latent_dim = 32
    num_classes = 10

    s1 = conv_out_size(in_shape[1], k, stride, padding)   # 8
    conv_out = conv_out_size(s1, k, stride, padding)      # 4

    key = jax.random.PRNGKey(0)
    kx, kp = jax.random.split(key)
    x = jax.random.normal(kx, (B,) + in_shape, dtype=jnp.float32)
    params = make_params(kp, in_shape, F, k, latent_dim, num_classes, conv_out)

    mats, biases, cfg = prepare_packed(params, in_shape=in_shape, F=F, k=k,
                                       stride=stride, padding=padding,
                                       latent_dim=latent_dim, num_classes=num_classes)

    fwd = jax.jit(functools.partial(conv_autoencoder_forward, cfg=cfg))
    fwd_latent = jax.jit(functools.partial(conv_autoencoder_forward, cfg=cfg,
                                           return_latent=True))

    recon, logits = fwd(mats, biases, x)
    latent, logits_enc = fwd_latent(mats, biases, x)
    jax.block_until_ready((recon, logits, latent, logits_enc))

    assert recon.shape == (B,) + in_shape, recon.shape
    assert logits.shape == (B, num_classes), logits.shape
    assert latent.shape == (B, latent_dim), latent.shape
    # exact softmax normalizer -> rows sum to 1 tightly
    assert jnp.allclose(jnp.sum(logits, axis=1), 1.0, atol=1e-3)
    # encoder-only path agrees with the full path
    assert float(jnp.max(jnp.abs(logits - logits_enc))) < 1e-4

    # cross-check against the pure-JAX f32 reference (bf16 MXU drift expected)
    recon_ref, logits_ref, latent_ref = reference_forward(
        params, x, F=F, k=k, stride=stride, padding=padding, conv_out=conv_out)
    assert float(jnp.max(jnp.abs(recon - recon_ref))) < 5e-2
    assert float(jnp.max(jnp.abs(logits - logits_ref))) < 5e-2
    assert float(jnp.max(jnp.abs(latent - latent_ref))) < 5e-2

    print("KERNEL_OK")
</pallas_src>

<mosaic_0001>
module attributes {stable_mosaic.version = 11 : i64} {
  func.func @_fused_full_kernel(%arg0: i32, %arg1: memref<16x768xbf16, #tpu.memory_space<vmem>>, %arg2: memref<768x512xbf16, #tpu.memory_space<vmem>>, %arg3: memref<512x256xbf16, #tpu.memory_space<vmem>>, %arg4: memref<256x128xbf16, #tpu.memory_space<vmem>>, %arg5: memref<128x384xbf16, #tpu.memory_space<vmem>>, %arg6: memref<256x768xbf16, #tpu.memory_space<vmem>>, %arg7: memref<768x768xbf16, #tpu.memory_space<vmem>>, %arg8: memref<1x512xf32, #tpu.memory_space<vmem>>, %arg9: memref<1x256xf32, #tpu.memory_space<vmem>>, %arg10: memref<1x128xf32, #tpu.memory_space<vmem>>, %arg11: memref<1x384xf32, #tpu.memory_space<vmem>>, %arg12: memref<1x768xf32, #tpu.memory_space<vmem>>, %arg13: memref<1x768xf32, #tpu.memory_space<vmem>>, %arg14: memref<16x128xf32, #tpu.memory_space<vmem>>, %arg15: memref<16x128xf32, #tpu.memory_space<vmem>>, %arg16: memref<16x768xf32, #tpu.memory_space<vmem>>) attributes {dimension_semantics = [#tpu.dimension_semantics<parallel>], iteration_bounds = array<i64: 1>, scalar_prefetch = 0 : i64, scratch_operands = 0 : i64, tpu.core_type = #tpu.core_type<tc>, window_params = [{transform_indices = @transform_0, window_bounds = array<i64: 16, 768>}, {pipeline_mode = #tpu.pipeline_mode<synchronous>, transform_indices = @transform_1, window_bounds = array<i64: 768, 512>}, {pipeline_mode = #tpu.pipeline_mode<synchronous>, transform_indices = @transform_2, window_bounds = array<i64: 512, 256>}, {pipeline_mode = #tpu.pipeline_mode<synchronous>, transform_indices = @transform_3, window_bounds = array<i64: 256, 128>}, {pipeline_mode = #tpu.pipeline_mode<synchronous>, transform_indices = @transform_4, window_bounds = array<i64: 128, 384>}, {pipeline_mode = #tpu.pipeline_mode<synchronous>, transform_indices = @transform_5, window_bounds = array<i64: 256, 768>}, {pipeline_mode = #tpu.pipeline_mode<synchronous>, transform_indices = @transform_6, window_bounds = array<i64: 768, 768>}, {pipeline_mode = #tpu.pipeline_mode<synchronous>, transform_indices = @transform_7, window_bounds = array<i64: 1, 512>}, {pipeline_mode = #tpu.pipeline_mode<synchronous>, transform_indices = @transform_8, window_bounds = array<i64: 1, 256>}, {pipeline_mode = #tpu.pipeline_mode<synchronous>, transform_indices = @transform_9, window_bounds = array<i64: 1, 128>}, {pipeline_mode = #tpu.pipeline_mode<synchronous>, transform_indices = @transform_10, window_bounds = array<i64: 1, 384>}, {pipeline_mode = #tpu.pipeline_mode<synchronous>, transform_indices = @transform_11, window_bounds = array<i64: 1, 768>}, {pipeline_mode = #tpu.pipeline_mode<synchronous>, transform_indices = @transform_12, window_bounds = array<i64: 1, 768>}, {transform_indices = @transform_13, window_bounds = array<i64: 16, 128>}, {transform_indices = @transform_14, window_bounds = array<i64: 16, 128>}, {transform_indices = @transform_15, window_bounds = array<i64: 16, 768>}]} {
    %c0 = arith.constant 0 : index
    %c0_0 = arith.constant 0 : index
    %0 = vector.load %arg1[%c0, %c0_0] : memref<16x768xbf16, #tpu.memory_space<vmem>>, vector<16x768xbf16>
    %c0_1 = arith.constant 0 : index
    %c0_2 = arith.constant 0 : index
    %1 = vector.load %arg2[%c0_1, %c0_2] : memref<768x512xbf16, #tpu.memory_space<vmem>>, vector<768x512xbf16>
    %cst = arith.constant dense<0.000000e+00> : vector<16x512xf32>
    %2 = tpu.matmul %0, %1, %cst {dimension_numbers = #tpu.dot_dimension_numbers<[1], [0], [0], [1], [0, 0, 1, 1], [], []>} : vector<16x768xbf16>, vector<768x512xbf16>, vector<16x512xf32> -> vector<16x512xf32>
    %c0_3 = arith.constant 0 : index
    %c0_4 = arith.constant 0 : index
    %3 = vector.load %arg8[%c0_3, %c0_4] : memref<1x512xf32, #tpu.memory_space<vmem>>, vector<1x512xf32>
    %4 = vector.broadcast %3 : vector<1x512xf32> to vector<16x512xf32>
    %5 = arith.addf %2, %4 : vector<16x512xf32>
    %cst_5 = arith.constant 0.000000e+00 : f32
    %6 = vector.broadcast %cst_5 : f32 to vector<16x512xf32>
    %7 = arith.maximumf %5, %6 : vector<16x512xf32>
    %8 = arith.truncf %7 : vector<16x512xf32> to vector<16x512xbf16>
    %c0_6 = arith.constant 0 : index
    %c0_7 = arith.constant 0 : index
    %9 = vector.load %arg3[%c0_6, %c0_7] : memref<512x256xbf16, #tpu.memory_space<vmem>>, vector<512x256xbf16>
    %cst_8 = arith.constant dense<0.000000e+00> : vector<16x256xf32>
    %10 = tpu.matmul %8, %9, %cst_8 {dimension_numbers = #tpu.dot_dimension_numbers<[1], [0], [0], [1], [0, 0, 1, 1], [], []>} : vector<16x512xbf16>, vector<512x256xbf16>, vector<16x256xf32> -> vector<16x256xf32>
    %c0_9 = arith.constant 0 : index
    %c0_10 = arith.constant 0 : index
    %11 = vector.load %arg9[%c0_9, %c0_10] : memref<1x256xf32, #tpu.memory_space<vmem>>, vector<1x256xf32>
    %12 = vector.broadcast %11 : vector<1x256xf32> to vector<16x256xf32>
    %13 = arith.addf %10, %12 : vector<16x256xf32>
    %cst_11 = arith.constant 0.000000e+00 : f32
    %14 = vector.broadcast %cst_11 : f32 to vector<16x256xf32>
    %15 = arith.maximumf %13, %14 : vector<16x256xf32>
    %16 = arith.truncf %15 : vector<16x256xf32> to vector<16x256xbf16>
    %c0_12 = arith.constant 0 : index
    %c0_13 = arith.constant 0 : index
    %17 = vector.load %arg4[%c0_12, %c0_13] : memref<256x128xbf16, #tpu.memory_space<vmem>>, vector<256x128xbf16>
    %cst_14 = arith.constant dense<0.000000e+00> : vector<16x128xf32>
    %18 = tpu.matmul %16, %17, %cst_14 {dimension_numbers = #tpu.dot_dimension_numbers<[1], [0], [0], [1], [0, 0, 1, 1], [], []>} : vector<16x256xbf16>, vector<256x128xbf16>, vector<16x128xf32> -> vector<16x128xf32>
    %c0_15 = arith.constant 0 : index
    %c0_16 = arith.constant 0 : index
    %19 = vector.load %arg10[%c0_15, %c0_16] : memref<1x128xf32, #tpu.memory_space<vmem>>, vector<1x128xf32>
    %20 = vector.broadcast %19 : vector<1x128xf32> to vector<16x128xf32>
    %21 = arith.addf %18, %20 : vector<16x128xf32>
    %22 = arith.truncf %21 : vector<16x128xf32> to vector<16x128xbf16>
    %c0_17 = arith.constant 0 : index
    %c0_18 = arith.constant 0 : index
    %23 = vector.load %arg5[%c0_17, %c0_18] : memref<128x384xbf16, #tpu.memory_space<vmem>>, vector<128x384xbf16>
    %cst_19 = arith.constant dense<0.000000e+00> : vector<16x384xf32>
    %24 = tpu.matmul %22, %23, %cst_19 {dimension_numbers = #tpu.dot_dimension_numbers<[1], [0], [0], [1], [0, 0, 1, 1], [], []>} : vector<16x128xbf16>, vector<128x384xbf16>, vector<16x384xf32> -> vector<16x384xf32>
    %c0_20 = arith.constant 0 : index
    %c0_21 = arith.constant 0 : index
    %25 = vector.load %arg11[%c0_20, %c0_21] : memref<1x384xf32, #tpu.memory_space<vmem>>, vector<1x384xf32>
    %26 = vector.broadcast %25 : vector<1x384xf32> to vector<16x384xf32>
    %27 = arith.addf %24, %26 : vector<16x384xf32>
    %28 = vector.extract_strided_slice %27 {offsets = [0, 0], sizes = [16, 128], strides = [1, 1]} : vector<16x384xf32> to vector<16x128xf32>
    %cst_22 = arith.constant dense<0xFF800000> : vector<16xf32>
    %29 = vector.multi_reduction <maximumf>, %28, %cst_22 [1] : vector<16x128xf32> to vector<16xf32>
    %30 = vector.shape_cast %29 : vector<16xf32> to vector<16x1xf32>
    %31 = vector.broadcast %30 : vector<16x1xf32> to vector<16x128xf32>
    %32 = arith.subf %28, %31 : vector<16x128xf32>
    %33 = math.exp %32 : vector<16x128xf32>
    %cst_23 = arith.constant dense<0.000000e+00> : vector<16xf32>
    %34 = vector.multi_reduction <add>, %33, %cst_23 [1] : vector<16x128xf32> to vector<16xf32>
    %35 = vector.shape_cast %34 : vector<16xf32> to vector<16x1xf32>
    %36 = vector.broadcast %35 : vector<16x1xf32> to vector<16x128xf32>
    %37 = arith.divf %33, %36 : vector<16x128xf32>
    %38 = vector.extract_strided_slice %27 {offsets = [0, 128], sizes = [16, 256], strides = [1, 1]} : vector<16x384xf32> to vector<16x256xf32>
    %c0_24 = arith.constant 0 : index
    %c0_25 = arith.constant 0 : index
    %39 = vector.load %arg14[%c0_24, %c0_25] : memref<16x128xf32, #tpu.memory_space<vmem>>, vector<16x128xf32>
    tpu.vector_store %arg14[%c0_24, %c0_25], %21 {strides = array<i32>} : memref<16x128xf32, #tpu.memory_space<vmem>>, vector<16x128xf32>,
    %c0_26 = arith.constant 0 : index
    %c0_27 = arith.constant 0 : index
    %40 = vector.load %arg15[%c0_26, %c0_27] : memref<16x128xf32, #tpu.memory_space<vmem>>, vector<16x128xf32>
    tpu.vector_store %arg15[%c0_26, %c0_27], %37 {strides = array<i32>} : memref<16x128xf32, #tpu.memory_space<vmem>>, vector<16x128xf32>,
    %cst_28 = arith.constant 0.000000e+00 : f32
    %41 = vector.broadcast %cst_28 : f32 to vector<16x256xf32>
    %42 = arith.maximumf %38, %41 : vector<16x256xf32>
    %43 = arith.truncf %42 : vector<16x256xf32> to vector<16x256xbf16>
    %c0_29 = arith.constant 0 : index
    %c0_30 = arith.constant 0 : index
    %44 = vector.load %arg6[%c0_29, %c0_30] : memref<256x768xbf16, #tpu.memory_space<vmem>>, vector<256x768xbf16>
    %cst_31 = arith.constant dense<0.000000e+00> : vector<16x768xf32>
    %45 = tpu.matmul %43, %44, %cst_31 {dimension_numbers = #tpu.dot_dimension_numbers<[1], [0], [0], [1], [0, 0, 1, 1], [], []>} : vector<16x256xbf16>, vector<256x768xbf16>, vector<16x768xf32> -> vector<16x768xf32>
    %c0_32 = arith.constant 0 : index
    %c0_33 = arith.constant 0 : index
    %46 = vector.load %arg12[%c0_32, %c0_33] : memref<1x768xf32, #tpu.memory_space<vmem>>, vector<1x768xf32>
    %47 = vector.broadcast %46 : vector<1x768xf32> to vector<16x768xf32>
    %48 = arith.addf %45, %47 : vector<16x768xf32>
    %cst_34 = arith.constant 0.000000e+00 : f32
    %49 = vector.broadcast %cst_34 : f32 to vector<16x768xf32>
    %50 = arith.maximumf %48, %49 : vector<16x768xf32>
    %51 = arith.truncf %50 : vector<16x768xf32> to vector<16x768xbf16>
    %c0_35 = arith.constant 0 : index
    %c0_36 = arith.constant 0 : index
    %52 = vector.load %arg7[%c0_35, %c0_36] : memref<768x768xbf16, #tpu.memory_space<vmem>>, vector<768x768xbf16>
    %cst_37 = arith.constant dense<0.000000e+00> : vector<16x768xf32>
    %53 = tpu.matmul %51, %52, %cst_37 {dimension_numbers = #tpu.dot_dimension_numbers<[1], [0], [0], [1], [0, 0, 1, 1], [], []>} : vector<16x768xbf16>, vector<768x768xbf16>, vector<16x768xf32> -> vector<16x768xf32>
    %c0_38 = arith.constant 0 : index
    %c0_39 = arith.constant 0 : index
    %54 = vector.load %arg13[%c0_38, %c0_39] : memref<1x768xf32, #tpu.memory_space<vmem>>, vector<1x768xf32>
    %55 = vector.broadcast %54 : vector<1x768xf32> to vector<16x768xf32>
    %56 = arith.addf %53, %55 : vector<16x768xf32>
    %cst_40 = arith.constant 0.000000e+00 : f32
    %57 = vector.broadcast %cst_40 : f32 to vector<16x768xf32>
    %58 = arith.subf %57, %56 : vector<16x768xf32>
    %59 = math.exp %58 : vector<16x768xf32>
    %cst_41 = arith.constant 1.000000e+00 : f32
    %60 = vector.broadcast %cst_41 : f32 to vector<16x768xf32>
    %61 = arith.addf %60, %59 : vector<16x768xf32>
    %cst_42 = arith.constant 1.000000e+00 : f32
    %62 = vector.broadcast %cst_42 : f32 to vector<16x768xf32>
    %63 = arith.divf %62, %61 : vector<16x768xf32>
    %c0_43 = arith.constant 0 : index
    %c0_44 = arith.constant 0 : index
    %64 = vector.load %arg16[%c0_43, %c0_44] : memref<16x768xf32, #tpu.memory_space<vmem>>, vector<16x768xf32>
    tpu.vector_store %arg16[%c0_43, %c0_44], %63 {strides = array<i32>} : memref<16x768xf32, #tpu.memory_space<vmem>>, vector<16x768xf32>,
    return
  }
  func.func @transform_0(%arg0: i32) -> (i32, i32) {
    %c0_i32 = arith.constant 0 : i32
    %c0_i32_0 = arith.constant 0 : i32
    return %arg0, %c0_i32 : i32, i32
  }
  func.func @transform_1(%arg0: i32) -> (i32, i32) {
    %c0_i32 = arith.constant 0 : i32
    %c0_i32_0 = arith.constant 0 : i32
    %c0_i32_1 = arith.constant 0 : i32
    return %c0_i32, %c0_i32_0 : i32, i32
  }
  func.func @transform_2(%arg0: i32) -> (i32, i32) {
    %c0_i32 = arith.constant 0 : i32
    %c0_i32_0 = arith.constant 0 : i32
    %c0_i32_1 = arith.constant 0 : i32
    return %c0_i32, %c0_i32_0 : i32, i32
  }
  func.func @transform_3(%arg0: i32) -> (i32, i32) {
    %c0_i32 = arith.constant 0 : i32
    %c0_i32_0 = arith.constant 0 : i32
    %c0_i32_1 = arith.constant 0 : i32
    return %c0_i32, %c0_i32_0 : i32, i32
  }
  func.func @transform_4(%arg0: i32) -> (i32, i32) {
    %c0_i32 = arith.constant 0 : i32
    %c0_i32_0 = arith.constant 0 : i32
    %c0_i32_1 = arith.constant 0 : i32
    return %c0_i32, %c0_i32_0 : i32, i32
  }
  func.func @transform_5(%arg0: i32) -> (i32, i32) {
    %c0_i32 = arith.constant 0 : i32
    %c0_i32_0 = arith.constant 0 : i32
    %c0_i32_1 = arith.constant 0 : i32
    return %c0_i32, %c0_i32_0 : i32, i32
  }
  func.func @transform_6(%arg0: i32) -> (i32, i32) {
    %c0_i32 = arith.constant 0 : i32
    %c0_i32_0 = arith.constant 0 : i32
    %c0_i32_1 = arith.constant 0 : i32
    return %c0_i32, %c0_i32_0 : i32, i32
  }
  func.func @transform_7(%arg0: i32) -> (i32, i32) {
    %c0_i32 = arith.constant 0 : i32
    %c0_i32_0 = arith.constant 0 : i32
    %c0_i32_1 = arith.constant 0 : i32
    return %c0_i32, %c0_i32_0 : i32, i32
  }
  func.func @transform_8(%arg0: i32) -> (i32, i32) {
    %c0_i32 = arith.constant 0 : i32
    %c0_i32_0 = arith.constant 0 : i32
    %c0_i32_1 = arith.constant 0 : i32
    return %c0_i32, %c0_i32_0 : i32, i32
  }
  func.func @transform_9(%arg0: i32) -> (i32, i32) {
    %c0_i32 = arith.constant 0 : i32
    %c0_i32_0 = arith.constant 0 : i32
    %c0_i32_1 = arith.constant 0 : i32
    return %c0_i32, %c0_i32_0 : i32, i32
  }
  func.func @transform_10(%arg0: i32) -> (i32, i32) {
    %c0_i32 = arith.constant 0 : i32
    %c0_i32_0 = arith.constant 0 : i32
    %c0_i32_1 = arith.constant 0 : i32
    return %c0_i32, %c0_i32_0 : i32, i32
  }
  func.func @transform_11(%arg0: i32) -> (i32, i32) {
    %c0_i32 = arith.constant 0 : i32
    %c0_i32_0 = arith.constant 0 : i32
    %c0_i32_1 = arith.constant 0 : i32
    return %c0_i32, %c0_i32_0 : i32, i32
  }
  func.func @transform_12(%arg0: i32) -> (i32, i32) {
    %c0_i32 = arith.constant 0 : i32
    %c0_i32_0 = arith.constant 0 : i32
    %c0_i32_1 = arith.constant 0 : i32
    return %c0_i32, %c0_i32_0 : i32, i32
  }
  func.func @transform_13(%arg0: i32) -> (i32, i32) {
    %c0_i32 = arith.constant 0 : i32
    %c0_i32_0 = arith.constant 0 : i32
    return %arg0, %c0_i32 : i32, i32
  }
  func.func @transform_14(%arg0: i32) -> (i32, i32) {
    %c0_i32 = arith.constant 0 : i32
    %c0_i32_0 = arith.constant 0 : i32
    return %arg0, %c0_i32 : i32, i32
  }
  func.func @transform_15(%arg0: i32) -> (i32, i32) {
    %c0_i32 = arith.constant 0 : i32
    %c0_i32_0 = arith.constant 0 : i32
    return %arg0, %c0_i32 : i32, i32
  }
}

</mosaic_0001>

<bundles_post_ra>
// kernel: conv_autoencoder_forward.1
= control target key start
LH: loop header
LB: loop body
LE: loop exit
PB: predicated region body
PF: predicated region fallthrough
CT: control target
= control target key end

     0   :  { %21 = vsyncpa [#allocation3], 0  ;;  %s8333_s0 = inlined_call_operand.vmem [shape: bf16[16,768], index: 0, kind: input, shape index: {}]   ;;  %s8334_s1 = inlined_call_operand.hbm [shape: bf16[768,512], index: 1, kind: input, shape index: {}]   ;;  %s8335_s2 = inlined_call_operand.hbm [shape: bf16[512,256], index: 2, kind: input, shape index: {}]   ;;  %s8336_s3 = inlined_call_operand.hbm [shape: bf16[256,128], index: 3, kind: input, shape index: {}]   ;;  %s8337_s4 = inlined_call_operand.hbm [shape: bf16[128,384], index: 4, kind: input, shape index: {}]   ;;  %s8338_s5 = inlined_call_operand.hbm [shape: bf16[256,768], index: 5, kind: input, shape index: {}]   ;;  %s8339_s6 = inlined_call_operand.hbm [shape: bf16[768,768], index: 6, kind: input, shape index: {}]   ;;  %s8340_s7 = inlined_call_operand.hbm [shape: f32[1,512], index: 7, kind: input, shape index: {}]   ;;  %s8341_s8 = inlined_call_operand.hbm [shape: f32[1,256], index: 8, kind: input, shape index: {}]   ;;  %s8342_s9 = inlined_call_operand.hbm [shape: f32[1,128], index: 9, kind: input, shape index: {}]   ;;  %s8343_s10 = inlined_call_operand.hbm [shape: f32[1,384], index: 10, kind: input, shape index: {}]   ;;  %s8344_s11 = inlined_call_operand.hbm [shape: f32[1,768], index: 11, kind: input, shape index: {}]   ;;  %s8345_s12 = inlined_call_operand.hbm [shape: f32[1,768], index: 12, kind: input, shape index: {}]   ;;  %s8346_s13 = inlined_call_operand.hbm [shape: f32[16,128], index: 13, kind: output, shape index: {0}]   ;;  %s8347_s14 = inlined_call_operand.vmem [shape: f32[16,128], index: 14, kind: output, shape index: {1}]   ;;  %s8348_s15 = inlined_call_operand.vmem [shape: f32[16,768], index: 15, kind: output, shape index: {2}]  }
   0x1   :  { %22 = vsyncpa [#allocation6], 0 }
   0x2   :  { %23 = vsyncpa [#allocation9], 0 }
   0x3   :  { %24 = vsyncpa [#allocation12], 0 }
   0x4   :  { %25 = vsyncpa [#allocation15], 0 }
   0x5   :  { %26 = vsyncpa [#allocation18], 0 }
   0x6   :  { %27 = vsyncpa [#allocation21], 0 }
   0x7   :  { %28 = vsyncpa [#allocation4], 0  ;;  %s7860_s18 = smov [#allocation5]   ;;  %s7558_s22 = scalar_lea.hbm %s8335_s2, 8192 }
   0x8   :  { %s48_s19 = sshll.u32 %s7860_s18, 4  ;;  %p7559_p0 = scmp.ne.s32.totalorder %s8335_s2, %s7558_s22  ;;  %s49_s19 = int_to_ptr.vmem [resolvable:$true] %s48_s19 }
   0x9   :  { %p7562_p1 = scmp.lt.u32.totalorder %s7558_s22, %s8335_s2 }
   0xb   :  { %p7564_p2 = pnand %p7562_p1, %p7559_p0 }
   0xd   :  { %7567 = shalt.err (!%p7564_p2)
}
   0xe   :  { %s7568_s27 = scalar_lea.vmem %s49_s19, 8192  ;;  %p7573_p4 = scmp.lt.s32.totalorder %s49_s19, %s49_s19 }
   0xf   :  { %p7569_p3 = scmp.ne.s32.totalorder %s49_s19, %s7568_s27  ;;  %p7574_p5 = scmp.lt.s32.totalorder %s7568_s27, %s7568_s27 }
  0x11   :  { %p7575_p6 = por %p7574_p5, %p7573_p4 }
  0x13   :  { %p7576_p7 = pnand %p7575_p6, %p7569_p3 }
  0x15   :  { %7579 = shalt.err (!%p7576_p7)
}
  0x16   :  { %s8349_s28 = smov 128   ;;  %s8350_s29 = smov 8  }
  0x17   :  { %54 = dma.hbm_to_vmem [thread:$0]  %s8335_s2, 8192, %s49_s19, [#allocation6], %s8349_s28, %s8349_s28, %s8350_s29  }
  0x18   :  { %s7863_s17 = smov [#allocation8]   ;;  %s7580_s22 = scalar_lea.hbm %s8337_s4, 3072 }
  0x19   :  { %s72_s18 = sshll.u32 %s7863_s17, 4  ;;  %p7581_p8 = scmp.ne.s32.totalorder %s8337_s4, %s7580_s22  ;;  %s73_s18 = int_to_ptr.vmem [resolvable:$true] %s72_s18 }
  0x1a   :  { %p7584_p9 = scmp.lt.u32.totalorder %s7580_s22, %s8337_s4 }
  0x1c   :  { %p7586_p10 = pnand %p7584_p9, %p7581_p8 }
  0x1e   :  { %7589 = shalt.err (!%p7586_p10)
}
  0x1f   :  { %s7590_s27 = scalar_lea.vmem %s73_s18, 3072  ;;  %p7595_p12 = scmp.lt.s32.totalorder %s73_s18, %s73_s18 }
  0x20   :  { %p7591_p11 = scmp.ne.s32.totalorder %s73_s18, %s7590_s27  ;;  %p7596_p13 = scmp.lt.s32.totalorder %s7590_s27, %s7590_s27 }
  0x22   :  { %p7597_p0 = por %p7596_p13, %p7595_p12 }
  0x24   :  { %p7598_p1 = pnand %p7597_p0, %p7591_p11 }
  0x26   :  { %7601 = shalt.err (!%p7598_p1)
}
  0x27   :  { %s7864_s2 = smov 192   ;;  %s7865_s19 = smov 12  }
  0x28   :  { %78 = dma.hbm_to_vmem [thread:$0]  %s8337_s4, 3072, %s73_s18, [#allocation9], %s7864_s2, %s7864_s2, %s7865_s19  }
  0x29   :  { %s7866_s17 = smov [#allocation11]   ;;  %s7867_s21 = smov [#allocation14]  }
  0x2a   :  { %s96_s20 = sshll.u32 %s7866_s17, 4  ;;  %s119_s23 = sshll.u32 %s7867_s21, 4  ;;  %s97_s20 = int_to_ptr.vmem [resolvable:$true] %s96_s20  ;;  %s120_s23 = int_to_ptr.vmem [resolvable:$true] %s119_s23 }
  0x2b   :  { %s7602_s25 = scalar_lea.hbm %s8339_s6, 36864 }
  0x2c   :  { %p7603_p2 = scmp.ne.s32.totalorder %s8339_s6, %s7602_s25  ;;  %p7606_p3 = scmp.lt.u32.totalorder %s7602_s25, %s8339_s6 }
  0x2e   :  { %p7608_p4 = pnand %p7606_p3, %p7603_p2 }
  0x30   :  { %7611 = shalt.err (!%p7608_p4)
}
  0x31   :  { %s7612_s4 = scalar_lea.vmem %s97_s20, 36864  ;;  %p7617_p6 = scmp.lt.s32.totalorder %s97_s20, %s97_s20 }
  0x32   :  { %p7613_p5 = scmp.ne.s32.totalorder %s97_s20, %s7612_s4  ;;  %p7618_p7 = scmp.lt.s32.totalorder %s7612_s4, %s7612_s4 }
  0x34   :  { %p7619_p8 = por %p7618_p7, %p7617_p6 }
  0x36   :  { %p7620_p9 = pnand %p7619_p8, %p7613_p5 }
  0x38   :  { %7623 = shalt.err (!%p7620_p9)
}
  0x39   :  { %s7868_s18 = smov 384   ;;  %s7869_s2 = smov 24  }
  0x3a   :  { %102 = dma.hbm_to_vmem [thread:$0]  %s8339_s6, 36864, %s97_s20, [#allocation12], %s7868_s18, %s7868_s18, %s7869_s2  }
  0x3b   :  { %s7624_s16 = scalar_lea.hbm %s8341_s8, 32 }
  0x3c   :  { %p7625_p10 = scmp.ne.s32.totalorder %s8341_s8, %s7624_s16  ;;  %p7628_p11 = scmp.lt.u32.totalorder %s7624_s16, %s8341_s8 }
  0x3e   :  { %p7630_p12 = pnand %p7628_p11, %p7625_p10 }
  0x40   :  { %7633 = shalt.err (!%p7630_p12)
}
  0x41   :  { %s7634_s25 = scalar_lea.vmem %s120_s23, 32  ;;  %p7639_p0 = scmp.lt.s32.totalorder %s120_s23, %s120_s23 }
  0x42   :  { %p7635_p13 = scmp.ne.s32.totalorder %s120_s23, %s7634_s25  ;;  %p7640_p1 = scmp.lt.s32.totalorder %s7634_s25, %s7634_s25 }
  0x44   :  { %p7641_p2 = por %p7640_p1, %p7639_p0 }
  0x46   :  { %p7642_p3 = pnand %p7641_p2, %p7635_p13 }
  0x48   :  { %7645 = shalt.err (!%p7642_p3)
}
  0x49   :  { %122 = dma.hbm_to_vmem [thread:$0]  %s8341_s8, 32, %s120_s23, [#allocation15]  }
  0x4a   :  { %s7870_s26 = smov [#allocation17]   ;;  %s7871_s4 = smov [#allocation2]  }
  0x4b   :  { %s139_s27 = sshll.u32 %s7870_s26, 4  ;;  %s36_s19 = sshll.u32 %s7871_s4, 4  ;;  %s140_s27 = int_to_ptr.vmem [resolvable:$true] %s139_s27  ;;  %s8020_s19 = int_to_ptr.vmem [resolvable:$true] %s36_s19 }
  0x4c   :  { %s7646_s29 = scalar_lea.hbm %s8343_s10, 48 }
  0x4d   :  { %p7647_p4 = scmp.ne.s32.totalorder %s8343_s10, %s7646_s29  ;;  %p7650_p5 = scmp.lt.u32.totalorder %s7646_s29, %s8343_s10 }
  0x4f   :  { %p7652_p6 = pnand %p7650_p5, %p7647_p4 }
  0x51   :  { %7655 = shalt.err (!%p7652_p6)
}
  0x52   :  { %s7656_s8 = scalar_lea.vmem %s140_s27, 48  ;;  %s7660_s23 = scalar_lea.vmem %s140_s27, 64 }
  0x53   :  { %p7657_p7 = scmp.ne.s32.totalorder %s140_s27, %s7656_s8  ;;  %p7661_p8 = scmp.lt.s32.totalorder %s140_s27, %s140_s27 }
  0x54   :  { %p7662_p9 = scmp.lt.s32.totalorder %s7660_s23, %s7656_s8 }
  0x56   :  { %p7663_p10 = por %p7662_p9, %p7661_p8 }
  0x58   :  { %p7664_p11 = pnand %p7663_p10, %p7657_p7 }
  0x5a   :  { %7667 = shalt.err (!%p7664_p11)
}
  0x5b   :  { %142 = dma.hbm_to_vmem [thread:$0]  %s8343_s10, 48, %s140_s27, [#allocation18]  }
  0x5c   :  { %s7668_s26 = scalar_lea.hbm %s8334_s1, 24576 }
  0x5d   :  { %p7669_p12 = scmp.ne.s32.totalorder %s8334_s1, %s7668_s26  ;;  %p7672_p13 = scmp.lt.u32.totalorder %s7668_s26, %s8334_s1 }
  0x5f   :  { %p7674_p0 = pnand %p7672_p13, %p7669_p12 }
  0x61   :  { %7677 = shalt.err (!%p7674_p0)
}
  0x62   :  { %s7678_s16 = scalar_lea.vmem %s8020_s19, 24576  ;;  %p7683_p2 = scmp.lt.s32.totalorder %s8020_s19, %s8020_s19 }
  0x63   :  { %p7679_p1 = scmp.ne.s32.totalorder %s8020_s19, %s7678_s16  ;;  %p7684_p3 = scmp.lt.s32.totalorder %s7678_s16, %s7678_s16 }
  0x65   :  { %p7685_p4 = por %p7684_p3, %p7683_p2 }
  0x67   :  { %p7686_p5 = pnand %p7685_p4, %p7679_p1 }
  0x69   :  { %7689 = shalt.err (!%p7686_p5)
}
  0x6a   :  { %s7872_s10 = smov 256   ;;  %s7873_s27 = smov 16  }
  0x6b   :  { %42 = dma.hbm_to_vmem [thread:$0]  %s8334_s1, 24576, %s8020_s19, [#allocation3], %s7872_s10, %s7872_s10, %s7873_s27  }
  0x6c   :  { %s7874_s22 = smov [#allocation7]   ;;  %s7690_s25 = scalar_lea.hbm %s8336_s3, 2048 }
  0x6d   :  { %s60_s8 = sshll.u32 %s7874_s22, 4  ;;  %p7691_p6 = scmp.ne.s32.totalorder %s8336_s3, %s7690_s25  ;;  %s61_s8 = int_to_ptr.vmem [resolvable:$true] %s60_s8 }
  0x6e   :  { %p7694_p7 = scmp.lt.u32.totalorder %s7690_s25, %s8336_s3 }
  0x70   :  { %p7696_p8 = pnand %p7694_p7, %p7691_p6 }
  0x72   :  { %7699 = shalt.err (!%p7696_p8)
}
  0x73   :  { %s7700_s30 = scalar_lea.vmem %s61_s8, 2048  ;;  %p7705_p10 = scmp.lt.s32.totalorder %s61_s8, %s61_s8 }
  0x74   :  { %p7701_p9 = scmp.ne.s32.totalorder %s61_s8, %s7700_s30  ;;  %p7706_p11 = scmp.lt.s32.totalorder %s7700_s30, %s7700_s30 }
  0x76   :  { %p7707_p12 = por %p7706_p11, %p7705_p10 }
  0x78   :  { %p7708_p13 = pnand %p7707_p12, %p7701_p9 }
  0x7a   :  { %7711 = shalt.err (!%p7708_p13)
}
  0x7b   :  { %s7875_s1 = smov 64   ;;  %s7876_s19 = smov 4  }
  0x7c   :  { %66 = dma.hbm_to_vmem [thread:$0]  %s8336_s3, 2048, %s61_s8, [#allocation6], %s7875_s1, %s7875_s1, %s7876_s19  }
  0x7d   :  { %s7877_s16 = smov [#allocation10]   ;;  %s7878_s27 = smov [#allocation13]  }
  0x7e   :  { %s84_s10 = sshll.u32 %s7877_s16, 4  ;;  %s109_s17 = sshll.u32 %s7878_s27, 4  ;;  %s85_s10 = int_to_ptr.vmem [resolvable:$true] %s84_s10  ;;  %s110_s17 = int_to_ptr.vmem [resolvable:$true] %s109_s17 }
  0x7f   :  { %s7712_s23 = scalar_lea.hbm %s8338_s5, 12288 }
  0x80   :  { %p7713_p0 = scmp.ne.s32.totalorder %s8338_s5, %s7712_s23  ;;  %p7716_p1 = scmp.lt.u32.totalorder %s7712_s23, %s8338_s5 }
  0x82   :  { %p7718_p2 = pnand %p7716_p1, %p7713_p0 }
  0x84   :  { %7721 = shalt.err (!%p7718_p2)
}
  0x85   :  { %s7722_s3 = scalar_lea.vmem %s85_s10, 12288  ;;  %p7727_p4 = scmp.lt.s32.totalorder %s85_s10, %s85_s10 }
  0x86   :  { %p7723_p3 = scmp.ne.s32.totalorder %s85_s10, %s7722_s3  ;;  %p7728_p5 = scmp.lt.s32.totalorder %s7722_s3, %s7722_s3 }
  0x88   :  { %p7729_p6 = por %p7728_p5, %p7727_p4 }
  0x8a   :  { %p7730_p7 = pnand %p7729_p6, %p7723_p3 }
  0x8c   :  { %7733 = shalt.err (!%p7730_p7)
}
  0x8d   :  { %90 = dma.hbm_to_vmem [thread:$0]  %s8338_s5, 12288, %s85_s10, [#allocation9], %s7868_s18, %s7868_s18, %s7869_s2  }
  0x8e   :  { %s7734_s1 = scalar_lea.hbm %s8340_s7, 64 }
  0x8f   :  { %p7735_p8 = scmp.ne.s32.totalorder %s8340_s7, %s7734_s1  ;;  %p7738_p9 = scmp.lt.u32.totalorder %s7734_s1, %s8340_s7 }
  0x91   :  { %p7740_p10 = pnand %p7738_p9, %p7735_p8 }
  0x93   :  { %7743 = shalt.err (!%p7740_p10)
}
  0x94   :  { %s7744_s27 = scalar_lea.vmem %s110_s17, 64  ;;  %p7749_p12 = scmp.lt.s32.totalorder %s110_s17, %s110_s17 }
  0x95   :  { %p7745_p11 = scmp.ne.s32.totalorder %s110_s17, %s7744_s27  ;;  %p7750_p13 = scmp.lt.s32.totalorder %s7744_s27, %s7744_s27 }
  0x97   :  { %p7751_p0 = por %p7750_p13, %p7749_p12 }
  0x99   :  { %p7752_p1 = pnand %p7751_p0, %p7745_p11 }
  0x9b   :  { %7755 = shalt.err (!%p7752_p1)
}
  0x9c   :  { %112 = dma.hbm_to_vmem [thread:$0]  %s8340_s7, 64, %s110_s17, [#allocation12]  }
  0x9d   :  { %s7879_s2 = smov [#allocation16]   ;;  %s7880_s21 = smov [#allocation19]  }
  0x9e   :  { %s129_s10 = sshll.u32 %s7879_s2, 4  ;;  %s149_s22 = sshll.u32 %s7880_s21, 4  ;;  %s130_s10 = int_to_ptr.vmem [resolvable:$true] %s129_s10  ;;  %s150_s22 = int_to_ptr.vmem [resolvable:$true] %s149_s22 }
  0x9f   :  { %s7756_s25 = scalar_lea.hbm %s8342_s9, 16 }
  0xa0   :  { %p7757_p2 = scmp.ne.s32.totalorder %s8342_s9, %s7756_s25  ;;  %p7760_p3 = scmp.lt.u32.totalorder %s7756_s25, %s8342_s9 }
  0xa2   :  { %p7762_p4 = pnand %p7760_p3, %p7757_p2 }
  0xa4   :  { %7765 = shalt.err (!%p7762_p4)
}
  0xa5   :  { %s7766_s7 = scalar_lea.vmem %s130_s10, 16  ;;  %s7770_s17 = scalar_lea.vmem %s130_s10, 32 }
  0xa6   :  { %p7767_p5 = scmp.ne.s32.totalorder %s130_s10, %s7766_s7  ;;  %p7771_p6 = scmp.lt.s32.totalorder %s130_s10, %s130_s10 }
  0xa7   :  { %p7772_p7 = scmp.lt.s32.totalorder %s7770_s17, %s7766_s7 }
  0xa9   :  { %p7773_p8 = por %p7772_p7, %p7771_p6 }
  0xab   :  { %p7774_p9 = pnand %p7773_p8, %p7767_p5 }
  0xad   :  { %7777 = shalt.err (!%p7774_p9)
}
  0xae   :  { %132 = dma.hbm_to_vmem [thread:$0]  %s8342_s9, 16, %s130_s10, [#allocation15]  }
  0xaf   :  { %s7778_s19 = scalar_lea.hbm %s8344_s11, 96 }
  0xb0   :  { %p7779_p10 = scmp.ne.s32.totalorder %s8344_s11, %s7778_s19  ;;  %p7782_p11 = scmp.lt.u32.totalorder %s7778_s19, %s8344_s11 }
  0xb2   :  { %p7784_p12 = pnand %p7782_p11, %p7779_p10 }
  0xb4   :  { %7787 = shalt.err (!%p7784_p12)
}
  0xb5   :  { %s7788_s5 = scalar_lea.vmem %s150_s22, 96  ;;  %p7793_p0 = scmp.lt.s32.totalorder %s150_s22, %s150_s22 }
  0xb6   :  { %p7789_p13 = scmp.ne.s32.totalorder %s150_s22, %s7788_s5  ;;  %p7794_p1 = scmp.lt.s32.totalorder %s7788_s5, %s7788_s5 }
  0xb8   :  { %p7795_p2 = por %p7794_p1, %p7793_p0 }
  0xba   :  { %p7796_p3 = pnand %p7795_p2, %p7789_p13 }
  0xbc   :  { %7799 = shalt.err (!%p7796_p3)
}
  0xbd   :  { %152 = dma.hbm_to_vmem [thread:$0]  %s8344_s11, 96, %s150_s22, [#allocation18]  }
  0xbe   :  { %s7881_s2 = smov [#allocation20]   ;;  %s7800_s24 = scalar_lea.hbm %s8345_s12, 96 }
  0xbf   :  { %s159_s10 = sshll.u32 %s7881_s2, 4  ;;  %p7801_p4 = scmp.ne.s32.totalorder %s8345_s12, %s7800_s24  ;;  %s160_s10 = int_to_ptr.vmem [resolvable:$true] %s159_s10 }
  0xc0   :  { %p7804_p5 = scmp.lt.u32.totalorder %s7800_s24, %s8345_s12 }
  0xc2   :  { %p7806_p6 = pnand %p7804_p5, %p7801_p4 }
  0xc4   :  { %7809 = shalt.err (!%p7806_p6)
}
  0xc5   :  { %s7810_s8 = scalar_lea.vmem %s160_s10, 96  ;;  %p7815_p8 = scmp.lt.s32.totalorder %s160_s10, %s160_s10 }
  0xc6   :  { %p7811_p7 = scmp.ne.s32.totalorder %s160_s10, %s7810_s8  ;;  %p7816_p9 = scmp.lt.s32.totalorder %s7810_s8, %s7810_s8 }
  0xc8   :  { %p7817_p10 = por %p7816_p9, %p7815_p8 }
  0xca   :  { %p7818_p11 = pnand %p7817_p10, %p7811_p7 }
  0xcc   :  { %7821 = shalt.err (!%p7818_p11)
}
  0xcd   :  { %162 = dma.hbm_to_vmem [thread:$0]  %s8345_s12, 96, %s160_s10, [#allocation21]  }
  0xce   :  { %7844 = dma.done.wait [#allocation3], 24576  }
  0xcf   :  { %7845 = vsyncadd [#allocation3], 4294942720 }
  0xd0   :  { %7846 = dma.done.wait [#allocation6], 10240  }
  0xd1   :  { %7847 = vsyncadd [#allocation6], 4294957056 }
  0xd2   :  { %7848 = dma.done.wait [#allocation9], 15360  }
  0xd3   :  { %7849 = vsyncadd [#allocation9], 4294951936 }
  0xd4   :  { %7850 = dma.done.wait [#allocation12], 36928  }
  0xd5   :  { %7851 = vsyncadd [#allocation12], 4294930368 }
  0xd6   :  { %7852 = dma.done.wait [#allocation15], 48  }
  0xd7   :  { %7853 = vsyncadd [#allocation15], 4294967248 }
  0xd8   :  { %7854 = dma.done.wait [#allocation18], 144  }
  0xd9   :  { %7855 = vsyncadd [#allocation18], 4294967152 }
  0xda   :  { %7856 = dma.done.wait [#allocation21], 96  }
  0xdb   :  { %7857 = vsyncadd [#allocation21], 4294967200  ;;  %v6483_v0 = vld [vmem:[#allocation2 + $0x4] ss:$16 sps:$4 sm:$0xff]   ;;  %v6487_v2 = vld [vmem:[#allocation2] ss:$16 sps:$4 sm:$0xff]  }
  0xdc   :  { %v6485_v1 = vld [vmem:[#allocation2 + $0x204] ss:$16 sps:$4 sm:$0xff]   ;;  %1410 = vmatprep.subr.bf16.mxu1 %v6483_v0  ;;  %v6488_v3 = vld [vmem:[#allocation2 + $0x200] ss:$16 sps:$4 sm:$0xff]   ;;  %vm7884_vm0 = vmmov 0   ;;  %s7885_s19 = smov [#allocation22]  }
  0xdd   :  { %1453 = vmatprep.subr.bf16.mxu0 %v6485_v1  ;;  %v6489_v4 = vld [vmem:[#allocation2 + $0x24] ss:$16 sps:$4 sm:$0xff]   ;;  %1411 = vmatpush1.bf16.msra.mxu1 %v6487_v2  ;;  %v6493_v6 = vld [vmem:[#allocation2 + $0x20] ss:$16 sps:$4 sm:$0xff]   ;;  %s5625_s28 = sshll.u32 %s7885_s19, 4  ;;  %s5626_s28 = int_to_ptr.vmem [resolvable:$true] %s5625_s28 }
  0xde   :  { %1454 = vmatpush1.bf16.msra.mxu0 %v6488_v3  ;;  %v6491_v5 = vld [vmem:[#allocation2 + $0x224] ss:$16 sps:$4 sm:$0xff]   ;;  %1412 = vmatprep.subr.bf16.mxu1 %v6489_v4  ;;  %v6494_v7 = vld [vmem:[#allocation2 + $0x220] ss:$16 sps:$4 sm:$0xff]   ;;  %v6590_v3 = vld [vmem:[#allocation2 + $0xc] ss:$16 sps:$4 sm:$0xff]   ;;  %p7827_p13 = scmp.lt.s32.totalorder %s5626_s28, %s5626_s28 }
  0xdf   :  { %1455 = vmatprep.subr.bf16.mxu0 %v6491_v5  ;;  %v6495_v8 = vld [vmem:[#allocation2 + $0x44] ss:$16 sps:$4 sm:$0xff]   ;;  %v6499_v10 = vld [vmem:[#allocation2 + $0x40] ss:$16 sps:$4 sm:$0xff]   ;;  %s7822_s29 = scalar_lea.vmem %s5626_s28, 256 }
  0xe0   :  { %v6497_v9 = vld [vmem:[#allocation2 + $0x244] ss:$16 sps:$4 sm:$0xff]   ;;  %v6500_v11 = vld [vmem:[#allocation2 + $0x240] ss:$16 sps:$4 sm:$0xff]   ;;  %p7823_p12 = scmp.ne.s32.totalorder %s5626_s28, %s7822_s29  ;;  %p7828_p0 = scmp.lt.s32.totalorder %s7822_s29, %s7822_s29 }
  0xe1   :  { %1413 = vmatpush1.bf16.msra.mxu1 %v6493_v6  ;;  %v6501_v12 = vld [vmem:[#allocation2 + $0x64] ss:$16 sps:$4 sm:$0xff]   ;;  %v6505_v14 = vld [vmem:[#allocation2 + $0x60] ss:$16 sps:$4 sm:$0xff]  }
  0xe2   :  { %1456 = vmatpush1.bf16.msra.mxu0 %v6494_v7  ;;  %1414 = vmatprep.subr.bf16.mxu1 %v6495_v8  ;;  %v6503_v13 = vld [vmem:[#allocation2 + $0x264] ss:$16 sps:$4 sm:$0xff]   ;;  %v6506_v15 = vld [vmem:[#allocation2 + $0x260] ss:$16 sps:$4 sm:$0xff]   ;;  %v6588_v7 = vld [vmem:[#allocation2 + $0x8] ss:$16 sps:$4 sm:$0xff]   ;;  %p7829_p1 = por %p7828_p0, %p7827_p13 }
  0xe3   :  { %1457 = vmatprep.subr.bf16.mxu0 %v6497_v9  ;;  %v6507_v16 = vld [vmem:[#allocation2 + $0x84] ss:$16 sps:$4 sm:$0xff]   ;;  %v6511_v18 = vld [vmem:[#allocation2 + $0x80] ss:$16 sps:$4 sm:$0xff]   ;;  %v6596_v9 = vld [vmem:[#allocation2 + $0x2c] ss:$16 sps:$4 sm:$0xff]  }
  0xe4   :  { %v6509_v17 = vld [vmem:[#allocation2 + $0x284] ss:$16 sps:$4 sm:$0xff]   ;;  %v6512_v19 = vld [vmem:[#allocation2 + $0x280] ss:$16 sps:$4 sm:$0xff]   ;;  %p7830_p2 = pnand %p7829_p1, %p7823_p12 }
  0xe5   :  { %1415 = vmatpush1.bf16.msra.mxu1 %v6499_v10  ;;  %v6513_v20 = vld [vmem:[#allocation2 + $0xa4] ss:$16 sps:$4 sm:$0xff]   ;;  %v6517_v22 = vld [vmem:[#allocation2 + $0xa0] ss:$16 sps:$4 sm:$0xff]  }
  0xe6   :  { %1458 = vmatpush1.bf16.msra.mxu0 %v6500_v11  ;;  %1416 = vmatprep.subr.bf16.mxu1 %v6501_v12  ;;  %v6515_v21 = vld [vmem:[#allocation2 + $0x2a4] ss:$16 sps:$4 sm:$0xff]   ;;  %v6518_v23 = vld [vmem:[#allocation2 + $0x2a0] ss:$16 sps:$4 sm:$0xff]   ;;  %v6594_v11 = vld [vmem:[#allocation2 + $0x28] ss:$16 sps:$4 sm:$0xff]  }
  0xe7   :  { %1459 = vmatprep.subr.bf16.mxu0 %v6503_v13  ;;  %v6519_v24 = vld [vmem:[#allocation2 + $0xc4] ss:$16 sps:$4 sm:$0xff]   ;;  %v6523_v26 = vld [vmem:[#allocation2 + $0xc0] ss:$16 sps:$4 sm:$0xff]   ;;  %v6602_v13 = vld [vmem:[#allocation2 + $0x4c] ss:$16 sps:$4 sm:$0xff]  }
  0xe8   :  { %v6521_v25 = vld [vmem:[#allocation2 + $0x2c4] ss:$16 sps:$4 sm:$0xff]   ;;  %v6524_v27 = vld [vmem:[#allocation2 + $0x2c0] ss:$16 sps:$4 sm:$0xff]  }
  0xe9   :  { %1417 = vmatpush1.bf16.msra.mxu1 %v6505_v14  ;;  %v6525_v28 = vld [vmem:[#allocation2 + $0xe4] ss:$16 sps:$4 sm:$0xff]   ;;  %v6529_v30 = vld [vmem:[#allocation2 + $0xe0] ss:$16 sps:$4 sm:$0xff]  }
  0xea   :  { %1460 = vmatpush1.bf16.msra.mxu0 %v6506_v15  ;;  %1418 = vmatprep.subr.bf16.mxu1 %v6507_v16  ;;  %v6527_v29 = vld [vmem:[#allocation2 + $0x2e4] ss:$16 sps:$4 sm:$0xff]   ;;  %v6530_v31 = vld [vmem:[#allocation2 + $0x2e0] ss:$16 sps:$4 sm:$0xff]   ;;  %v6600_v15 = vld [vmem:[#allocation2 + $0x48] ss:$16 sps:$4 sm:$0xff]  }
  0xeb   :  { %1461 = vmatprep.subr.bf16.mxu0 %v6509_v17  ;;  %v6531_v32 = vld [vmem:[#allocation2 + $0x104] ss:$16 sps:$4 sm:$0xff]   ;;  %v6535_v34 = vld [vmem:[#allocation2 + $0x100] ss:$16 sps:$4 sm:$0xff]   ;;  %v6608_v17 = vld [vmem:[#allocation2 + $0x6c] ss:$16 sps:$4 sm:$0xff]  }
  0xec   :  { %v6533_v33 = vld [vmem:[#allocation2 + $0x304] ss:$16 sps:$4 sm:$0xff]   ;;  %v6536_v35 = vld [vmem:[#allocation2 + $0x300] ss:$16 sps:$4 sm:$0xff]  }
  0xed   :  { %1419 = vmatpush1.bf16.msra.mxu1 %v6511_v18  ;;  %v6537_v36 = vld [vmem:[#allocation2 + $0x124] ss:$16 sps:$4 sm:$0xff]   ;;  %v6541_v38 = vld [vmem:[#allocation2 + $0x120] ss:$16 sps:$4 sm:$0xff]  }
  0xee   :  { %1462 = vmatpush1.bf16.msra.mxu0 %v6512_v19  ;;  %1420 = vmatprep.subr.bf16.mxu1 %v6513_v20  ;;  %v6539_v37 = vld [vmem:[#allocation2 + $0x324] ss:$16 sps:$4 sm:$0xff]   ;;  %v6542_v39 = vld [vmem:[#allocation2 + $0x320] ss:$16 sps:$4 sm:$0xff]   ;;  %v6606_v19 = vld [vmem:[#allocation2 + $0x68] ss:$16 sps:$4 sm:$0xff]  }
  0xef   :  { %1463 = vmatprep.subr.bf16.mxu0 %v6515_v21  ;;  %v6543_v40 = vld [vmem:[#allocation2 + $0x144] ss:$16 sps:$4 sm:$0xff]   ;;  %v6547_v42 = vld [vmem:[#allocation2 + $0x140] ss:$16 sps:$4 sm:$0xff]   ;;  %v6614_v21 = vld [vmem:[#allocation2 + $0x8c] ss:$16 sps:$4 sm:$0xff]  }
  0xf0   :  { %v6545_v41 = vld [vmem:[#allocation2 + $0x344] ss:$16 sps:$4 sm:$0xff]   ;;  %v6548_v43 = vld [vmem:[#allocation2 + $0x340] ss:$16 sps:$4 sm:$0xff]  }
  0xf1   :  { %1421 = vmatpush1.bf16.msra.mxu1 %v6517_v22  ;;  %v6549_v44 = vld [vmem:[#allocation2 + $0x164] ss:$16 sps:$4 sm:$0xff]   ;;  %v6553_v46 = vld [vmem:[#allocation2 + $0x160] ss:$16 sps:$4 sm:$0xff]  }
  0xf2   :  { %1464 = vmatpush1.bf16.msra.mxu0 %v6518_v23  ;;  %1422 = vmatprep.subr.bf16.mxu1 %v6519_v24  ;;  %v6551_v45 = vld [vmem:[#allocation2 + $0x364] ss:$16 sps:$4 sm:$0xff]   ;;  %v6554_v47 = vld [vmem:[#allocation2 + $0x360] ss:$16 sps:$4 sm:$0xff]   ;;  %v6612_v23 = vld [vmem:[#allocation2 + $0x88] ss:$16 sps:$4 sm:$0xff]  }
  0xf3   :  { %1465 = vmatprep.subr.bf16.mxu0 %v6521_v25  ;;  %v6555_v48 = vld [vmem:[#allocation2 + $0x184] ss:$16 sps:$4 sm:$0xff]   ;;  %v6559_v52 = vld [vmem:[#allocation2 + $0x180] ss:$16 sps:$4 sm:$0xff]   ;;  %v6620_v25 = vld [vmem:[#allocation2 + $0xac] ss:$16 sps:$4 sm:$0xff]  }
  0xf4   :  { %v6581_v49 = vld [vmem:[%s8333_s0 + $0x4] ss:$24 sps:$4 sm:$0xff]   ;;  %v6560_v53 = vld [vmem:[#allocation2 + $0x380] ss:$16 sps:$4 sm:$0xff]  }
  0xf5   :  { %1423 = vmatpush1.bf16.msra.mxu1 %v6523_v26  ;;  %v6557_v50 = vld [vmem:[#allocation2 + $0x384] ss:$16 sps:$4 sm:$0xff]   ;;  %1442 = vmatprep.mubr.bf16.mxu1 %v6581_v49  ;;  %v6565_v56 = vld [vmem:[#allocation2 + $0x1a0] ss:$16 sps:$4 sm:$0xff]  }
  0xf6   :  { %1466 = vmatpush1.bf16.msra.mxu0 %v6524_v27  ;;  %1424 = vmatprep.subr.bf16.mxu1 %v6525_v28  ;;  %v8132_v51 = vld [vmem:[%s8333_s0 + $0xc] ss:$24 sps:$4 sm:$0xff]   ;;  %v6566_v57 = vld [vmem:[#allocation2 + $0x3a0] ss:$16 sps:$4 sm:$0xff]   ;;  %v6618_v27 = vld [vmem:[#allocation2 + $0xa8] ss:$16 sps:$4 sm:$0xff]  }
  0xf7   :  { %1467 = vmatprep.subr.bf16.mxu0 %v6527_v29  ;;  %1485 = vmatprep.mubr.bf16.mxu0 %v8132_v51  ;;  %v6561_v54 = vld [vmem:[#allocation2 + $0x1a4] ss:$16 sps:$4 sm:$0xff]   ;;  %v6571_v60 = vld [vmem:[#allocation2 + $0x1c0] ss:$16 sps:$4 sm:$0xff]   ;;  %v6626_v29 = vld [vmem:[#allocation2 + $0xcc] ss:$16 sps:$4 sm:$0xff]  }
  0xf8   :  { %v6563_v55 = vld [vmem:[#allocation2 + $0x3a4] ss:$16 sps:$4 sm:$0xff]   ;;  %v6572_v61 = vld [vmem:[#allocation2 + $0x3c0] ss:$16 sps:$4 sm:$0xff]  }
  0xf9   :  { %1425 = vmatpush1.bf16.msra.mxu1 %v6529_v30  ;;  %v6567_v58 = vld [vmem:[#allocation2 + $0x1c4] ss:$16 sps:$4 sm:$0xff]   ;;  %v6577_v0 = vld [vmem:[#allocation2 + $0x1e0] ss:$16 sps:$4 sm:$0xff]  }
  0xfa   :  { %1468 = vmatpush1.bf16.msra.mxu0 %v6530_v31  ;;  %1426 = vmatprep.subr.bf16.mxu1 %v6531_v32  ;;  %v6569_v59 = vld [vmem:[#allocation2 + $0x3c4] ss:$16 sps:$4 sm:$0xff]   ;;  %v6578_v1 = vld [vmem:[#allocation2 + $0x3e0] ss:$16 sps:$4 sm:$0xff]   ;;  %v6624_v31 = vld [vmem:[#allocation2 + $0xc8] ss:$16 sps:$4 sm:$0xff]  }
  0xfb   :  { %1469 = vmatprep.subr.bf16.mxu0 %v6533_v33  ;;  %v6573_v62 = vld [vmem:[#allocation2 + $0x1e4] ss:$16 sps:$4 sm:$0xff]   ;;  %v8138_v4 = vld [vmem:[%s8333_s0] ss:$24 sps:$4 sm:$0xff]   ;;  %v6632_v33 = vld [vmem:[#allocation2 + $0xec] ss:$16 sps:$4 sm:$0xff]  }
  0xfc   :  { %v6575_v63 = vld [vmem:[#allocation2 + $0x3e4] ss:$16 sps:$4 sm:$0xff]   ;;  %v6582_v5 = vld [vmem:[%s8333_s0 + $0x8] ss:$24 sps:$4 sm:$0xff]  }
  0xfd   :  { %1427 = vmatpush1.bf16.msra.mxu1 %v6535_v34  ;;  %v6587_v2 = vld [vmem:[#allocation2 + $0x404] ss:$16 sps:$4 sm:$0xff]   ;;  %v6585_v6 = vld [vmem:[#allocation2 + $0x400] ss:$16 sps:$4 sm:$0xff]  }
  0xfe   :  { %1470 = vmatpush1.bf16.msra.mxu0 %v6536_v35  ;;  %1428 = vmatprep.subr.bf16.mxu1 %v6537_v36  ;;  %v6593_v8 = vld [vmem:[#allocation2 + $0x424] ss:$16 sps:$4 sm:$0xff]   ;;  %v6591_v10 = vld [vmem:[#allocation2 + $0x420] ss:$16 sps:$4 sm:$0xff]   ;;  %v6630_v36 = vld [vmem:[#allocation2 + $0xe8] ss:$16 sps:$4 sm:$0xff]  }
  0xff   :  { %1471 = vmatprep.subr.bf16.mxu0 %v6539_v37  ;;  %v6599_v12 = vld [vmem:[#allocation2 + $0x444] ss:$16 sps:$4 sm:$0xff]   ;;  %v6597_v14 = vld [vmem:[#allocation2 + $0x440] ss:$16 sps:$4 sm:$0xff]  }
 0x100   :  { %v6605_v16 = vld [vmem:[#allocation2 + $0x464] ss:$16 sps:$4 sm:$0xff]   ;;  %v6603_v18 = vld [vmem:[#allocation2 + $0x460] ss:$16 sps:$4 sm:$0xff]  }
 0x101   :  { %1429 = vmatpush1.bf16.msra.mxu1 %v6541_v38  ;;  %v6611_v20 = vld [vmem:[#allocation2 + $0x484] ss:$16 sps:$4 sm:$0xff]   ;;  %v6609_v22 = vld [vmem:[#allocation2 + $0x480] ss:$16 sps:$4 sm:$0xff]   ;;  %v6638_v38 = vld [vmem:[#allocation2 + $0x10c] ss:$16 sps:$4 sm:$0xff]  }
 0x102   :  { %1472 = vmatpush1.bf16.msra.mxu0 %v6542_v39  ;;  %1430 = vmatprep.subr.bf16.mxu1 %v6543_v40  ;;  %v6617_v24 = vld [vmem:[#allocation2 + $0x4a4] ss:$16 sps:$4 sm:$0xff]   ;;  %v6615_v26 = vld [vmem:[#allocation2 + $0x4a0] ss:$16 sps:$4 sm:$0xff]   ;;  %v6636_v40 = vld [vmem:[#allocation2 + $0x108] ss:$16 sps:$4 sm:$0xff]  }
 0x103   :  { %1473 = vmatprep.subr.bf16.mxu0 %v6545_v41  ;;  %v6623_v28 = vld [vmem:[#allocation2 + $0x4c4] ss:$16 sps:$4 sm:$0xff]   ;;  %v6621_v30 = vld [vmem:[#allocation2 + $0x4c0] ss:$16 sps:$4 sm:$0xff]  }
 0x104   :  { %v6629_v32 = vld [vmem:[#allocation2 + $0x4e4] ss:$16 sps:$4 sm:$0xff]   ;;  %v6627_v35 = vld [vmem:[#allocation2 + $0x4e0] ss:$16 sps:$4 sm:$0xff]  }
 0x105   :  { %1431 = vmatpush1.bf16.msra.mxu1 %v6547_v42  ;;  %v8147_v34 = vld [vmem:[%s8333_s0 + $0x14] ss:$24 sps:$4 sm:$0xff]   ;;  %v6633_v39 = vld [vmem:[#allocation2 + $0x500] ss:$16 sps:$4 sm:$0xff]  }
 0x106   :  { %1474 = vmatpush1.bf16.msra.mxu0 %v6548_v43  ;;  %1432 = vmatprep.subr.bf16.mxu1 %v6549_v44  ;;  %v6635_v37 = vld [vmem:[#allocation2 + $0x504] ss:$16 sps:$4 sm:$0xff]   ;;  %v6644_v42 = vld [vmem:[#allocation2 + $0x12c] ss:$16 sps:$4 sm:$0xff]   ;;  %v6639_v43 = vld [vmem:[#allocation2 + $0x520] ss:$16 sps:$4 sm:$0xff]  }
 0x107   :  { %1475 = vmatprep.subr.bf16.mxu0 %v6551_v45  ;;  %v6641_v41 = vld [vmem:[#allocation2 + $0x524] ss:$16 sps:$4 sm:$0xff]   ;;  %v6642_v44 = vld [vmem:[#allocation2 + $0x128] ss:$16 sps:$4 sm:$0xff]  }
 0x108   :  { %v6647_v45 = vld [vmem:[#allocation2 + $0x544] ss:$16 sps:$4 sm:$0xff]  }
 0x109   :  { %1433 = vmatpush1.bf16.msra.mxu1 %v6553_v46  ;;  %v6650_v46 = vld [vmem:[#allocation2 + $0x14c] ss:$16 sps:$4 sm:$0xff]  }
 0x10a   :  { %1476 = vmatpush1.bf16.msra.mxu0 %v6554_v47  ;;  %1434 = vmatprep.subr.bf16.mxu1 %v6555_v48  ;;  %v6645_v47 = vld [vmem:[#allocation2 + $0x540] ss:$16 sps:$4 sm:$0xff]   ;;  %v6648_v48 = vld [vmem:[#allocation2 + $0x148] ss:$16 sps:$4 sm:$0xff]  }
 0x10b   :  { %1477 = vmatprep.subr.bf16.mxu0 %v6557_v50  ;;  %v6656_v50 = vld [vmem:[#allocation2 + $0x16c] ss:$16 sps:$4 sm:$0xff]  }
 0x10d   :  { %1435 = vmatpush1.bf16.msra.mxu1 %v6559_v52  ;;  %v6651_v52 = vld [vmem:[#allocation2 + $0x560] ss:$16 sps:$4 sm:$0xff]  }
 0x10e   :  { %1478 = vmatpush1.bf16.msra.mxu0 %v6560_v53  ;;  %1436 = vmatprep.subr.bf16.mxu1 %v6561_v54  ;;  %v6654_v53 = vld [vmem:[#allocation2 + $0x168] ss:$16 sps:$4 sm:$0xff]   ;;  %v6659_v54 = vld [vmem:[#allocation2 + $0x584] ss:$16 sps:$4 sm:$0xff]  }
 0x10f   :  { %1479 = vmatprep.subr.bf16.mxu0 %v6563_v55  ;;  %v6662_v55 = vld [vmem:[#allocation2 + $0x18c] ss:$16 sps:$4 sm:$0xff]  }
 0x111   :  { %1437 = vmatpush1.bf16.msra.mxu1 %v6565_v56  ;;  %v6657_v56 = vld [vmem:[#allocation2 + $0x580] ss:$16 sps:$4 sm:$0xff]  }
 0x112   :  { %1480 = vmatpush1.bf16.msra.mxu0 %v6566_v57  ;;  %1438 = vmatprep.subr.bf16.mxu1 %v6567_v58  ;;  %v6660_v57 = vld [vmem:[#allocation2 + $0x188] ss:$16 sps:$4 sm:$0xff]   ;;  %v6665_v58 = vld [vmem:[#allocation2 + $0x5a4] ss:$16 sps:$4 sm:$0xff]  }
 0x113   :  { %1481 = vmatprep.subr.bf16.mxu0 %v6569_v59  ;;  %v6668_v59 = vld [vmem:[#allocation2 + $0x1ac] ss:$16 sps:$4 sm:$0xff]  }
 0x115   :  { %1439 = vmatpush1.bf16.msra.mxu1 %v6571_v60  ;;  %v6663_v60 = vld [vmem:[#allocation2 + $0x5a0] ss:$16 sps:$4 sm:$0xff]  }
 0x116   :  { %1482 = vmatpush1.bf16.msra.mxu0 %v6572_v61  ;;  %1440 = vmatprep.subr.bf16.mxu1 %v6573_v62  ;;  %v6666_v61 = vld [vmem:[#allocation2 + $0x1a8] ss:$16 sps:$4 sm:$0xff]   ;;  %v6671_v62 = vld [vmem:[#allocation2 + $0x5c4] ss:$16 sps:$4 sm:$0xff]  }
 0x117   :  { %1483 = vmatprep.subr.bf16.mxu0 %v6575_v63  ;;  %v6674_v63 = vld [vmem:[#allocation2 + $0x1cc] ss:$16 sps:$4 sm:$0xff]  }
 0x119   :  { %1441 = vmatpush1.bf16.msra.mxu1 %v6577_v0  ;;  %v6669_v0 = vld [vmem:[#allocation2 + $0x5c0] ss:$16 sps:$4 sm:$0xff]  }
 0x11a   :  { %1484 = vmatpush1.bf16.msra.mxu0 %v6578_v1  ;;  %1539 = vmatprep.subr.bf16.mxu1 %v6590_v3  ;;  %v6672_v1 = vld [vmem:[#allocation2 + $0x1c8] ss:$16 sps:$4 sm:$0xff]   ;;  %v6680_v3 = vld [vmem:[#allocation2 + $0x1ec] ss:$16 sps:$4 sm:$0xff]  }
 0x11b   :  { %1496 = vmatprep.subr.bf16.mxu0 %v6587_v2  ;;  %v6677_v2 = vld [vmem:[#allocation2 + $0x5e4] ss:$16 sps:$4 sm:$0xff]  }
 0x11c   :  { %1443 = vmatmul.mubr.bf16.vlgmr.msra.gmra.mrb[0].mxu1 %v8138_v4 }
 0x11d   :  { %1486 = vmatmul.mubr.bf16.vlgmr.msra.gmra.mrb[0].mxu0 %v6582_v5  ;;  %1540 = vmatpush1.bf16.msra.mxu1 %v6588_v7  ;;  %v6675_v5 = vld [vmem:[#allocation2 + $0x5e0] ss:$16 sps:$4 sm:$0xff]   ;;  %v6686_v7 = vld [vmem:[#allocation2 + $0x20c] ss:$16 sps:$4 sm:$0xff]  }
 0x11e   :  { %1497 = vmatpush1.bf16.msra.mxu0 %v6585_v6  ;;  %1541 = vmatprep.subr.bf16.mxu1 %v6596_v9  ;;  %v6678_v6 = vld [vmem:[#allocation2 + $0x1e8] ss:$16 sps:$4 sm:$0xff]  }
 0x11f   :  { %1498 = vmatprep.subr.bf16.mxu0 %v6593_v8  ;;  %1571 = vmatprep.mubr.bf16.mxu1 %v6581_v49  ;;  %v6653_v49 = vld [vmem:[#allocation2 + $0x564] ss:$16 sps:$4 sm:$0xff]   ;;  %v6681_v8 = vld [vmem:[%s8333_s0 + $0x10] ss:$24 sps:$4 sm:$0xff]  }
 0x120   :  { %1528 = vmatprep.mubr.bf16.mxu0 %v8147_v34  ;;  %v6684_v9 = vld [vmem:[#allocation2 + $0x208] ss:$16 sps:$4 sm:$0xff]  }
 0x121   :  { %1542 = vmatpush1.bf16.msra.mxu1 %v6594_v11  ;;  %v6687_v11 = vld [vmem:[#allocation2 + $0x228] ss:$16 sps:$4 sm:$0xff]  }
 0x122   :  { %1499 = vmatpush1.bf16.msra.mxu0 %v6591_v10  ;;  %1543 = vmatprep.subr.bf16.mxu1 %v6602_v13  ;;  %v6689_v10 = vld [vmem:[#allocation2 + $0x22c] ss:$16 sps:$4 sm:$0xff]   ;;  %v6690_v13 = vld [vmem:[#allocation2 + $0x248] ss:$16 sps:$4 sm:$0xff]  }
 0x123   :  { %1500 = vmatprep.subr.bf16.mxu0 %v6599_v12  ;;  %v6692_v12 = vld [vmem:[#allocation2 + $0x24c] ss:$16 sps:$4 sm:$0xff]  }
 0x125   :  { %1544 = vmatpush1.bf16.msra.mxu1 %v6600_v15  ;;  %v6693_v15 = vld [vmem:[#allocation2 + $0x268] ss:$16 sps:$4 sm:$0xff]  }
 0x126   :  { %1501 = vmatpush1.bf16.msra.mxu0 %v6597_v14  ;;  %1545 = vmatprep.subr.bf16.mxu1 %v6608_v17  ;;  %v6695_v14 = vld [vmem:[#allocation2 + $0x26c] ss:$16 sps:$4 sm:$0xff]   ;;  %v6696_v17 = vld [vmem:[#allocation2 + $0x288] ss:$16 sps:$4 sm:$0xff]  }
 0x127   :  { %1502 = vmatprep.subr.bf16.mxu0 %v6605_v16  ;;  %v6698_v16 = vld [vmem:[#allocation2 + $0x28c] ss:$16 sps:$4 sm:$0xff]  }
 0x129   :  { %1546 = vmatpush1.bf16.msra.mxu1 %v6606_v19  ;;  %v6699_v19 = vld [vmem:[#allocation2 + $0x2a8] ss:$16 sps:$4 sm:$0xff]  }
 0x12a   :  { %1503 = vmatpush1.bf16.msra.mxu0 %v6603_v18  ;;  %1547 = vmatprep.subr.bf16.mxu1 %v6614_v21  ;;  %v6701_v18 = vld [vmem:[#allocation2 + $0x2ac] ss:$16 sps:$4 sm:$0xff]  }
 0x12b   :  { %1504 = vmatprep.subr.bf16.mxu0 %v6611_v20  ;;  %v6702_v20 = vld [vmem:[#allocation2 + $0x2c8] ss:$16 sps:$4 sm:$0xff]   ;;  %v6707_v21 = vld [vmem:[#allocation2 + $0x2ec] ss:$16 sps:$4 sm:$0xff]  }
 0x12d   :  { %1548 = vmatpush1.bf16.msra.mxu1 %v6612_v23  ;;  %v6785_v23 = vld [vmem:[#allocation5 + $0x14] ss:$8 sps:$4 sm:$0xff]  }
 0x12e   :  { %1505 = vmatpush1.bf16.msra.mxu0 %v6609_v22  ;;  %1549 = vmatprep.subr.bf16.mxu1 %v6620_v25  ;;  %v6782_v22 = vld [vmem:[#allocation5 + $0x4] ss:$8 sps:$4 sm:$0xff]  }
 0x12f   :  { %1506 = vmatprep.subr.bf16.mxu0 %v6617_v24  ;;  %v6705_v24 = vld [vmem:[#allocation2 + $0x2e8] ss:$16 sps:$4 sm:$0xff]   ;;  %v6710_v25 = vld [vmem:[#allocation2 + $0x30c] ss:$16 sps:$4 sm:$0xff]  }
 0x131   :  { %1550 = vmatpush1.bf16.msra.mxu1 %v6618_v27  ;;  %v6788_v27 = vld [vmem:[#allocation5 + $0x24] ss:$8 sps:$4 sm:$0xff]  }
 0x132   :  { %1507 = vmatpush1.bf16.msra.mxu0 %v6615_v26  ;;  %1551 = vmatprep.subr.bf16.mxu1 %v6626_v29  ;;  %v6783_v26 = vld [vmem:[#allocation5 + $0x10] ss:$8 sps:$4 sm:$0xff]   ;;  %v6713_v29 = vld [vmem:[#allocation2 + $0x32c] ss:$16 sps:$4 sm:$0xff]  }
 0x133   :  { %1508 = vmatprep.subr.bf16.mxu0 %v6623_v28  ;;  %v6708_v28 = vld [vmem:[#allocation2 + $0x308] ss:$16 sps:$4 sm:$0xff]  }
 0x135   :  { %1552 = vmatpush1.bf16.msra.mxu1 %v6624_v31  ;;  %v6711_v31 = vld [vmem:[#allocation2 + $0x328] ss:$16 sps:$4 sm:$0xff]  }
 0x136   :  { %1509 = vmatpush1.bf16.msra.mxu0 %v6621_v30  ;;  %1553 = vmatprep.subr.bf16.mxu1 %v6632_v33  ;;  %v6786_v30 = vld [vmem:[#allocation5 + $0x20] ss:$8 sps:$4 sm:$0xff]   ;;  %v6716_v33 = vld [vmem:[#allocation2 + $0x34c] ss:$16 sps:$4 sm:$0xff]  }
 0x137   :  { %1510 = vmatprep.subr.bf16.mxu0 %v6629_v32  ;;  %v6791_v32 = vld [vmem:[#allocation5 + $0x34] ss:$8 sps:$4 sm:$0xff]  }
 0x139   :  { %1554 = vmatpush1.bf16.msra.mxu1 %v6630_v36  ;;  %v6794_v36 = vld [vmem:[#allocation5 + $0x44] ss:$8 sps:$4 sm:$0xff]  }
 0x13a   :  { %1511 = vmatpush1.bf16.msra.mxu0 %v6627_v35  ;;  %1555 = vmatprep.subr.bf16.mxu1 %v6638_v38  ;;  %v6789_v35 = vld [vmem:[#allocation5 + $0x30] ss:$8 sps:$4 sm:$0xff]   ;;  %v6719_v38 = vld [vmem:[#allocation2 + $0x36c] ss:$16 sps:$4 sm:$0xff]  }
 0x13b   :  { %1512 = vmatprep.subr.bf16.mxu0 %v6635_v37  ;;  %v6714_v37 = vld [vmem:[#allocation2 + $0x348] ss:$16 sps:$4 sm:$0xff]  }
 0x13d   :  { %1556 = vmatpush1.bf16.msra.mxu1 %v6636_v40  ;;  %v6797_v40 = vld [vmem:[#allocation5 + $0x54] ss:$8 sps:$4 sm:$0xff]  }
 0x13e   :  { %1513 = vmatpush1.bf16.msra.mxu0 %v6633_v39  ;;  %1557 = vmatprep.subr.bf16.mxu1 %v6644_v42  ;;  %v6792_v39 = vld [vmem:[#allocation5 + $0x40] ss:$8 sps:$4 sm:$0xff]   ;;  %v6722_v42 = vld [vmem:[#allocation2 + $0x38c] ss:$16 sps:$4 sm:$0xff]  }
 0x13f   :  { %1514 = vmatprep.subr.bf16.mxu0 %v6641_v41  ;;  %v6717_v41 = vld [vmem:[#allocation2 + $0x368] ss:$16 sps:$4 sm:$0xff]  }
 0x141   :  { %1558 = vmatpush1.bf16.msra.mxu1 %v6642_v44  ;;  %v6800_v44 = vld [vmem:[#allocation5 + $0x64] ss:$8 sps:$4 sm:$0xff]  }
 0x142   :  { %1515 = vmatpush1.bf16.msra.mxu0 %v6639_v43  ;;  %1559 = vmatprep.subr.bf16.mxu1 %v6650_v46  ;;  %v6795_v43 = vld [vmem:[#allocation5 + $0x50] ss:$8 sps:$4 sm:$0xff]   ;;  %v6725_v46 = vld [vmem:[#allocation2 + $0x3ac] ss:$16 sps:$4 sm:$0xff]  }
 0x143   :  { %1516 = vmatprep.subr.bf16.mxu0 %v6647_v45  ;;  %v6720_v45 = vld [vmem:[#allocation2 + $0x388] ss:$16 sps:$4 sm:$0xff]  }
 0x145   :  { %1560 = vmatpush1.bf16.msra.mxu1 %v6648_v48  ;;  %v6803_v48 = vld [vmem:[#allocation5 + $0x74] ss:$8 sps:$4 sm:$0xff]  }
 0x146   :  { %1517 = vmatpush1.bf16.msra.mxu0 %v6645_v47  ;;  %1561 = vmatprep.subr.bf16.mxu1 %v6656_v50  ;;  %v6798_v47 = vld [vmem:[#allocation5 + $0x60] ss:$8 sps:$4 sm:$0xff]   ;;  %v6728_v50 = vld [vmem:[#allocation2 + $0x3cc] ss:$16 sps:$4 sm:$0xff]  }
 0x147   :  { %1518 = vmatprep.subr.bf16.mxu0 %v6653_v49  ;;  %v6723_v49 = vld [vmem:[#allocation2 + $0x3a8] ss:$16 sps:$4 sm:$0xff]  }
 0x149   :  { %1562 = vmatpush1.bf16.msra.mxu1 %v6654_v53  ;;  %v6806_v53 = vld [vmem:[#allocation5 + $0x84] ss:$8 sps:$4 sm:$0xff]  }
 0x14a   :  { %1519 = vmatpush1.bf16.msra.mxu0 %v6651_v52  ;;  %1563 = vmatprep.subr.bf16.mxu1 %v6662_v55  ;;  %v6801_v52 = vld [vmem:[#allocation5 + $0x70] ss:$8 sps:$4 sm:$0xff]   ;;  %v6731_v55 = vld [vmem:[#allocation2 + $0x3ec] ss:$16 sps:$4 sm:$0xff]  }
 0x14b   :  { %1520 = vmatprep.subr.bf16.mxu0 %v6659_v54  ;;  %v6726_v54 = vld [vmem:[#allocation2 + $0x3c8] ss:$16 sps:$4 sm:$0xff]  }
 0x14d   :  { %1564 = vmatpush1.bf16.msra.mxu1 %v6660_v57  ;;  %v6809_v57 = vld [vmem:[#allocation5 + $0x94] ss:$8 sps:$4 sm:$0xff]  }
 0x14e   :  { %1521 = vmatpush1.bf16.msra.mxu0 %v6657_v56  ;;  %1565 = vmatprep.subr.bf16.mxu1 %v6668_v59  ;;  %v6804_v56 = vld [vmem:[#allocation5 + $0x80] ss:$8 sps:$4 sm:$0xff]   ;;  %v6734_v59 = vld [vmem:[#allocation2 + $0x40c] ss:$16 sps:$4 sm:$0xff]  }
 0x14f   :  { %1522 = vmatprep.subr.bf16.mxu0 %v6665_v58  ;;  %v6729_v58 = vld [vmem:[#allocation2 + $0x3e8] ss:$16 sps:$4 sm:$0xff]  }
 0x151   :  { %1566 = vmatpush1.bf16.msra.mxu1 %v6666_v61  ;;  %v6812_v61 = vld [vmem:[#allocation5 + $0xa4] ss:$8 sps:$4 sm:$0xff]  }
 0x152   :  { %1523 = vmatpush1.bf16.msra.mxu0 %v6663_v60  ;;  %1567 = vmatprep.subr.bf16.mxu1 %v6674_v63  ;;  %v6807_v60 = vld [vmem:[#allocation5 + $0x90] ss:$8 sps:$4 sm:$0xff]   ;;  %v6737_v63 = vld [vmem:[#allocation2 + $0x42c] ss:$16 sps:$4 sm:$0xff]  }
 0x153   :  { %1524 = vmatprep.subr.bf16.mxu0 %v6671_v62  ;;  %v6732_v62 = vld [vmem:[#allocation2 + $0x408] ss:$16 sps:$4 sm:$0xff]  }
 0x155   :  { %1568 = vmatpush1.bf16.msra.mxu1 %v6672_v1  ;;  %v6815_v1 = vld [vmem:[#allocation5 + $0xb4] ss:$8 sps:$4 sm:$0xff]  }
 0x156   :  { %1525 = vmatpush1.bf16.msra.mxu0 %v6669_v0  ;;  %1569 = vmatprep.subr.bf16.mxu1 %v6680_v3  ;;  %v6810_v0 = vld [vmem:[#allocation5 + $0xa0] ss:$8 sps:$4 sm:$0xff]  }
 0x157   :  { %1526 = vmatprep.subr.bf16.mxu0 %v6677_v2  ;;  %v6735_v2 = vld [vmem:[#allocation2 + $0x428] ss:$16 sps:$4 sm:$0xff]  }
 0x158   :  { %v7556_v3 = vld [vmem:[%s8333_s0 + $0x8] ss:$24 sps:$4 sm:$0xff]  }
 0x159   :  { %1570 = vmatpush1.bf16.msra.mxu1 %v6678_v6  ;;  %v6813_v6 = vld [vmem:[#allocation5 + $0xb0] ss:$8 sps:$4 sm:$0xff]  }
 0x15a   :  { %1527 = vmatpush1.bf16.msra.mxu0 %v6675_v5  ;;  %1582 = vmatprep.subr.bf16.mxu1 %v6686_v7  ;;  %v6740_v5 = vld [vmem:[#allocation2 + $0x44c] ss:$16 sps:$4 sm:$0xff]  }
 0x15b   :  { %2076 = vmatprep.subr.bf16.mxu0 %v6782_v22  ;;  %v6818_v7 = vld [vmem:[#allocation5 + $0xc4] ss:$8 sps:$4 sm:$0xff]   ;;  %v6827_v22 = vld [vmem:[#allocation5 + $0xf4] ss:$8 sps:$4 sm:$0xff]  }
 0x15c   :  { %1572 = vmatmul.mubr.bf16.vlgmr.msra.gmra.mrb[4].mxu1 %v8138_v4  ;;  %v6704_v4 = vld [vmem:[#allocation2 + $0x2cc] ss:$16 sps:$4 sm:$0xff]  }
 0x15d   :  { %1529 = vmatmul.mubr.bf16.vlgmr.msra.gmra.mrb[0].mxu0 %v6681_v8  ;;  %1583 = vmatpush1.bf16.msra.mxu1 %v6684_v9  ;;  %v6738_v8 = vld [vmem:[#allocation2 + $0x448] ss:$16 sps:$4 sm:$0xff]   ;;  %v6743_v9 = vld [vmem:[#allocation2 + $0x46c] ss:$16 sps:$4 sm:$0xff]  }
 0x15e   :  { %1614 = vmatprep.mubr.bf16.mxu1 %v8132_v51  ;;  %1584 = vmatprep.subr.bf16.mxu1 %v6689_v10  ;;  %v6780_v51 = vld [vmem:[#allocation5] ss:$8 sps:$4 sm:$0xff]  }
 0x15f   :  { %2077 = vmatpush1.bf16.msra.mxu0 %v6780_v51  ;;  %v6816_v10 = vld [vmem:[#allocation5 + $0xc0] ss:$8 sps:$4 sm:$0xff]   ;;  %v6758_v51 = vld [vmem:[#allocation2 + $0x50c] ss:$16 sps:$4 sm:$0xff]  }
 0x160   :  { %2078 = vmatprep.subr.bf16.mxu0 %v6785_v23  ;;  %v6825_v23 = vld [vmem:[#allocation5 + $0xf0] ss:$8 sps:$4 sm:$0xff]  }
 0x161   :  { %1585 = vmatpush1.bf16.msra.mxu1 %v6687_v11  ;;  %v6821_v11 = vld [vmem:[#allocation5 + $0xd4] ss:$8 sps:$4 sm:$0xff]  }
 0x162   :  { %1586 = vmatprep.subr.bf16.mxu1 %v6692_v12  ;;  %v6741_v12 = vld [vmem:[#allocation2 + $0x468] ss:$16 sps:$4 sm:$0xff]  }
 0x163   :  { %2079 = vmatpush1.bf16.msra.mxu0 %v6783_v26  ;;  %v6830_v26 = vld [vmem:[#allocation5 + $0x104] ss:$8 sps:$4 sm:$0xff]  }
 0x164   :  { %2080 = vmatprep.subr.bf16.mxu0 %v6788_v27  ;;  %v6759_v27 = vld [vmem:[#allocation2 + $0x528] ss:$16 sps:$4 sm:$0xff]  }
 0x165   :  { %1587 = vmatpush1.bf16.msra.mxu1 %v6690_v13  ;;  %v6746_v13 = vld [vmem:[#allocation2 + $0x48c] ss:$16 sps:$4 sm:$0xff]  }
 0x166   :  { %1588 = vmatprep.subr.bf16.mxu1 %v6695_v14  ;;  %v6819_v14 = vld [vmem:[#allocation5 + $0xd0] ss:$8 sps:$4 sm:$0xff]  }
 0x167   :  { %2081 = vmatpush1.bf16.msra.mxu0 %v6786_v30  ;;  %v6767_v30 = vld [vmem:[#allocation2 + $0x56c] ss:$16 sps:$4 sm:$0xff]  }
 0x168   :  { %2082 = vmatprep.subr.bf16.mxu0 %v6791_v32  ;;  %v6770_v32 = vld [vmem:[#allocation2 + $0x58c] ss:$16 sps:$4 sm:$0xff]  }
 0x169   :  { %1589 = vmatpush1.bf16.msra.mxu1 %v6693_v15  ;;  %v6744_v15 = vld [vmem:[#allocation2 + $0x488] ss:$16 sps:$4 sm:$0xff]  }
 0x16a   :  { %1590 = vmatprep.subr.bf16.mxu1 %v6698_v16  ;;  %v6747_v16 = vld [vmem:[#allocation2 + $0x4a8] ss:$16 sps:$4 sm:$0xff]  }
 0x16b   :  { %2083 = vmatpush1.bf16.msra.mxu0 %v6789_v35  ;;  %v6773_v35 = vld [vmem:[#allocation2 + $0x5ac] ss:$16 sps:$4 sm:$0xff]  }
 0x16c   :  { %2084 = vmatprep.subr.bf16.mxu0 %v6794_v36  ;;  %v6771_v36 = vld [vmem:[#allocation2 + $0x5a8] ss:$16 sps:$4 sm:$0xff]  }
 0x16d   :  { %1591 = vmatpush1.bf16.msra.mxu1 %v6696_v17  ;;  %v6752_v17 = vld [vmem:[#allocation2 + $0x4cc] ss:$16 sps:$4 sm:$0xff]  }
 0x16e   :  { %1592 = vmatprep.subr.bf16.mxu1 %v6701_v18  ;;  %v6750_v18 = vld [vmem:[#allocation2 + $0x4c8] ss:$16 sps:$4 sm:$0xff]  }
 0x16f   :  { %2085 = vmatpush1.bf16.msra.mxu0 %v6792_v39  ;;  %v6779_v39 = vld [vmem:[#allocation2 + $0x5ec] ss:$16 sps:$4 sm:$0xff]  }
 0x170   :  { %2086 = vmatprep.subr.bf16.mxu0 %v6797_v40  ;;  %v6777_v40 = vld [vmem:[#allocation2 + $0x5e8] ss:$16 sps:$4 sm:$0xff]  }
 0x171   :  { %1593 = vmatpush1.bf16.msra.mxu1 %v6699_v19  ;;  %v6755_v19 = vld [vmem:[#allocation2 + $0x4ec] ss:$16 sps:$4 sm:$0xff]  }
 0x172   :  { %1594 = vmatprep.subr.bf16.mxu1 %v6704_v4  ;;  %v6824_v4 = vld [vmem:[#allocation5 + $0xe4] ss:$8 sps:$4 sm:$0xff]  }
 0x173   :  { %2087 = vmatpush1.bf16.msra.mxu0 %v6795_v43 }
 0x174   :  { %2088 = vmatprep.subr.bf16.mxu0 %v6800_v44 }
 0x175   :  { %1595 = vmatpush1.bf16.msra.mxu1 %v6702_v20  ;;  %v6822_v20 = vld [vmem:[#allocation5 + $0xe0] ss:$8 sps:$4 sm:$0xff]  }
 0x176   :  { %1596 = vmatprep.subr.bf16.mxu1 %v6707_v21  ;;  %v6753_v21 = vld [vmem:[#allocation2 + $0x4e8] ss:$16 sps:$4 sm:$0xff]  }
 0x177   :  { %2089 = vmatpush1.bf16.msra.mxu0 %v6798_v47 }
 0x178   :  { %2090 = vmatprep.subr.bf16.mxu0 %v6803_v48 }
 0x179   :  { %1597 = vmatpush1.bf16.msra.mxu1 %v6705_v24  ;;  %v6756_v24 = vld [vmem:[#allocation2 + $0x508] ss:$16 sps:$4 sm:$0xff]  }
 0x17a   :  { %1598 = vmatprep.subr.bf16.mxu1 %v6710_v25  ;;  %v6761_v25 = vld [vmem:[#allocation2 + $0x52c] ss:$16 sps:$4 sm:$0xff]  }
 0x17b   :  { %2091 = vmatpush1.bf16.msra.mxu0 %v6801_v52 }
 0x17c   :  { %2092 = vmatprep.subr.bf16.mxu0 %v6806_v53 }
 0x17d   :  { %1599 = vmatpush1.bf16.msra.mxu1 %v6708_v28  ;;  %v6764_v28 = vld [vmem:[#allocation2 + $0x54c] ss:$16 sps:$4 sm:$0xff]  }
 0x17e   :  { %1600 = vmatprep.subr.bf16.mxu1 %v6713_v29  ;;  %v6762_v29 = vld [vmem:[#allocation2 + $0x548] ss:$16 sps:$4 sm:$0xff]  }
 0x17f   :  { %2093 = vmatpush1.bf16.msra.mxu0 %v6804_v56 }
 0x180   :  { %2094 = vmatprep.subr.bf16.mxu0 %v6809_v57 }
 0x181   :  { %1601 = vmatpush1.bf16.msra.mxu1 %v6711_v31  ;;  %v6765_v31 = vld [vmem:[#allocation2 + $0x568] ss:$16 sps:$4 sm:$0xff]  }
 0x182   :  { %1602 = vmatprep.subr.bf16.mxu1 %v6716_v33  ;;  %v6768_v33 = vld [vmem:[#allocation2 + $0x588] ss:$16 sps:$4 sm:$0xff]  }
 0x183   :  { %2095 = vmatpush1.bf16.msra.mxu0 %v6807_v60 }
 0x184   :  { %2096 = vmatprep.subr.bf16.mxu0 %v6812_v61 }
 0x185   :  { %1603 = vmatpush1.bf16.msra.mxu1 %v6714_v37  ;;  %v6776_v37 = vld [vmem:[#allocation2 + $0x5cc] ss:$16 sps:$4 sm:$0xff]  }
 0x186   :  { %1604 = vmatprep.subr.bf16.mxu1 %v6719_v38  ;;  %v6774_v38 = vld [vmem:[#allocation2 + $0x5c8] ss:$16 sps:$4 sm:$0xff]  }
 0x187   :  { %2097 = vmatpush1.bf16.msra.mxu0 %v6810_v0 }
 0x188   :  { %2098 = vmatprep.subr.bf16.mxu0 %v6815_v1 }
 0x189   :  { %1605 = vmatpush1.bf16.msra.mxu1 %v6717_v41  ;;  %v7557_v41 = vld [vmem:[%s8333_s0 + $0x10] ss:$24 sps:$4 sm:$0xff]  }
 0x18a   :  { %1606 = vmatprep.subr.bf16.mxu1 %v6722_v42 }
 0x18b   :  { %2099 = vmatpush1.bf16.msra.mxu0 %v6813_v6 }
 0x18c   :  { %2100 = vmatprep.subr.bf16.mxu0 %v6818_v7 }
 0x18d   :  { %1607 = vmatpush1.bf16.msra.mxu1 %v6720_v45 }
 0x18e   :  { %1608 = vmatprep.subr.bf16.mxu1 %v6725_v46  ;;  %v400_v46 = vlaneseq }
 0x18f   :  { %2101 = vmatpush1.bf16.msra.mxu0 %v6816_v10  ;;  %v6833_v10 = vld [vmem:[#allocation5 + $0x114] ss:$8 sps:$4 sm:$0xff]  }
 0x190   :  { %2102 = vmatprep.subr.bf16.mxu0 %v6821_v11  ;;  %v8162_v47 = vshrl.u32 %v400_v46, 7  ;;  %v6876_v11 = vld [vmem:[#allocation7 + $0x40] sm:$0xff]  }
 0x191   :  { %1609 = vmatpush1.bf16.msra.mxu1 %v6723_v49  ;;  %v8167_v49 = vld [vmem:[#allocation13] sm:$0xf] }
 0x192   :  { %1610 = vmatprep.subr.bf16.mxu1 %v6728_v50  ;;  %v8165_v48 = vsub.s32 0, %v8162_v47  ;;  %v8170_v50 = vsub.s32 1, %v8162_v47  ;;  %v6870_v46 = vld [vmem:[#allocation5 + $0x1e0] ss:$8 sps:$4 sm:$0xff]  }
 0x193   :  { %2103 = vmatpush1.bf16.msra.mxu0 %v6819_v14  ;;  %v6831_v14 = vld [vmem:[#allocation5 + $0x110] ss:$8 sps:$4 sm:$0xff]  }
 0x194   :  { %2104 = vmatprep.subr.bf16.mxu0 %v6824_v4  ;;  %v403_v52 = vrot.slane %v8167_v49, %v8165_v48  ;;  %v407_v53 = vrot.slane %v8167_v49, %v8170_v50  ;;  %v6882_v4 = vld [vmem:[#allocation7 + $0x58] sm:$0xff]  }
 0x195   :  { %1611 = vmatpush1.bf16.msra.mxu1 %v6726_v54 }
 0x196   :  { %1612 = vmatprep.subr.bf16.mxu1 %v6731_v55 }
 0x197   :  { %2105 = vmatpush1.bf16.msra.mxu0 %v6822_v20  ;;  %v6837_v20 = vld [vmem:[#allocation5 + $0x130] ss:$8 sps:$4 sm:$0xff]  }
 0x198   :  { %2106 = vmatprep.subr.bf16.mxu0 %v6827_v22  ;;  %v6884_v22 = vld [vmem:[#allocation7 + $0x60] sm:$0xff]  }
 0x199   :  { %1613 = vmatpush1.bf16.msra.mxu1 %v6729_v58 }
 0x19a   :  { %1625 = vmatprep.subr.bf16.mxu1 %v6734_v59 }
 0x19b   :  { %2107 = vmatpush1.bf16.msra.mxu0 %v6825_v23  ;;  %v6840_v23 = vld [vmem:[#allocation5 + $0x140] ss:$8 sps:$4 sm:$0xff]  }
 0x19c   :  { %1615 = vmatmul.mubr.bf16.vlgmr.msra.gmra.mrb[4].mxu1 %v7556_v3  ;;  %2119 = vmatprep.subr.bf16.mxu0 %v6830_v26  ;;  %v6886_v26 = vld [vmem:[#allocation7 + $0x68] sm:$0xff]  }
 0x19d   :  { %1626 = vmatpush1.bf16.msra.mxu1 %v6732_v62  ;;  %1657 = vmatprep.mubr.bf16.mxu1 %v8147_v34  ;;  %v6749_v34 = vld [vmem:[#allocation2 + $0x4ac] ss:$16 sps:$4 sm:$0xff]  }
 0x19e   :  { %1627 = vmatprep.subr.bf16.mxu1 %v6737_v63 }
 0x1a1   :  { %1628 = vmatpush1.bf16.msra.mxu1 %v6735_v2 }
 0x1a2   :  { %1629 = vmatprep.subr.bf16.mxu1 %v6740_v5 }
 0x1a5   :  { %1630 = vmatpush1.bf16.msra.mxu1 %v6738_v8 }
 0x1a6   :  { %1631 = vmatprep.subr.bf16.mxu1 %v6743_v9  ;;  %v6828_v9 = vld [vmem:[#allocation5 + $0x100] ss:$8 sps:$4 sm:$0xff]  }
 0x1a9   :  { %1632 = vmatpush1.bf16.msra.mxu1 %v6741_v12  ;;  %v6877_v12 = vld [vmem:[#allocation7] sm:$0xff]  }
 0x1aa   :  { %1633 = vmatprep.subr.bf16.mxu1 %v6746_v13  ;;  %v6878_v13 = vld [vmem:[#allocation7 + $0x48] sm:$0xff]  }
 0x1ad   :  { %1634 = vmatpush1.bf16.msra.mxu1 %v6744_v15  ;;  %v6836_v15 = vld [vmem:[#allocation5 + $0x124] ss:$8 sps:$4 sm:$0xff]  }
 0x1ae   :  { %1635 = vmatprep.subr.bf16.mxu1 %v6749_v34  ;;  %v6879_v34 = vld [vmem:[#allocation7 + $0x8] sm:$0xff]  }
 0x1b1   :  { %1636 = vmatpush1.bf16.msra.mxu1 %v6747_v16  ;;  %v6880_v16 = vld [vmem:[#allocation7 + $0x50] sm:$0xff]  }
 0x1b2   :  { %1637 = vmatprep.subr.bf16.mxu1 %v6752_v17  ;;  %v6834_v17 = vld [vmem:[#allocation5 + $0x120] ss:$8 sps:$4 sm:$0xff]  }
 0x1b5   :  { %1638 = vmatpush1.bf16.msra.mxu1 %v6750_v18  ;;  %v6839_v18 = vld [vmem:[#allocation5 + $0x134] ss:$8 sps:$4 sm:$0xff]  }
 0x1b6   :  { %1639 = vmatprep.subr.bf16.mxu1 %v6755_v19  ;;  %v6881_v19 = vld [vmem:[#allocation7 + $0x10] sm:$0xff]  }
 0x1b9   :  { %1640 = vmatpush1.bf16.msra.mxu1 %v6753_v21  ;;  %v6842_v21 = vld [vmem:[#allocation5 + $0x144] ss:$8 sps:$4 sm:$0xff]  }
 0x1ba   :  { %1641 = vmatprep.subr.bf16.mxu1 %v6758_v51  ;;  %v6883_v51 = vld [vmem:[#allocation7 + $0x18] sm:$0xff]  }
 0x1bd   :  { %1642 = vmatpush1.bf16.msra.mxu1 %v6756_v24  ;;  %v6845_v24 = vld [vmem:[#allocation5 + $0x154] ss:$8 sps:$4 sm:$0xff]  }
 0x1be   :  { %1643 = vmatprep.subr.bf16.mxu1 %v6761_v25  ;;  %v6885_v25 = vld [vmem:[#allocation7 + $0x20] sm:$0xff]  }
 0x1c1   :  { %1644 = vmatpush1.bf16.msra.mxu1 %v6759_v27  ;;  %v6843_v27 = vld [vmem:[#allocation5 + $0x150] ss:$8 sps:$4 sm:$0xff]  }
 0x1c2   :  { %1645 = vmatprep.subr.bf16.mxu1 %v6764_v28  ;;  %v6848_v28 = vld [vmem:[#allocation5 + $0x164] ss:$8 sps:$4 sm:$0xff]  }
 0x1c5   :  { %1646 = vmatpush1.bf16.msra.mxu1 %v6762_v29  ;;  %v6846_v29 = vld [vmem:[#allocation5 + $0x160] ss:$8 sps:$4 sm:$0xff]  }
 0x1c6   :  { %1647 = vmatprep.subr.bf16.mxu1 %v6767_v30  ;;  %v6851_v30 = vld [vmem:[#allocation5 + $0x174] ss:$8 sps:$4 sm:$0xff]  }
 0x1c9   :  { %1648 = vmatpush1.bf16.msra.mxu1 %v6765_v31  ;;  %v6849_v31 = vld [vmem:[#allocation5 + $0x170] ss:$8 sps:$4 sm:$0xff]  }
 0x1ca   :  { %1649 = vmatprep.subr.bf16.mxu1 %v6770_v32  ;;  %v6854_v32 = vld [vmem:[#allocation5 + $0x184] ss:$8 sps:$4 sm:$0xff]  }
 0x1cd   :  { %1650 = vmatpush1.bf16.msra.mxu1 %v6768_v33  ;;  %v6852_v33 = vld [vmem:[#allocation5 + $0x180] ss:$8 sps:$4 sm:$0xff]  }
 0x1ce   :  { %1651 = vmatprep.subr.bf16.mxu1 %v6773_v35  ;;  %v6857_v35 = vld [vmem:[#allocation5 + $0x194] ss:$8 sps:$4 sm:$0xff]  }
 0x1d1   :  { %1652 = vmatpush1.bf16.msra.mxu1 %v6771_v36  ;;  %v6855_v36 = vld [vmem:[#allocation5 + $0x190] ss:$8 sps:$4 sm:$0xff]  }
 0x1d2   :  { %1653 = vmatprep.subr.bf16.mxu1 %v6776_v37  ;;  %v6860_v37 = vld [vmem:[#allocation5 + $0x1a4] ss:$8 sps:$4 sm:$0xff]  }
 0x1d5   :  { %1654 = vmatpush1.bf16.msra.mxu1 %v6774_v38  ;;  %v6858_v38 = vld [vmem:[#allocation5 + $0x1a0] ss:$8 sps:$4 sm:$0xff]  }
 0x1d6   :  { %1655 = vmatprep.subr.bf16.mxu1 %v6779_v39  ;;  %v6863_v39 = vld [vmem:[#allocation5 + $0x1b4] ss:$8 sps:$4 sm:$0xff]  }
 0x1d9   :  { %1656 = vmatpush1.bf16.msra.mxu1 %v6777_v40  ;;  %v6861_v40 = vld [vmem:[#allocation5 + $0x1b0] ss:$8 sps:$4 sm:$0xff]  }
 0x1da   :  { %6338 = vmatprep.subr.bf16.mxu1 %v6876_v11  ;;  %v6890_v11 = vld [vmem:[#allocation7 + $0x78] sm:$0xff]  }
 0x1dc   :  { %1658 = vmatmul.mubr.bf16.vlgmr.msra.gmra.mrb[4].mxu1 %v7557_v41  ;;  %v6866_v41 = vld [vmem:[#allocation5 + $0x1c4] ss:$8 sps:$4 sm:$0xff]  }
 0x1dd   :  { %6339 = vmatpush3.bf16.msra.mxu1 %v6877_v12  ;;  %v6891_v12 = vld [vmem:[#allocation7 + $0x38] sm:$0xff]  }
 0x1de   :  { %6340 = vmatprep.subr.bf16.mxu1 %v6878_v13  ;;  %v6894_v13 = vld [vmem:[#allocation8 + $0x4] ss:$12 sps:$4 sm:$0xff]  }
 0x1e1   :  { %6341 = vmatpush3.bf16.msra.mxu1 %v6879_v34 }
 0x1e2   :  { %6342 = vmatprep.subr.bf16.mxu1 %v6880_v16 }
 0x1e5   :  { %6343 = vmatpush3.bf16.msra.mxu1 %v6881_v19 }
 0x1e6   :  { %6344 = vmatprep.subr.bf16.mxu1 %v6882_v4 }
 0x1e9   :  { %6345 = vmatpush3.bf16.msra.mxu1 %v6883_v51 }
 0x1ea   :  { %6346 = vmatprep.subr.bf16.mxu1 %v6884_v22 }
 0x1ed   :  { %6347 = vmatpush3.bf16.msra.mxu1 %v6885_v25 }
 0x1ee   :  { %6348 = vmatprep.subr.bf16.mxu1 %v6886_v26 }
 0x1ef   :  { %v1444_v42 = vpop.f32.mrb[0].mxu1 }
 0x1f0   :  { %v1446_v43 = vpop.f32.mrb[1].mxu1  ;;  %v1445_v54 = vadd.f32 %v1444_v42, %v403_v52  ;;  %v6864_v42 = vld [vmem:[#allocation5 + $0x1c0] ss:$8 sps:$4 sm:$0xff]  }
 0x1f1   :  { %v1448_v44 = vpop.f32.mrb[2].mxu1  ;;  %v1447_v55 = vadd.f32 %v1446_v43, %v407_v53  ;;  %v6869_v43 = vld [vmem:[#allocation5 + $0x1d4] ss:$8 sps:$4 sm:$0xff]  }
 0x1f2   :  { %v1450_v45 = vpop.f32.mrb[3].mxu1  ;;  %v1449_v57 = vadd.f32 %v1448_v44, %v403_v52  ;;  %v6867_v44 = vld [vmem:[#allocation5 + $0x1d0] ss:$8 sps:$4 sm:$0xff]   ;;  %v6875_v52 = vld [vmem:[#allocation5 + $0x1f4] ss:$8 sps:$4 sm:$0xff]  }
 0x1f3   :  { %v1451_v60 = vadd.f32 %v1450_v45, %v407_v53  ;;  %v6872_v45 = vld [vmem:[#allocation5 + $0x1e4] ss:$8 sps:$4 sm:$0xff]   ;;  %v6873_v53 = vld [vmem:[#allocation5 + $0x1f0] ss:$8 sps:$4 sm:$0xff]  }
 0x230   :  { %v1530_v56 = vpop.f32.mrb[0].mxu0 }
 0x231   :  { %v6390_v58 = vadd.f32 %v1530_v56, %v1445_v54  ;;  %v1532_v59 = vpop.f32.mrb[1].mxu0  ;;  %v8177_v54 = vsub.s32 2, %v8162_v47 }
 0x232   :  { %v6392_v61 = vadd.f32 %v1532_v59, %v1447_v55  ;;  %v1534_v62 = vpop.f32.mrb[2].mxu0  ;;  %v8180_v55 = vsub.s32 3, %v8162_v47 }
 0x233   :  { %v6394_v63 = vadd.f32 %v1534_v62, %v1449_v57  ;;  %v1536_v0 = vpop.f32.mrb[3].mxu0  ;;  %v1668_v2 = vmax.f32 %v6390_v58, 0.0  ;;  %v411_v56 = vrot.slane %v8167_v49, %v8177_v54 }
 0x234   :  { %v6396_v1 = vadd.f32 %v1536_v0, %v1451_v60  ;;  %v1669_v5 = vmax.f32 %v6392_v61, 0.0  ;;  %v415_v57 = vrot.slane %v8167_v49, %v8180_v55  ;;  %v6889_v49 = vld [vmem:[#allocation7 + $0x30] sm:$0xff]  }
 0x235   :  { %v1672_v3 = vmax.f32 %v6394_v63, 0.0 }
 0x236   :  { %v1673_v6 = vmax.f32 %v6396_v1, 0.0 }
 0x237   :  { %v1676_v7 = vpack.c.bf16 %v1672_v3, %v1668_v2 }
 0x238   :  { %v1677_v8 = vpack.c.bf16 %v1673_v6, %v1669_v5 }
 0x23a   :  { %2108 = vmatprep.mubr.bf16.mxu0 %v1677_v8 }
 0x23b   :  { %2109 = vmatmul.mubr.bf16.vlgmr.msra.gmra.mrb[4].mxu0 %v1676_v7 }
 0x23c   :  { %2120 = vmatpush1.bf16.msra.mxu0 %v6828_v9  ;;  %v6887_v9 = vld [vmem:[#allocation7 + $0x28] sm:$0xff]  }
 0x23d   :  { %2121 = vmatprep.subr.bf16.mxu0 %v6833_v10  ;;  %6349 = vmatpush3.bf16.msra.mxu1 %v6887_v9  ;;  %v6888_v10 = vld [vmem:[#allocation7 + $0x70] sm:$0xff]  }
 0x23e   :  { %6350 = vmatprep.subr.bf16.mxu1 %v6888_v10 }
 0x240   :  { %2122 = vmatpush1.bf16.msra.mxu0 %v6831_v14  ;;  %v1744_v14 = vld [vmem:[#allocation14] sm:$0x3] }
 0x241   :  { %2123 = vmatprep.subr.bf16.mxu0 %v6836_v15  ;;  %6351 = vmatpush3.bf16.msra.mxu1 %v6889_v49  ;;  %v1749_v15 = vrot.slane %v1744_v14, %v8165_v48  ;;  %v1753_v34 = vrot.slane %v1744_v14, %v8170_v50  ;;  %v6916_v49 = vld [vmem:[#allocation8 + $0x8] ss:$12 sps:$4 sm:$0xff]   ;;  %v6919_v14 = vld [vmem:[#allocation8 + $0x50] ss:$12 sps:$4 sm:$0xff]  }
 0x242   :  { %6352 = vmatprep.subr.bf16.mxu1 %v6890_v11 }
 0x244   :  { %2124 = vmatpush1.bf16.msra.mxu0 %v6834_v17 }
 0x245   :  { %2125 = vmatprep.subr.bf16.mxu0 %v6839_v18  ;;  %6353 = vmatpush3.bf16.msra.mxu1 %v6891_v12  ;;  %v6917_v12 = vld [vmem:[#allocation8 + $0x20] ss:$12 sps:$4 sm:$0xff]  }
 0x246   :  { %2522 = vmatprep.subr.bf16.mxu1 %v6894_v13  ;;  %v6918_v13 = vld [vmem:[#allocation8 + $0x38] ss:$12 sps:$4 sm:$0xff]  }
 0x248   :  { %2126 = vmatpush1.bf16.msra.mxu0 %v6837_v20 }
 0x249   :  { %2127 = vmatprep.subr.bf16.mxu0 %v6842_v21 }
 0x24c   :  { %2128 = vmatpush1.bf16.msra.mxu0 %v6840_v23 }
 0x24d   :  { %2129 = vmatprep.subr.bf16.mxu0 %v6845_v24 }
 0x250   :  { %2130 = vmatpush1.bf16.msra.mxu0 %v6843_v27 }
 0x251   :  { %2131 = vmatprep.subr.bf16.mxu0 %v6848_v28  ;;  %v6892_v28 = vld [vmem:[#allocation8] ss:$12 sps:$4 sm:$0xff]  }
 0x254   :  { %2132 = vmatpush1.bf16.msra.mxu0 %v6846_v29  ;;  %v6897_v29 = vld [vmem:[#allocation8 + $0x1c] ss:$12 sps:$4 sm:$0xff]  }
 0x255   :  { %2133 = vmatprep.subr.bf16.mxu0 %v6851_v30  ;;  %v6895_v30 = vld [vmem:[#allocation8 + $0x18] ss:$12 sps:$4 sm:$0xff]  }
 0x258   :  { %2134 = vmatpush1.bf16.msra.mxu0 %v6849_v31  ;;  %v6900_v31 = vld [vmem:[#allocation8 + $0x34] ss:$12 sps:$4 sm:$0xff]  }
 0x259   :  { %2135 = vmatprep.subr.bf16.mxu0 %v6854_v32  ;;  %v6898_v32 = vld [vmem:[#allocation8 + $0x30] ss:$12 sps:$4 sm:$0xff]  }
 0x25c   :  { %2136 = vmatpush1.bf16.msra.mxu0 %v6852_v33  ;;  %v6903_v33 = vld [vmem:[#allocation8 + $0x4c] ss:$12 sps:$4 sm:$0xff]  }
 0x25d   :  { %2137 = vmatprep.subr.bf16.mxu0 %v6857_v35  ;;  %v6901_v35 = vld [vmem:[#allocation8 + $0x48] ss:$12 sps:$4 sm:$0xff]  }
 0x260   :  { %2138 = vmatpush1.bf16.msra.mxu0 %v6855_v36  ;;  %v6906_v36 = vld [vmem:[#allocation8 + $0x64] ss:$12 sps:$4 sm:$0xff]  }
 0x261   :  { %2139 = vmatprep.subr.bf16.mxu0 %v6860_v37  ;;  %v6904_v37 = vld [vmem:[#allocation8 + $0x60] ss:$12 sps:$4 sm:$0xff]  }
 0x264   :  { %2140 = vmatpush1.bf16.msra.mxu0 %v6858_v38  ;;  %v6909_v38 = vld [vmem:[#allocation8 + $0x7c] ss:$12 sps:$4 sm:$0xff]  }
 0x265   :  { %2141 = vmatprep.subr.bf16.mxu0 %v6863_v39  ;;  %v6907_v39 = vld [vmem:[#allocation8 + $0x78] ss:$12 sps:$4 sm:$0xff]  }
 0x268   :  { %2142 = vmatpush1.bf16.msra.mxu0 %v6861_v40  ;;  %v6912_v40 = vld [vmem:[#allocation8 + $0x94] ss:$12 sps:$4 sm:$0xff]  }
 0x269   :  { %2143 = vmatprep.subr.bf16.mxu0 %v6866_v41  ;;  %v6910_v41 = vld [vmem:[#allocation8 + $0x90] ss:$12 sps:$4 sm:$0xff]  }
 0x26c   :  { %2144 = vmatpush1.bf16.msra.mxu0 %v6864_v42  ;;  %v6915_v42 = vld [vmem:[#allocation8 + $0xac] ss:$12 sps:$4 sm:$0xff]  }
 0x26d   :  { %2145 = vmatprep.subr.bf16.mxu0 %v6869_v43  ;;  %v6913_v43 = vld [vmem:[#allocation8 + $0xa8] ss:$12 sps:$4 sm:$0xff]  }
 0x270   :  { %2146 = vmatpush1.bf16.msra.mxu0 %v6867_v44  ;;  %v7882_v44 = vmov 0  }
 0x271   :  { %2147 = vmatprep.subr.bf16.mxu0 %v6872_v45  ;;  %v7883_v45 = vmov 0.0  }
 0x274   :  { %2148 = vmatpush1.bf16.msra.mxu0 %v6870_v46  ;;  %v6927_v46 = vld [vmem:[#allocation10 + $0x8] ss:$24 sps:$4 sm:$0xff]  }
 0x275   :  { %2149 = vmatprep.subr.bf16.mxu0 %v6875_v52  ;;  %v6929_v52 = vld [vmem:[#allocation10 + $0xc] ss:$24 sps:$4 sm:$0xff]  }
 0x278   :  { %2150 = vmatpush1.bf16.msra.mxu0 %v6873_v53  ;;  %v6933_v53 = vld [vmem:[#allocation10 + $0x38] ss:$24 sps:$4 sm:$0xff]  }
 0x279   :  { %3285 = vmatprep.subr.bf16.mxu0 %v6929_v52  ;;  %v6984_v52 = vld [vmem:[#allocation10 + $0x1e0] ss:$24 sps:$4 sm:$0xff]  }
 0x2af   :  { %v1659_v58 = vpop.f32.mrb[4].mxu1 }
 0x2b0   :  { %v6397_v59 = vadd.f32 %v1659_v58, %v411_v56  ;;  %v1661_v60 = vpop.f32.mrb[5].mxu1  ;;  %v6941_v58 = vld [vmem:[#allocation10 + $0x6c] ss:$24 sps:$4 sm:$0xff]  }
 0x2b1   :  { %v6398_v61 = vadd.f32 %v1661_v60, %v415_v57  ;;  %v1663_v62 = vpop.f32.mrb[6].mxu1  ;;  %v6947_v60 = vld [vmem:[#allocation10 + $0x9c] ss:$24 sps:$4 sm:$0xff]  }
 0x2b2   :  { %v6399_v63 = vadd.f32 %v1663_v62, %v411_v56  ;;  %v1665_v0 = vpop.f32.mrb[7].mxu1  ;;  %v1670_v2 = vmax.f32 %v6397_v59, 0.0  ;;  %v6935_v56 = vld [vmem:[#allocation10 + $0x3c] ss:$24 sps:$4 sm:$0xff]   ;;  %v6945_v59 = vld [vmem:[#allocation10 + $0x98] ss:$24 sps:$4 sm:$0xff]  }
 0x2b3   :  { %v6400_v1 = vadd.f32 %v1665_v0, %v415_v57  ;;  %v1671_v5 = vmax.f32 %v6398_v61, 0.0  ;;  %v6939_v57 = vld [vmem:[#allocation10 + $0x68] ss:$24 sps:$4 sm:$0xff]   ;;  %v6953_v62 = vld [vmem:[#allocation10 + $0xcc] ss:$24 sps:$4 sm:$0xff]  }
 0x2b4   :  { %v1674_v3 = vmax.f32 %v6399_v63, 0.0  ;;  %v6951_v61 = vld [vmem:[#allocation10 + $0xc8] ss:$24 sps:$4 sm:$0xff]   ;;  %v6957_v63 = vld [vmem:[#allocation10 + $0xf8] ss:$24 sps:$4 sm:$0xff]  }
 0x2b5   :  { %v1675_v6 = vmax.f32 %v6400_v1, 0.0  ;;  %v6959_v0 = vld [vmem:[#allocation10 + $0xfc] ss:$24 sps:$4 sm:$0xff]  }
 0x2b6   :  { %v1678_v7 = vpack.c.bf16 %v1674_v3, %v1670_v2  ;;  %v5913_v2 = vld [vmem:[#allocation16] ss:$0 sm:$0xff] }
 0x2b7   :  { %v1679_v8 = vpack.c.bf16 %v1675_v6, %v1671_v5 }
 0x2b9   :  { %2151 = vmatprep.mubr.bf16.mxu0 %v1679_v8 }
 0x2ba   :  { %2152 = vmatmul.mubr.bf16.vlgmr.msra.gmra.mrb[4].mxu0 %v1678_v7 }
 0x2bb   :  { %3286 = vmatpush1.bf16.msra.mxu0 %v6927_v46  ;;  %v6989_v46 = vld [vmem:[#allocation10 + $0x1ec] ss:$24 sps:$4 sm:$0xff]  }
 0x2bc   :  { %3287 = vmatprep.subr.bf16.mxu0 %v6935_v56  ;;  %v6992_v56 = vld [vmem:[#allocation10 + $0x214] ss:$24 sps:$4 sm:$0xff]  }
 0x2bf   :  { %3288 = vmatpush1.bf16.msra.mxu0 %v6933_v53  ;;  %v6987_v53 = vld [vmem:[#allocation10 + $0x1e8] ss:$24 sps:$4 sm:$0xff]  }
 0x2c0   :  { %3289 = vmatprep.subr.bf16.mxu0 %v6941_v58  ;;  %v6990_v58 = vld [vmem:[#allocation10 + $0x210] ss:$24 sps:$4 sm:$0xff]  }
 0x2c3   :  { %3290 = vmatpush1.bf16.msra.mxu0 %v6939_v57  ;;  %v6995_v57 = vld [vmem:[#allocation10 + $0x21c] ss:$24 sps:$4 sm:$0xff]  }
 0x2c4   :  { %3291 = vmatprep.subr.bf16.mxu0 %v6947_v60  ;;  %v6998_v60 = vld [vmem:[#allocation10 + $0x244] ss:$24 sps:$4 sm:$0xff]  }
 0x2c7   :  { %3292 = vmatpush1.bf16.msra.mxu0 %v6945_v59  ;;  %v6993_v59 = vld [vmem:[#allocation10 + $0x218] ss:$24 sps:$4 sm:$0xff]  }
 0x2c8   :  { %3293 = vmatprep.subr.bf16.mxu0 %v6953_v62  ;;  %v6996_v62 = vld [vmem:[#allocation10 + $0x240] ss:$24 sps:$4 sm:$0xff]  }
 0x2cb   :  { %3294 = vmatpush1.bf16.msra.mxu0 %v6951_v61  ;;  %v7001_v61 = vld [vmem:[#allocation10 + $0x24c] ss:$24 sps:$4 sm:$0xff]  }
 0x2cc   :  { %3295 = vmatprep.subr.bf16.mxu0 %v6959_v0  ;;  %v7004_v0 = vld [vmem:[#allocation10 + $0x274] ss:$24 sps:$4 sm:$0xff]  }
 0x2cf   :  { %3296 = vmatpush1.bf16.msra.mxu0 %v6957_v63  ;;  %v6999_v63 = vld [vmem:[#allocation10 + $0x248] ss:$24 sps:$4 sm:$0xff]  }
 0x38d   :  { %v2153_v16 = vpop.f32.mrb[4].mxu0 }
 0x38e   :  { %v6401_v17 = vadd.f32 %v2153_v16, %v1749_v15  ;;  %v2155_v18 = vpop.f32.mrb[5].mxu0  ;;  %v6922_v16 = vld [vmem:[#allocation8 + $0x98] ss:$12 sps:$4 sm:$0xff]  }
 0x38f   :  { %v6402_v19 = vadd.f32 %v2155_v18, %v1753_v34  ;;  %v2157_v4 = vpop.f32.mrb[6].mxu0  ;;  %v6926_v18 = vld [vmem:[#allocation10 + $0x4] ss:$24 sps:$4 sm:$0xff]  }
 0x390   :  { %v6403_v20 = vadd.f32 %v2157_v4, %v1749_v15  ;;  %v2159_v21 = vpop.f32.mrb[7].mxu0  ;;  %v2162_v22 = vmax.f32 %v6401_v17, 0.0  ;;  %v6920_v15 = vld [vmem:[#allocation8 + $0x68] ss:$12 sps:$4 sm:$0xff]   ;;  %v6923_v17 = vld [vmem:[#allocation8 + $0xb0] ss:$12 sps:$4 sm:$0xff]  }
 0x391   :  { %v6404_v51 = vadd.f32 %v2159_v21, %v1753_v34  ;;  %v2163_v24 = vmax.f32 %v6402_v19, 0.0  ;;  %v6921_v34 = vld [vmem:[#allocation8 + $0x80] ss:$12 sps:$4 sm:$0xff]   ;;  %v6938_v21 = vld [vmem:[#allocation10 + $0x64] ss:$24 sps:$4 sm:$0xff]  }
 0x392   :  { %v2164_v23 = vmax.f32 %v6403_v20, 0.0  ;;  %v6924_v19 = vld [vmem:[#allocation10] ss:$24 sps:$4 sm:$0xff]   ;;  %v6932_v4 = vld [vmem:[#allocation10 + $0x34] ss:$24 sps:$4 sm:$0xff]  }
 0x393   :  { %v2165_v25 = vmax.f32 %v6404_v51, 0.0  ;;  %v6930_v20 = vld [vmem:[#allocation10 + $0x30] ss:$24 sps:$4 sm:$0xff]   ;;  %v6936_v51 = vld [vmem:[#allocation10 + $0x60] ss:$24 sps:$4 sm:$0xff]  }
 0x394   :  { %v2166_v26 = vpack.c.bf16 %v2164_v23, %v2162_v22  ;;  %v6944_v22 = vld [vmem:[#allocation10 + $0x94] ss:$24 sps:$4 sm:$0xff]   ;;  %v6942_v23 = vld [vmem:[#allocation10 + $0x90] ss:$24 sps:$4 sm:$0xff]  }
 0x395   :  { %v2167_v27 = vpack.c.bf16 %v2165_v25, %v2163_v24  ;;  %v6950_v24 = vld [vmem:[#allocation10 + $0xc4] ss:$24 sps:$4 sm:$0xff]   ;;  %v6948_v25 = vld [vmem:[#allocation10 + $0xc0] ss:$24 sps:$4 sm:$0xff]  }
 0x397   :  { %2335 = vmatprep.mubr.bf16.mxu1 %v2167_v27  ;;  %v6954_v27 = vld [vmem:[#allocation10 + $0xf0] ss:$24 sps:$4 sm:$0xff]  }
 0x398   :  { %2336 = vmatmul.mubr.bf16.vlgmr.msra.gmra.mrb[8].mxu1 %v2166_v26  ;;  %v6956_v26 = vld [vmem:[#allocation10 + $0xf4] ss:$24 sps:$4 sm:$0xff]  }
 0x399   :  { %2523 = vmatpush1.bf16.msra.mxu1 %v6892_v28  ;;  %2554 = vmatprep.mubr.bf16.mxu1 %v7882_v44  ;;  %v6962_v28 = vld [vmem:[#allocation10 + $0x124] ss:$24 sps:$4 sm:$0xff]   ;;  %v6981_v44 = vld [vmem:[#allocation10 + $0x1b8] ss:$24 sps:$4 sm:$0xff]  }
 0x39a   :  { %2524 = vmatprep.subr.bf16.mxu1 %v6897_v29  ;;  %v6960_v29 = vld [vmem:[#allocation10 + $0x120] ss:$24 sps:$4 sm:$0xff]  }
 0x39d   :  { %2525 = vmatpush1.bf16.msra.mxu1 %v6895_v30  ;;  %v6965_v30 = vld [vmem:[#allocation10 + $0x12c] ss:$24 sps:$4 sm:$0xff]  }
 0x39e   :  { %2526 = vmatprep.subr.bf16.mxu1 %v6900_v31  ;;  %v6963_v31 = vld [vmem:[#allocation10 + $0x128] ss:$24 sps:$4 sm:$0xff]   ;;  %3297 = vmatprep.subr.bf16.mxu0 %v6965_v30 }
 0x39f   :  { %3298 = vmatpush1.bf16.msra.mxu0 %v6963_v31  ;;  %v7070_v31 = vld [vmem:[#allocation11 + $0x4] ss:$24 sps:$4 sm:$0xff]  }
 0x3a1   :  { %2527 = vmatpush1.bf16.msra.mxu1 %v6898_v32  ;;  %v6968_v32 = vld [vmem:[#allocation10 + $0x154] ss:$24 sps:$4 sm:$0xff]  }
 0x3a2   :  { %2528 = vmatprep.subr.bf16.mxu1 %v6903_v33  ;;  %v6966_v33 = vld [vmem:[#allocation10 + $0x150] ss:$24 sps:$4 sm:$0xff]  }
 0x3a5   :  { %2529 = vmatpush1.bf16.msra.mxu1 %v6901_v35  ;;  %v6971_v35 = vld [vmem:[#allocation10 + $0x15c] ss:$24 sps:$4 sm:$0xff]  }
 0x3a6   :  { %2530 = vmatprep.subr.bf16.mxu1 %v6906_v36  ;;  %v6969_v36 = vld [vmem:[#allocation10 + $0x158] ss:$24 sps:$4 sm:$0xff]   ;;  %3299 = vmatprep.subr.bf16.mxu0 %v6971_v35 }
 0x3a7   :  { %3300 = vmatpush1.bf16.msra.mxu0 %v6969_v36  ;;  %v7020_v36 = vld [vmem:[#allocation10 + $0x10] ss:$24 sps:$4 sm:$0xff]  }
 0x3a9   :  { %2531 = vmatpush1.bf16.msra.mxu1 %v6904_v37  ;;  %v6974_v37 = vld [vmem:[#allocation10 + $0x184] ss:$24 sps:$4 sm:$0xff]  }
 0x3aa   :  { %2532 = vmatprep.subr.bf16.mxu1 %v6909_v38  ;;  %v6972_v38 = vld [vmem:[#allocation10 + $0x180] ss:$24 sps:$4 sm:$0xff]  }
 0x3ad   :  { %2533 = vmatpush1.bf16.msra.mxu1 %v6907_v39  ;;  %v6975_v39 = vld [vmem:[#allocation10 + $0x188] ss:$24 sps:$4 sm:$0xff]  }
 0x3ae   :  { %2534 = vmatprep.subr.bf16.mxu1 %v6912_v40  ;;  %v6977_v40 = vld [vmem:[#allocation10 + $0x18c] ss:$24 sps:$4 sm:$0xff]  }
 0x3af   :  { %3301 = vmatprep.subr.bf16.mxu0 %v6977_v40  ;;  %v7023_v40 = vld [vmem:[#allocation10 + $0x40] ss:$24 sps:$4 sm:$0xff]  }
 0x3b0   :  { %3302 = vmatpush1.bf16.msra.mxu0 %v6975_v39  ;;  %v7076_v39 = vld [vmem:[#allocation11 + $0x34] ss:$24 sps:$4 sm:$0xff]  }
 0x3b1   :  { %2535 = vmatpush1.bf16.msra.mxu1 %v6910_v41  ;;  %v6980_v41 = vld [vmem:[#allocation10 + $0x1b4] ss:$24 sps:$4 sm:$0xff]  }
 0x3b2   :  { %2536 = vmatprep.subr.bf16.mxu1 %v6915_v42  ;;  %v6978_v42 = vld [vmem:[#allocation10 + $0x1b0] ss:$24 sps:$4 sm:$0xff]  }
 0x3b5   :  { %2537 = vmatpush1.bf16.msra.mxu1 %v6913_v43  ;;  %v6983_v43 = vld [vmem:[#allocation10 + $0x1bc] ss:$24 sps:$4 sm:$0xff]  }
 0x3b6   :  { %6369 = vmatprep.subr.bf16.mxu1 %v7883_v45  ;;  %3303 = vmatprep.subr.bf16.mxu0 %v6983_v43  ;;  %v7082_v43 = vld [vmem:[#allocation11 + $0x64] ss:$24 sps:$4 sm:$0xff]  }
 0x3b7   :  { %3304 = vmatpush1.bf16.msra.mxu0 %v6981_v44  ;;  %v7026_v44 = vld [vmem:[#allocation10 + $0x70] ss:$24 sps:$4 sm:$0xff]  }
 0x3b8   :  { %3305 = vmatprep.subr.bf16.mxu0 %v6989_v46  ;;  %v7080_v46 = vld [vmem:[#allocation11 + $0x60] ss:$24 sps:$4 sm:$0xff]  }
 0x3bb   :  { %3306 = vmatpush1.bf16.msra.mxu0 %v6987_v53  ;;  %v7029_v53 = vld [vmem:[#allocation10 + $0xa0] ss:$24 sps:$4 sm:$0xff]  }
 0x3bc   :  { %3307 = vmatprep.subr.bf16.mxu0 %v6995_v57  ;;  %v7086_v57 = vld [vmem:[#allocation11 + $0x90] ss:$24 sps:$4 sm:$0xff]  }
 0x3bf   :  { %3308 = vmatpush1.bf16.msra.mxu0 %v6993_v59  ;;  %v7032_v59 = vld [vmem:[#allocation10 + $0xd0] ss:$24 sps:$4 sm:$0xff]  }
 0x3c0   :  { %3309 = vmatprep.subr.bf16.mxu0 %v7001_v61  ;;  %v7092_v61 = vld [vmem:[#allocation11 + $0xc0] ss:$24 sps:$4 sm:$0xff]  }
 0x3c3   :  { %3310 = vmatpush1.bf16.msra.mxu0 %v6999_v63  ;;  %v7035_v63 = vld [vmem:[#allocation10 + $0x100] ss:$24 sps:$4 sm:$0xff]  }
 0x46b   :  { %v6354_v1 = vpop.f32.mrb[8].mxu1 }
 0x46c   :  { %v6355_v3 = vpop.f32.mrb[9].mxu1 }
 0x46d   :  { %v6356_v5 = vadd.f32 %v6355_v3, %v6354_v1  ;;  %v6357_v6 = vpop.f32.mrb[10].mxu1  ;;  %v7007_v1 = vld [vmem:[#allocation10 + $0x27c] ss:$24 sps:$4 sm:$0xff]   ;;  %v7005_v3 = vld [vmem:[#allocation10 + $0x278] ss:$24 sps:$4 sm:$0xff]  }
 0x46e   :  { %v6358_v7 = vpop.f32.mrb[11].mxu1  ;;  %3311 = vmatprep.subr.bf16.mxu0 %v7007_v1  ;;  %v7098_v1 = vld [vmem:[#allocation11 + $0xf0] ss:$24 sps:$4 sm:$0xff]  }
 0x46f   :  { %v2338_v8 = vadd.f32 %v6356_v5, %v5913_v2  ;;  %v6359_v9 = vadd.f32 %v6358_v7, %v6357_v6  ;;  %3312 = vmatpush1.bf16.msra.mxu0 %v7005_v3  ;;  %v7010_v5 = vld [vmem:[#allocation10 + $0x2a4] ss:$24 sps:$4 sm:$0xff]   ;;  %v7008_v6 = vld [vmem:[#allocation10 + $0x2a0] ss:$24 sps:$4 sm:$0xff]   ;;  %v7038_v3 = vld [vmem:[#allocation10 + $0x130] ss:$24 sps:$4 sm:$0xff]  }
 0x470   :  { %v7013_v7 = vld [vmem:[#allocation10 + $0x2ac] ss:$24 sps:$4 sm:$0xff]  }
 0x471   :  { %2624 = vst [vmem:[#allocation22] sm:$0xff] %v2338_v8  ;;  %v2341_v10 = vadd.f32 %v6359_v9, %v5913_v2  ;;  %v7002_v2 = vld [vmem:[#allocation10 + $0x270] ss:$24 sps:$4 sm:$0xff]   ;;  %3313 = vmatprep.subr.bf16.mxu0 %v7013_v7  ;;  %v7016_v9 = vld [vmem:[#allocation10 + $0x2d4] ss:$24 sps:$4 sm:$0xff]  }
 0x472   :  { %v7112_v7 = vld [vmem:[#allocation11 + $0x154] ss:$24 sps:$4 sm:$0xff]  }
 0x473   :  { %v2344_v11 = vpack.c.bf16 %v2341_v10, %v2338_v8  ;;  %2625 = vst [vmem:[#allocation22 + $0x8] sm:$0xff] %v2341_v10  ;;  %v7011_v8 = vld [vmem:[#allocation10 + $0x2a8] ss:$24 sps:$4 sm:$0xff]  }
 0x474   :  { %3314 = vmatpush1.bf16.msra.mxu0 %v7011_v8  ;;  %v7014_v10 = vld [vmem:[#allocation10 + $0x2d0] ss:$24 sps:$4 sm:$0xff]   ;;  %v7041_v8 = vld [vmem:[#allocation10 + $0x160] ss:$24 sps:$4 sm:$0xff]  }
 0x475   :  { %2555 = vmatmul.mubr.bf16.vlgmr.msra.gmra.mrb[12].mxu1 %v2344_v11 }
 0x476   :  { %6370 = vmatpush3.bf16.msra.mxu1 %v6916_v49  ;;  %6385 = vmatprep.mubr.msk.bf16.mxu1 %vm7884_vm0, %v7883_v45  ;;  %v7019_v49 = vld [vmem:[#allocation10 + $0x2dc] ss:$24 sps:$4 sm:$0xff]  }
 0x477   :  { %6371 = vmatprep.subr.bf16.mxu1 %v7883_v45  ;;  %3315 = vmatprep.subr.bf16.mxu0 %v7019_v49  ;;  %v7118_v49 = vld [vmem:[#allocation11 + $0x184] ss:$24 sps:$4 sm:$0xff]  }
 0x47a   :  { %6372 = vmatpush3.bf16.msra.mxu1 %v6917_v12  ;;  %v7022_v12 = vld [vmem:[#allocation10 + $0x14] ss:$24 sps:$4 sm:$0xff]  }
 0x47b   :  { %6373 = vmatprep.subr.bf16.mxu1 %v7883_v45 }
 0x47e   :  { %6374 = vmatpush3.bf16.msra.mxu1 %v6918_v13  ;;  %v2377_v13 = vld [vmem:[#allocation17] sm:$0x7] }
 0x47f   :  { %6375 = vmatprep.subr.bf16.mxu1 %v7883_v45 }
 0x482   :  { %6376 = vmatpush3.bf16.msra.mxu1 %v6919_v14  ;;  %v2382_v14 = vrot.slane %v2377_v13, %v8165_v48 }
 0x483   :  { %6377 = vmatprep.subr.bf16.mxu1 %v7883_v45 }
 0x486   :  { %6378 = vmatpush3.bf16.msra.mxu1 %v6920_v15  ;;  %v2386_v15 = vrot.slane %v2377_v13, %v8170_v50 }
 0x487   :  { %6379 = vmatprep.subr.bf16.mxu1 %v7883_v45 }
 0x48a   :  { %6380 = vmatpush3.bf16.msra.mxu1 %v6921_v34 }
 0x48b   :  { %6381 = vmatprep.subr.bf16.mxu1 %v7883_v45 }
 0x48e   :  { %6382 = vmatpush3.bf16.msra.mxu1 %v6922_v16 }
 0x48f   :  { %6383 = vmatprep.subr.bf16.mxu1 %v7883_v45  ;;  %v6986_v45 = vld [vmem:[#allocation10 + $0x1e4] ss:$24 sps:$4 sm:$0xff]  }
 0x492   :  { %6384 = vmatpush3.bf16.msra.mxu1 %v6923_v17 }
 0x493   :  { %3242 = vmatprep.subr.bf16.mxu1 %v6926_v18 }
 0x495   :  { %6386 = vmatmul.mubr.bf16.vlgmr.msra.gmra.mrb[16].mxu1 %v2344_v11  ;;  %v7017_v11 = vld [vmem:[#allocation10 + $0x2d8] ss:$24 sps:$4 sm:$0xff]  }
 0x496   :  { %3243 = vmatpush1.bf16.msra.mxu1 %v6924_v19  ;;  %3316 = vmatpush1.bf16.msra.mxu0 %v7017_v11  ;;  %v7044_v11 = vld [vmem:[#allocation10 + $0x190] ss:$24 sps:$4 sm:$0xff]  }
 0x497   :  { %3244 = vmatprep.subr.bf16.mxu1 %v6932_v4  ;;  %5149 = vmatprep.subr.bf16.mxu0 %v7070_v31  ;;  %v7059_v31 = vld [vmem:[#allocation10 + $0x280] ss:$24 sps:$4 sm:$0xff]  }
 0x49a   :  { %3245 = vmatpush1.bf16.msra.mxu1 %v6930_v20 }
 0x49b   :  { %3246 = vmatprep.subr.bf16.mxu1 %v6938_v21 }
 0x49e   :  { %3247 = vmatpush1.bf16.msra.mxu1 %v6936_v51 }
 0x49f   :  { %3248 = vmatprep.subr.bf16.mxu1 %v6944_v22 }
 0x4a2   :  { %3249 = vmatpush1.bf16.msra.mxu1 %v6942_v23 }
 0x4a3   :  { %3250 = vmatprep.subr.bf16.mxu1 %v6950_v24  ;;  %v2390_v24 = vrot.slane %v2377_v13, %v8177_v54  ;;  %v7116_v13 = vld [vmem:[#allocation11 + $0x180] ss:$24 sps:$4 sm:$0xff]  }
 0x4a6   :  { %3251 = vmatpush1.bf16.msra.mxu1 %v6948_v25 }
 0x4a7   :  { %3252 = vmatprep.subr.bf16.mxu1 %v6956_v26 }
 0x4aa   :  { %3253 = vmatpush1.bf16.msra.mxu1 %v6954_v27 }
 0x4ab   :  { %3254 = vmatprep.subr.bf16.mxu1 %v6962_v28 }
 0x4ae   :  { %3255 = vmatpush1.bf16.msra.mxu1 %v6960_v29 }
 0x4af   :  { %3256 = vmatprep.subr.bf16.mxu1 %v6968_v32 }
 0x4b2   :  { %3257 = vmatpush1.bf16.msra.mxu1 %v6966_v33 }
 0x4b3   :  { %3258 = vmatprep.subr.bf16.mxu1 %v6974_v37  ;;  %v7025_v37 = vld [vmem:[#allocation10 + $0x44] ss:$24 sps:$4 sm:$0xff]  }
 0x4b6   :  { %3259 = vmatpush1.bf16.msra.mxu1 %v6972_v38  ;;  %v7068_v38 = vld [vmem:[#allocation11] ss:$24 sps:$4 sm:$0xff]  }
 0x4b7   :  { %3260 = vmatprep.subr.bf16.mxu1 %v6980_v41  ;;  %v7028_v41 = vld [vmem:[#allocation10 + $0x74] ss:$24 sps:$4 sm:$0xff]  }
 0x4ba   :  { %3261 = vmatpush1.bf16.msra.mxu1 %v6978_v42  ;;  %v7074_v42 = vld [vmem:[#allocation11 + $0x30] ss:$24 sps:$4 sm:$0xff]  }
 0x4bb   :  { %3262 = vmatprep.subr.bf16.mxu1 %v6986_v45  ;;  %v7031_v45 = vld [vmem:[#allocation10 + $0xa4] ss:$24 sps:$4 sm:$0xff]  }
 0x4be   :  { %3263 = vmatpush1.bf16.msra.mxu1 %v6984_v52  ;;  %v7088_v52 = vld [vmem:[#allocation11 + $0x94] ss:$24 sps:$4 sm:$0xff]  }
 0x4bf   :  { %3264 = vmatprep.subr.bf16.mxu1 %v6992_v56  ;;  %v7034_v56 = vld [vmem:[#allocation10 + $0xd4] ss:$24 sps:$4 sm:$0xff]  }
 0x4c2   :  { %3265 = vmatpush1.bf16.msra.mxu1 %v6990_v58  ;;  %v7094_v58 = vld [vmem:[#allocation11 + $0xc4] ss:$24 sps:$4 sm:$0xff]  }
 0x4c3   :  { %3266 = vmatprep.subr.bf16.mxu1 %v6998_v60  ;;  %v7037_v60 = vld [vmem:[#allocation10 + $0x104] ss:$24 sps:$4 sm:$0xff]  }
 0x4c6   :  { %3267 = vmatpush1.bf16.msra.mxu1 %v6996_v62  ;;  %v7100_v62 = vld [vmem:[#allocation11 + $0xf4] ss:$24 sps:$4 sm:$0xff]  }
 0x4c7   :  { %3268 = vmatprep.subr.bf16.mxu1 %v7004_v0  ;;  %v7040_v0 = vld [vmem:[#allocation10 + $0x134] ss:$24 sps:$4 sm:$0xff]  }
 0x4ca   :  { %3269 = vmatpush1.bf16.msra.mxu1 %v7002_v2  ;;  %v7106_v2 = vld [vmem:[#allocation11 + $0x124] ss:$24 sps:$4 sm:$0xff]  }
 0x4cb   :  { %3270 = vmatprep.subr.bf16.mxu1 %v7010_v5  ;;  %v7043_v5 = vld [vmem:[#allocation10 + $0x164] ss:$24 sps:$4 sm:$0xff]  }
 0x4ce   :  { %3271 = vmatpush1.bf16.msra.mxu1 %v7008_v6  ;;  %v7104_v6 = vld [vmem:[#allocation11 + $0x120] ss:$24 sps:$4 sm:$0xff]  }
 0x4cf   :  { %3272 = vmatprep.subr.bf16.mxu1 %v7016_v9  ;;  %v7046_v9 = vld [vmem:[#allocation10 + $0x194] ss:$24 sps:$4 sm:$0xff]  }
 0x4d2   :  { %3273 = vmatpush1.bf16.msra.mxu1 %v7014_v10  ;;  %v7110_v10 = vld [vmem:[#allocation11 + $0x150] ss:$24 sps:$4 sm:$0xff]  }
 0x4d3   :  { %3328 = vmatprep.subr.bf16.mxu1 %v7022_v12  ;;  %v7049_v12 = vld [vmem:[#allocation10 + $0x1c4] ss:$24 sps:$4 sm:$0xff]  }
 0x548   :  { %v2556_v34 = vpop.f32.mrb[12].mxu1 }
 0x549   :  { %v8190_v16 = vadd.f32 %v2556_v34, %v2382_v14  ;;  %v2558_v17 = vpop.f32.mrb[13].mxu1  ;;  %v7052_v34 = vld [vmem:[#allocation10 + $0x1f4] ss:$24 sps:$4 sm:$0xff]  }
 0x54a   :  { %v2559_v18 = vadd.f32 %v2558_v17, %v2386_v15  ;;  %v2560_v19 = vpop.f32.mrb[14].mxu1  ;;  %v7122_v17 = vld [vmem:[#allocation11 + $0x1b0] ss:$24 sps:$4 sm:$0xff]  }
 0x54b   :  { %v2562_v4 = vpop.f32.mrb[15].mxu1  ;;  %2606 = vmax.xlane.f32.xlu0 %v8190_v16  ;;  %v8193_v21 = vadd.f32 %v2560_v19, %v2382_v14  ;;  %v7124_v14 = vld [vmem:[#allocation11 + $0x1b4] ss:$24 sps:$4 sm:$0xff]   ;;  %v7050_v19 = vld [vmem:[#allocation10 + $0x1f0] ss:$24 sps:$4 sm:$0xff]  }
 0x54c   :  { %v2563_v20 = vadd.f32 %v2562_v4, %v2386_v15  ;;  %v2628_v51 = vmax.f32 %v2559_v18, 0.0  ;;  %v7047_v15 = vld [vmem:[#allocation10 + $0x1c0] ss:$24 sps:$4 sm:$0xff]   ;;  %v7130_v18 = vld [vmem:[#allocation11 + $0x1e4] ss:$24 sps:$4 sm:$0xff]  }
 0x54d   :  { %v7055_v4 = vld [vmem:[#allocation10 + $0x224] ss:$24 sps:$4 sm:$0xff]  }
 0x54e   :  { %v2630_v22 = vmax.f32 %v2563_v20, 0.0  ;;  %v7128_v20 = vld [vmem:[#allocation11 + $0x1e0] ss:$24 sps:$4 sm:$0xff]  }
 0x54f   :  { %2608 = vmax.xlane.f32.xlu0 %v8193_v21 }
 0x550   :  { %v8196_v23 = vpack.c.bf16 %v2630_v22, %v2628_v51  ;;  %v7136_v51 = vld [vmem:[#allocation11 + $0x214] ss:$24 sps:$4 sm:$0xff]   ;;  %v7053_v22 = vld [vmem:[#allocation10 + $0x220] ss:$24 sps:$4 sm:$0xff]  }
 0x568   :  { %v2599_v25 = vpop.f32.mrb[16].mxu1 }
 0x569   :  { %v2600_v26 = vadd.f32 %v2599_v25, %v2390_v24  ;;  %v6387_v27 = vpop.f32.mrb[17].mxu1  ;;  %v7134_v25 = vld [vmem:[#allocation11 + $0x210] ss:$24 sps:$4 sm:$0xff]  }
 0x56a   :  { %v2602_v28 = vpop.f32.mrb[18].mxu1  ;;  %v7056_v27 = vld [vmem:[#allocation10 + $0x250] ss:$24 sps:$4 sm:$0xff]  }
 0x56b   :  { %v2603_v29 = vadd.f32 %v2602_v28, %v2390_v24  ;;  %v6388_v30 = vpop.f32.mrb[19].mxu1  ;;  %v2629_v32 = vmax.f32 %v2600_v26, 0.0  ;;  %v7058_v24 = vld [vmem:[#allocation10 + $0x254] ss:$24 sps:$4 sm:$0xff]   ;;  %v7142_v26 = vld [vmem:[#allocation11 + $0x244] ss:$24 sps:$4 sm:$0xff]  }
 0x56c   :  { %v7061_v28 = vld [vmem:[#allocation10 + $0x284] ss:$24 sps:$4 sm:$0xff]   ;;  %v7148_v30 = vld [vmem:[#allocation11 + $0x274] ss:$24 sps:$4 sm:$0xff]  }
 0x56d   :  { %v2631_v33 = vmax.f32 %v2603_v29, 0.0  ;;  %v7140_v29 = vld [vmem:[#allocation11 + $0x240] ss:$24 sps:$4 sm:$0xff]  }
 0x56f   :  { %v2633_v35 = vpack.c.bf16 %v2631_v33, %v2629_v32  ;;  %v7064_v32 = vld [vmem:[#allocation10 + $0x2b4] ss:$24 sps:$4 sm:$0xff]   ;;  %v7146_v33 = vld [vmem:[#allocation11 + $0x270] ss:$24 sps:$4 sm:$0xff]  }
 0x571   :  { %3274 = vmatprep.mubr.bf16.mxu1 %v2633_v35  ;;  %3317 = vmatprep.mubr.bf16.mxu0 %v2633_v35 }
 0x572   :  { %3275 = vmatmul.mubr.bf16.vlgmr.msra.gmra.mrb[20].mxu1 %v8196_v23  ;;  %3318 = vmatmul.mubr.bf16.vlgmr.msra.gmra.mrb[8].mxu0 %v8196_v23 }
 0x573   :  { %3329 = vmatpush1.bf16.msra.mxu1 %v7020_v36  ;;  %3360 = vmatprep.mubr.bf16.mxu1 %v2633_v35  ;;  %v7062_v35 = vld [vmem:[#allocation10 + $0x2b0] ss:$24 sps:$4 sm:$0xff]   ;;  %v7067_v36 = vld [vmem:[#allocation10 + $0x2e4] ss:$24 sps:$4 sm:$0xff]  }
 0x574   :  { %3330 = vmatprep.subr.bf16.mxu1 %v7025_v37  ;;  %5150 = vmatpush1.bf16.msra.mxu0 %v7068_v38  ;;  %v7065_v37 = vld [vmem:[#allocation10 + $0x2e0] ss:$24 sps:$4 sm:$0xff]   ;;  %v7073_v38 = vld [vmem:[#allocation11 + $0xc] ss:$24 sps:$4 sm:$0xff]  }
 0x575   :  { %5151 = vmatprep.subr.bf16.mxu0 %v7076_v39  ;;  %v7071_v39 = vld [vmem:[#allocation11 + $0x8] ss:$24 sps:$4 sm:$0xff]  }
 0x577   :  { %3331 = vmatpush1.bf16.msra.mxu1 %v7023_v40  ;;  %v7079_v40 = vld [vmem:[#allocation11 + $0x3c] ss:$24 sps:$4 sm:$0xff]  }
 0x578   :  { %3332 = vmatprep.subr.bf16.mxu1 %v7028_v41  ;;  %5152 = vmatpush1.bf16.msra.mxu0 %v7074_v42  ;;  %v7077_v41 = vld [vmem:[#allocation11 + $0x38] ss:$24 sps:$4 sm:$0xff]   ;;  %v7085_v42 = vld [vmem:[#allocation11 + $0x6c] ss:$24 sps:$4 sm:$0xff]  }
 0x579   :  { %5153 = vmatprep.subr.bf16.mxu0 %v7082_v43  ;;  %v7083_v43 = vld [vmem:[#allocation11 + $0x68] ss:$24 sps:$4 sm:$0xff]  }
 0x57b   :  { %3333 = vmatpush1.bf16.msra.mxu1 %v7026_v44  ;;  %v7091_v44 = vld [vmem:[#allocation11 + $0x9c] ss:$24 sps:$4 sm:$0xff]  }
 0x57c   :  { %3334 = vmatprep.subr.bf16.mxu1 %v7031_v45  ;;  %5154 = vmatpush1.bf16.msra.mxu0 %v7080_v46  ;;  %v7089_v45 = vld [vmem:[#allocation11 + $0x98] ss:$24 sps:$4 sm:$0xff]   ;;  %v7097_v46 = vld [vmem:[#allocation11 + $0xcc] ss:$24 sps:$4 sm:$0xff]  }
 0x57d   :  { %5155 = vmatprep.subr.bf16.mxu0 %v7088_v52  ;;  %v7095_v52 = vld [vmem:[#allocation11 + $0xc8] ss:$24 sps:$4 sm:$0xff]  }
 0x57f   :  { %3335 = vmatpush1.bf16.msra.mxu1 %v7029_v53  ;;  %v7103_v53 = vld [vmem:[#allocation11 + $0xfc] ss:$24 sps:$4 sm:$0xff]  }
 0x580   :  { %3336 = vmatprep.subr.bf16.mxu1 %v7034_v56  ;;  %5156 = vmatpush1.bf16.msra.mxu0 %v7086_v57  ;;  %v7101_v56 = vld [vmem:[#allocation11 + $0xf8] ss:$24 sps:$4 sm:$0xff]   ;;  %v7154_v57 = vld [vmem:[#allocation11 + $0x2a4] ss:$24 sps:$4 sm:$0xff]  }
 0x581   :  { %5157 = vmatprep.subr.bf16.mxu0 %v7094_v58  ;;  %v7107_v58 = vld [vmem:[#allocation11 + $0x128] ss:$24 sps:$4 sm:$0xff]  }
 0x583   :  { %3337 = vmatpush1.bf16.msra.mxu1 %v7032_v59  ;;  %v7152_v59 = vld [vmem:[#allocation11 + $0x2a0] ss:$24 sps:$4 sm:$0xff]  }
 0x584   :  { %3338 = vmatprep.subr.bf16.mxu1 %v7037_v60  ;;  %5158 = vmatpush1.bf16.msra.mxu0 %v7092_v61  ;;  %v7115_v60 = vld [vmem:[#allocation11 + $0x15c] ss:$24 sps:$4 sm:$0xff]  }
 0x585   :  { %5159 = vmatprep.subr.bf16.mxu0 %v7100_v62  ;;  %v7160_v61 = vld [vmem:[#allocation11 + $0x2d4] ss:$24 sps:$4 sm:$0xff]   ;;  %v7113_v62 = vld [vmem:[#allocation11 + $0x158] ss:$24 sps:$4 sm:$0xff]  }
 0x587   :  { %3339 = vmatpush1.bf16.msra.mxu1 %v7035_v63  ;;  %v7158_v63 = vld [vmem:[#allocation11 + $0x2d0] ss:$24 sps:$4 sm:$0xff]  }
 0x588   :  { %3340 = vmatprep.subr.bf16.mxu1 %v7040_v0  ;;  %5160 = vmatpush1.bf16.msra.mxu0 %v7098_v1  ;;  %v7121_v0 = vld [vmem:[#allocation11 + $0x18c] ss:$24 sps:$4 sm:$0xff]  }
 0x589   :  { %5161 = vmatprep.subr.bf16.mxu0 %v7106_v2  ;;  %v7166_v1 = vld [vmem:[#allocation11 + $0x304] ss:$24 sps:$4 sm:$0xff]   ;;  %v7119_v2 = vld [vmem:[#allocation11 + $0x188] ss:$24 sps:$4 sm:$0xff]  }
 0x58b   :  { %3341 = vmatpush1.bf16.msra.mxu1 %v7038_v3  ;;  %v7127_v3 = vld [vmem:[#allocation11 + $0x1bc] ss:$24 sps:$4 sm:$0xff]  }
 0x58c   :  { %3342 = vmatprep.subr.bf16.mxu1 %v7043_v5  ;;  %5162 = vmatpush1.bf16.msra.mxu0 %v7104_v6  ;;  %v7125_v5 = vld [vmem:[#allocation11 + $0x1b8] ss:$24 sps:$4 sm:$0xff]   ;;  %v7133_v6 = vld [vmem:[#allocation11 + $0x1ec] ss:$24 sps:$4 sm:$0xff]  }
 0x58d   :  { %5163 = vmatprep.subr.bf16.mxu0 %v7112_v7  ;;  %v7131_v7 = vld [vmem:[#allocation11 + $0x1e8] ss:$24 sps:$4 sm:$0xff]  }
 0x58f   :  { %3343 = vmatpush1.bf16.msra.mxu1 %v7041_v8 }
 0x590   :  { %3344 = vmatprep.subr.bf16.mxu1 %v7046_v9  ;;  %5164 = vmatpush1.bf16.msra.mxu0 %v7110_v10  ;;  %v7139_v9 = vld [vmem:[#allocation11 + $0x21c] ss:$24 sps:$4 sm:$0xff]  }
 0x591   :  { %5165 = vmatprep.subr.bf16.mxu0 %v7118_v49 }
 0x593   :  { %3345 = vmatpush1.bf16.msra.mxu1 %v7044_v11  ;;  %v7137_v11 = vld [vmem:[#allocation11 + $0x218] ss:$24 sps:$4 sm:$0xff]  }
 0x594   :  { %3346 = vmatprep.subr.bf16.mxu1 %v7049_v12  ;;  %5166 = vmatpush1.bf16.msra.mxu0 %v7116_v13  ;;  %v7145_v13 = vld [vmem:[#allocation11 + $0x24c] ss:$24 sps:$4 sm:$0xff]  }
 0x595   :  { %5167 = vmatprep.subr.bf16.mxu0 %v7124_v14 }
 0x597   :  { %3347 = vmatpush1.bf16.msra.mxu1 %v7047_v15 }
 0x598   :  { %3348 = vmatprep.subr.bf16.mxu1 %v7052_v34  ;;  %5168 = vmatpush1.bf16.msra.mxu0 %v7122_v17  ;;  %v7143_v34 = vld [vmem:[#allocation11 + $0x248] ss:$24 sps:$4 sm:$0xff]   ;;  %v7151_v17 = vld [vmem:[#allocation11 + $0x27c] ss:$24 sps:$4 sm:$0xff]  }
 0x599   :  { %5169 = vmatprep.subr.bf16.mxu0 %v7130_v18  ;;  %v7149_v18 = vld [vmem:[#allocation11 + $0x278] ss:$24 sps:$4 sm:$0xff]  }
 0x59b   :  { %3349 = vmatpush1.bf16.msra.mxu1 %v7050_v19  ;;  %v7157_v19 = vld [vmem:[#allocation11 + $0x2ac] ss:$24 sps:$4 sm:$0xff]  }
 0x59c   :  { %3350 = vmatprep.subr.bf16.mxu1 %v7055_v4  ;;  %5170 = vmatpush1.bf16.msra.mxu0 %v7128_v20  ;;  %v7155_v4 = vld [vmem:[#allocation11 + $0x2a8] ss:$24 sps:$4 sm:$0xff]   ;;  %v7163_v20 = vld [vmem:[#allocation11 + $0x2dc] ss:$24 sps:$4 sm:$0xff]  }
 0x59d   :  { %5171 = vmatprep.subr.bf16.mxu0 %v7136_v51 }
 0x59f   :  { %3351 = vmatpush1.bf16.msra.mxu1 %v7053_v22  ;;  %v7169_v22 = vld [vmem:[#allocation11 + $0x30c] ss:$24 sps:$4 sm:$0xff]  }
 0x5a0   :  { %3352 = vmatprep.subr.bf16.mxu1 %v7058_v24  ;;  %5172 = vmatpush1.bf16.msra.mxu0 %v7134_v25  ;;  %v8210_v24 = vld [vmem:[#allocation19] sm:$0x3f] }
 0x5a1   :  { %5173 = vmatprep.subr.bf16.mxu0 %v7142_v26  ;;  %v2735_v25 = vrot.slane %v8210_v24, %v8165_v48  ;;  %v2743_v26 = vrot.slane %v8210_v24, %v8177_v54 }
 0x5a3   :  { %3353 = vmatpush1.bf16.msra.mxu1 %v7056_v27  ;;  %v2739_v27 = vrot.slane %v8210_v24, %v8170_v50 }
 0x5a4   :  { %3354 = vmatprep.subr.bf16.mxu1 %v7061_v28  ;;  %5174 = vmatpush1.bf16.msra.mxu0 %v7140_v29  ;;  %v2747_v28 = vrot.slane %v8210_v24, %v8180_v55 }
 0x5a5   :  { %5175 = vmatprep.subr.bf16.mxu0 %v7148_v30 }
 0x5a7   :  { %3355 = vmatpush1.bf16.msra.mxu1 %v7059_v31 }
 0x5a8   :  { %3356 = vmatprep.subr.bf16.mxu1 %v7064_v32  ;;  %5176 = vmatpush1.bf16.msra.mxu0 %v7146_v33 }
 0x5a9   :  { %5177 = vmatprep.subr.bf16.mxu0 %v7154_v57 }
 0x5ab   :  { %3357 = vmatpush1.bf16.msra.mxu1 %v7062_v35 }
 0x5ac   :  { %3358 = vmatprep.subr.bf16.mxu1 %v7067_v36  ;;  %5178 = vmatpush1.bf16.msra.mxu0 %v7152_v59 }
 0x5ad   :  { %5179 = vmatprep.subr.bf16.mxu0 %v7160_v61 }
 0x5af   :  { %3359 = vmatpush1.bf16.msra.mxu1 %v7065_v37 }
 0x5b0   :  { %5278 = vmatprep.subr.bf16.mxu1 %v7073_v38  ;;  %5180 = vmatpush1.bf16.msra.mxu0 %v7158_v63 }
 0x5b1   :  { %5192 = vmatprep.subr.bf16.mxu0 %v7166_v1  ;;  %v7167_v1 = vld [vmem:[#allocation11 + $0x308] ss:$24 sps:$4 sm:$0xff]  }
 0x5b2   :  { %3361 = vmatmul.mubr.bf16.vlgmr.msra.gmra.mrb[24].mxu1 %v8196_v23  ;;  %v7109_v23 = vld [vmem:[#allocation11 + $0x12c] ss:$24 sps:$4 sm:$0xff]  }
 0x5b3   :  { %5279 = vmatpush1.bf16.msra.mxu1 %v7071_v39 }
 0x5b4   :  { %5280 = vmatprep.subr.bf16.mxu1 %v7079_v40 }
 0x5b7   :  { %5281 = vmatpush1.bf16.msra.mxu1 %v7077_v41 }
 0x5b8   :  { %5282 = vmatprep.subr.bf16.mxu1 %v7085_v42 }
 0x5bb   :  { %5283 = vmatpush1.bf16.msra.mxu1 %v7083_v43 }
 0x5bc   :  { %5284 = vmatprep.subr.bf16.mxu1 %v7091_v44 }
 0x5bf   :  { %5285 = vmatpush1.bf16.msra.mxu1 %v7089_v45 }
 0x5c0   :  { %5286 = vmatprep.subr.bf16.mxu1 %v7097_v46 }
 0x5c3   :  { %5287 = vmatpush1.bf16.msra.mxu1 %v7095_v52 }
 0x5c4   :  { %5288 = vmatprep.subr.bf16.mxu1 %v7103_v53 }
 0x5c7   :  { %5289 = vmatpush1.bf16.msra.mxu1 %v7101_v56 }
 0x5c8   :  { %5290 = vmatprep.subr.bf16.mxu1 %v7109_v23 }
 0x5cb   :  { %5291 = vmatpush1.bf16.msra.mxu1 %v7107_v58 }
 0x5cc   :  { %5292 = vmatprep.subr.bf16.mxu1 %v7115_v60 }
 0x5cf   :  { %5293 = vmatpush1.bf16.msra.mxu1 %v7113_v62 }
 0x5d0   :  { %5294 = vmatprep.subr.bf16.mxu1 %v7121_v0  ;;  %v7164_v0 = vld [vmem:[#allocation11 + $0x300] ss:$24 sps:$4 sm:$0xff]  }
 0x5d3   :  { %5295 = vmatpush1.bf16.msra.mxu1 %v7119_v2  ;;  %v7172_v2 = vld [vmem:[#allocation11 + $0x334] ss:$24 sps:$4 sm:$0xff]  }
 0x5d4   :  { %5296 = vmatprep.subr.bf16.mxu1 %v7127_v3  ;;  %v7175_v3 = vld [vmem:[#allocation11 + $0x33c] ss:$24 sps:$4 sm:$0xff]  }
 0x5d7   :  { %5297 = vmatpush1.bf16.msra.mxu1 %v7125_v5  ;;  %v7170_v5 = vld [vmem:[#allocation11 + $0x330] ss:$24 sps:$4 sm:$0xff]  }
 0x5d8   :  { %v2607_v8 = vpop.xlane.xlu0 %2606  ;;  %5298 = vmatprep.subr.bf16.mxu1 %v7133_v6  ;;  %v7173_v6 = vld [vmem:[#allocation11 + $0x338] ss:$24 sps:$4 sm:$0xff]  }
 0x5d9   :  { %v2610_v10 = vsub.f32 %v8190_v16, %v2607_v8  ;;  %v7181_v8 = vld [vmem:[#allocation11 + $0x36c] ss:$24 sps:$4 sm:$0xff]  }
 0x5db   :  { %v2612_v49 = vmul.f32 1.442695, %v2610_v10  ;;  %5299 = vmatpush1.bf16.msra.mxu1 %v7131_v7  ;;  %v7178_v7 = vld [vmem:[#allocation11 + $0x364] ss:$24 sps:$4 sm:$0xff]   ;;  %v7179_v10 = vld [vmem:[#allocation11 + $0x368] ss:$24 sps:$4 sm:$0xff]  }
 0x5dc   :  { %v2609_v12 = vpop.xlane.xlu0 %2608  ;;  %5300 = vmatprep.subr.bf16.mxu1 %v7139_v9  ;;  %v7176_v9 = vld [vmem:[#allocation11 + $0x360] ss:$24 sps:$4 sm:$0xff]  }
 0x5dd   :  { %7500 = vpow2.f32 %v2612_v49  ;;  %v2611_v14 = vsub.f32 %v8193_v21, %v2609_v12  ;;  %v7161_v21 = vld [vmem:[#allocation11 + $0x2d8] ss:$24 sps:$4 sm:$0xff]   ;;  %v7184_v49 = vld [vmem:[#allocation11 + $0x394] ss:$24 sps:$4 sm:$0xff]  }
 0x5de   :  { %v7182_v12 = vld [vmem:[#allocation11 + $0x390] ss:$24 sps:$4 sm:$0xff]  }
 0x5df   :  { %v2614_v15 = vmul.f32 1.442695, %v2611_v14  ;;  %5301 = vmatpush1.bf16.msra.mxu1 %v7137_v11  ;;  %v7187_v11 = vld [vmem:[#allocation11 + $0x39c] ss:$24 sps:$4 sm:$0xff]  }
 0x5e0   :  { %5302 = vmatprep.subr.bf16.mxu1 %v7145_v13  ;;  %v7185_v13 = vld [vmem:[#allocation11 + $0x398] ss:$24 sps:$4 sm:$0xff]   ;;  %v7190_v14 = vld [vmem:[#allocation11 + $0x3c4] ss:$24 sps:$4 sm:$0xff]  }
 0x5e1   :  { %7502 = vpow2.f32 %v2614_v15  ;;  %v7193_v15 = vld [vmem:[#allocation11 + $0x3cc] ss:$24 sps:$4 sm:$0xff]  }
 0x5e3   :  { %5303 = vmatpush1.bf16.msra.mxu1 %v7143_v34  ;;  %v7188_v34 = vld [vmem:[#allocation11 + $0x3c0] ss:$24 sps:$4 sm:$0xff]  }
 0x5e4   :  { %5304 = vmatprep.subr.bf16.mxu1 %v7151_v17  ;;  %v7191_v17 = vld [vmem:[#allocation11 + $0x3c8] ss:$24 sps:$4 sm:$0xff]  }
 0x5e7   :  { %v8204_v16 = vpop.eup %7500  ;;  %5305 = vmatpush1.bf16.msra.mxu1 %v7149_v18  ;;  %v7196_v18 = vld [vmem:[#allocation11 + $0x3f4] ss:$24 sps:$4 sm:$0xff]  }
 0x5e8   :  { %2616 = vadd.xlane.f32.xlu1 %v8204_v16  ;;  %5306 = vmatprep.subr.bf16.mxu1 %v7157_v19  ;;  %v7199_v19 = vld [vmem:[#allocation11 + $0x3fc] ss:$24 sps:$4 sm:$0xff]  }
 0x5eb   :  { %v8207_v51 = vpop.eup %7502  ;;  %5307 = vmatpush1.bf16.msra.mxu1 %v7155_v4  ;;  %v7194_v4 = vld [vmem:[#allocation11 + $0x3f0] ss:$24 sps:$4 sm:$0xff]  }
 0x5ec   :  { %2618 = vadd.xlane.f32.xlu1 %v8207_v51  ;;  %5308 = vmatprep.subr.bf16.mxu1 %v7163_v20  ;;  %v7197_v20 = vld [vmem:[#allocation11 + $0x3f8] ss:$24 sps:$4 sm:$0xff]  }
 0x5ef   :  { %5309 = vmatpush1.bf16.msra.mxu1 %v7161_v21  ;;  %v7202_v21 = vld [vmem:[#allocation11 + $0x424] ss:$24 sps:$4 sm:$0xff]  }
 0x5f0   :  { %5321 = vmatprep.subr.bf16.mxu1 %v7169_v22  ;;  %v7205_v22 = vld [vmem:[#allocation11 + $0x42c] ss:$24 sps:$4 sm:$0xff]  }
 0x645   :  { %v3276_v29 = vpop.f32.mrb[20].mxu1  ;;  %v3319_v30 = vpop.f32.mrb[8].mxu0 }
 0x646   :  { %v3277_v31 = vadd.f32 %v3276_v29, %v2735_v25  ;;  %v3320_v32 = vadd.f32 %v3319_v30, %v2743_v26  ;;  %v3278_v33 = vpop.f32.mrb[21].mxu1  ;;  %v3321_v35 = vpop.f32.mrb[9].mxu0  ;;  %v7206_v29 = vld [vmem:[#allocation11 + $0x450] ss:$24 sps:$4 sm:$0xff]  }
 0x647   :  { %v3279_v36 = vadd.f32 %v3278_v33, %v2739_v27  ;;  %v3322_v37 = vadd.f32 %v3321_v35, %v2747_v28  ;;  %v3280_v38 = vpop.f32.mrb[22].mxu1  ;;  %v3323_v39 = vpop.f32.mrb[10].mxu0  ;;  %v7209_v30 = vld [vmem:[#allocation11 + $0x458] ss:$24 sps:$4 sm:$0xff]   ;;  %v7215_v35 = vld [vmem:[#allocation11 + $0x488] ss:$24 sps:$4 sm:$0xff]  }
 0x648   :  { %v3281_v40 = vadd.f32 %v3280_v38, %v2735_v25  ;;  %v3324_v41 = vadd.f32 %v3323_v39, %v2743_v26  ;;  %v3282_v42 = vpop.f32.mrb[23].mxu1  ;;  %v3325_v43 = vpop.f32.mrb[11].mxu0  ;;  %v3371_v46 = vmax.f32 %v3277_v31, 0.0  ;;  %v3373_v52 = vmax.f32 %v3320_v32, 0.0  ;;  %v7200_v25 = vld [vmem:[#allocation11 + $0x420] ss:$24 sps:$4 sm:$0xff]  }
 0x649   :  { %v3283_v44 = vadd.f32 %v3282_v42, %v2739_v27  ;;  %v3326_v45 = vadd.f32 %v3325_v43, %v2747_v28  ;;  %v3372_v23 = vmax.f32 %v3279_v36, 0.0  ;;  %v3374_v57 = vmax.f32 %v3322_v37, 0.0  ;;  %v7203_v26 = vld [vmem:[#allocation11 + $0x428] ss:$24 sps:$4 sm:$0xff]   ;;  %v7208_v27 = vld [vmem:[#allocation11 + $0x454] ss:$24 sps:$4 sm:$0xff]  }
 0x64a   :  { %v3377_v53 = vmax.f32 %v3281_v40, 0.0  ;;  %v3379_v56 = vmax.f32 %v3324_v41, 0.0  ;;  %v7211_v28 = vld [vmem:[#allocation11 + $0x45c] ss:$24 sps:$4 sm:$0xff]   ;;  %v7217_v32 = vld [vmem:[#allocation11 + $0x48c] ss:$24 sps:$4 sm:$0xff]  }
 0x64b   :  { %v3378_v58 = vmax.f32 %v3283_v44, 0.0  ;;  %v3380_v59 = vmax.f32 %v3326_v45, 0.0  ;;  %v7214_v31 = vld [vmem:[#allocation11 + $0x484] ss:$24 sps:$4 sm:$0xff]   ;;  %v7212_v33 = vld [vmem:[#allocation11 + $0x480] ss:$24 sps:$4 sm:$0xff]  }
 0x64c   :  { %v8220_v60 = vpack.c.bf16 %v3377_v53, %v3371_v46  ;;  %v8222_v61 = vpack.c.bf16 %v3379_v56, %v3373_v52  ;;  %v7220_v36 = vld [vmem:[#allocation11 + $0x4b4] ss:$24 sps:$4 sm:$0xff]   ;;  %v7218_v38 = vld [vmem:[#allocation11 + $0x4b0] ss:$24 sps:$4 sm:$0xff]   ;;  %v7226_v40 = vld [vmem:[#allocation11 + $0x4e4] ss:$24 sps:$4 sm:$0xff]  }
 0x64d   :  { %v8224_v62 = vpack.c.bf16 %v3378_v58, %v3372_v23  ;;  %v8226_v63 = vpack.c.bf16 %v3380_v59, %v3374_v57  ;;  %v7223_v37 = vld [vmem:[#allocation11 + $0x4bc] ss:$24 sps:$4 sm:$0xff]   ;;  %v7221_v39 = vld [vmem:[#allocation11 + $0x4b8] ss:$24 sps:$4 sm:$0xff]   ;;  %v7229_v41 = vld [vmem:[#allocation11 + $0x4ec] ss:$24 sps:$4 sm:$0xff]  }
 0x64e   :  { %v7224_v43 = vld [vmem:[#allocation11 + $0x4e0] ss:$24 sps:$4 sm:$0xff]   ;;  %v7232_v45 = vld [vmem:[#allocation11 + $0x514] ss:$24 sps:$4 sm:$0xff]   ;;  %v7230_v53 = vld [vmem:[#allocation11 + $0x510] ss:$24 sps:$4 sm:$0xff]  }
 0x64f   :  { %5181 = vmatprep.mubr.bf16.mxu0 %v8224_v62  ;;  %5310 = vmatprep.mubr.bf16.mxu1 %v8224_v62  ;;  %v7227_v44 = vld [vmem:[#allocation11 + $0x4e8] ss:$24 sps:$4 sm:$0xff]   ;;  %v7235_v46 = vld [vmem:[#allocation11 + $0x51c] ss:$24 sps:$4 sm:$0xff]   ;;  %v7233_v56 = vld [vmem:[#allocation11 + $0x518] ss:$24 sps:$4 sm:$0xff]  }
 0x650   :  { %5182 = vmatmul.mubr.bf16.vlgmr.msra.gmra.mrb[12].mxu0 %v8220_v60  ;;  %5311 = vmatmul.mubr.bf16.vlgmr.msra.gmra.mrb[28].mxu1 %v8220_v60  ;;  %v7238_v23 = vld [vmem:[#allocation11 + $0x544] ss:$24 sps:$4 sm:$0xff]   ;;  %v7236_v58 = vld [vmem:[#allocation11 + $0x540] ss:$24 sps:$4 sm:$0xff]  }
 0x651   :  { %5193 = vmatpush1.bf16.msra.mxu0 %v7164_v0  ;;  %5322 = vmatpush1.bf16.msra.mxu1 %v7167_v1  ;;  %v7241_v57 = vld [vmem:[#allocation11 + $0x54c] ss:$24 sps:$4 sm:$0xff]   ;;  %v7239_v59 = vld [vmem:[#allocation11 + $0x548] ss:$24 sps:$4 sm:$0xff]   ;;  %v7247_v1 = vld [vmem:[#allocation11 + $0x57c] ss:$24 sps:$4 sm:$0xff]  }
 0x652   :  { %5224 = vmatprep.mubr.bf16.mxu0 %v8226_v63  ;;  %5353 = vmatprep.mubr.bf16.mxu1 %v8226_v63  ;;  %v7244_v0 = vld [vmem:[#allocation11 + $0x574] ss:$24 sps:$4 sm:$0xff]  }
 0x653   :  { %5194 = vmatprep.subr.bf16.mxu0 %v7172_v2  ;;  %5323 = vmatprep.subr.bf16.mxu1 %v7175_v3  ;;  %v2750_v2 = vsub.s32 4, %v8162_v47  ;;  %v2754_v3 = vsub.s32 5, %v8162_v47 }
 0x655   :  { %5195 = vmatpush1.bf16.msra.mxu0 %v7170_v5  ;;  %5324 = vmatpush1.bf16.msra.mxu1 %v7173_v6 }
 0x656   :  { %5196 = vmatprep.subr.bf16.mxu0 %v7178_v7  ;;  %5325 = vmatprep.subr.bf16.mxu1 %v7181_v8  ;;  %v7242_v7 = vld [vmem:[#allocation11 + $0x570] ss:$24 sps:$4 sm:$0xff]  }
 0x657   :  { %v7245_v8 = vld [vmem:[#allocation11 + $0x578] ss:$24 sps:$4 sm:$0xff]  }
 0x659   :  { %5197 = vmatpush1.bf16.msra.mxu0 %v7176_v9  ;;  %5326 = vmatpush1.bf16.msra.mxu1 %v7179_v10  ;;  %v2751_v9 = vrot.slane %v8210_v24, %v2750_v2  ;;  %v7250_v10 = vld [vmem:[#allocation11 + $0x5a4] ss:$24 sps:$4 sm:$0xff]  }
 0x65a   :  { %5198 = vmatprep.subr.bf16.mxu0 %v7184_v49  ;;  %5327 = vmatprep.subr.bf16.mxu1 %v7187_v11  ;;  %v7253_v49 = vld [vmem:[#allocation11 + $0x5ac] ss:$24 sps:$4 sm:$0xff]  }
 0x65d   :  { %5199 = vmatpush1.bf16.msra.mxu0 %v7182_v12  ;;  %5328 = vmatpush1.bf16.msra.mxu1 %v7185_v13 }
 0x65e   :  { %5200 = vmatprep.subr.bf16.mxu0 %v7190_v14  ;;  %5329 = vmatprep.subr.bf16.mxu1 %v7193_v15  ;;  %v7248_v14 = vld [vmem:[#allocation11 + $0x5a0] ss:$24 sps:$4 sm:$0xff]  }
 0x65f   :  { %v7251_v15 = vld [vmem:[#allocation11 + $0x5a8] ss:$24 sps:$4 sm:$0xff]  }
 0x661   :  { %5201 = vmatpush1.bf16.msra.mxu0 %v7188_v34  ;;  %5330 = vmatpush1.bf16.msra.mxu1 %v7191_v17 }
 0x662   :  { %5202 = vmatprep.subr.bf16.mxu0 %v7196_v18  ;;  %5331 = vmatprep.subr.bf16.mxu1 %v7199_v19  ;;  %v7256_v18 = vld [vmem:[#allocation11 + $0x5d4] ss:$24 sps:$4 sm:$0xff]  }
 0x663   :  { %v7259_v19 = vld [vmem:[#allocation11 + $0x5dc] ss:$24 sps:$4 sm:$0xff]  }
 0x665   :  { %5203 = vmatpush1.bf16.msra.mxu0 %v7194_v4  ;;  %5332 = vmatpush1.bf16.msra.mxu1 %v7197_v20 }
 0x666   :  { %5204 = vmatprep.subr.bf16.mxu0 %v7202_v21  ;;  %5333 = vmatprep.subr.bf16.mxu1 %v7205_v22  ;;  %v7254_v22 = vld [vmem:[#allocation11 + $0x5d0] ss:$24 sps:$4 sm:$0xff]  }
 0x669   :  { %5205 = vmatpush1.bf16.msra.mxu0 %v7200_v25  ;;  %5334 = vmatpush1.bf16.msra.mxu1 %v7203_v26  ;;  %v7257_v25 = vld [vmem:[#allocation11 + $0x5d8] ss:$24 sps:$4 sm:$0xff]  }
 0x66a   :  { %5206 = vmatprep.subr.bf16.mxu0 %v7208_v27  ;;  %5335 = vmatprep.subr.bf16.mxu1 %v7211_v28  ;;  %v7262_v28 = vld [vmem:[#allocation11 + $0x604] ss:$24 sps:$4 sm:$0xff]  }
 0x66d   :  { %5207 = vmatpush1.bf16.msra.mxu0 %v7206_v29  ;;  %5336 = vmatpush1.bf16.msra.mxu1 %v7209_v30  ;;  %v7265_v29 = vld [vmem:[#allocation11 + $0x60c] ss:$24 sps:$4 sm:$0xff]  }
 0x66e   :  { %5208 = vmatprep.subr.bf16.mxu0 %v7214_v31  ;;  %5337 = vmatprep.subr.bf16.mxu1 %v7217_v32 }
 0x671   :  { %5209 = vmatpush1.bf16.msra.mxu0 %v7212_v33  ;;  %5338 = vmatpush1.bf16.msra.mxu1 %v7215_v35  ;;  %v7260_v35 = vld [vmem:[#allocation11 + $0x600] ss:$24 sps:$4 sm:$0xff]  }
 0x672   :  { %5210 = vmatprep.subr.bf16.mxu0 %v7220_v36  ;;  %5339 = vmatprep.subr.bf16.mxu1 %v7223_v37  ;;  %v7263_v36 = vld [vmem:[#allocation11 + $0x608] ss:$24 sps:$4 sm:$0xff]   ;;  %v7268_v37 = vld [vmem:[#allocation11 + $0x634] ss:$24 sps:$4 sm:$0xff]  }
 0x675   :  { %5211 = vmatpush1.bf16.msra.mxu0 %v7218_v38  ;;  %5340 = vmatpush1.bf16.msra.mxu1 %v7221_v39  ;;  %v2617_v42 = vpop.xlane.xlu1 %2616  ;;  %v7271_v38 = vld [vmem:[#allocation11 + $0x63c] ss:$24 sps:$4 sm:$0xff]   ;;  %v7266_v39 = vld [vmem:[#allocation11 + $0x630] ss:$24 sps:$4 sm:$0xff]  }
 0x676   :  { %7504 = vrcp.f32 %v2617_v42  ;;  %5212 = vmatprep.subr.bf16.mxu0 %v7226_v40  ;;  %5341 = vmatprep.subr.bf16.mxu1 %v7229_v41  ;;  %v7269_v40 = vld [vmem:[#allocation11 + $0x638] ss:$24 sps:$4 sm:$0xff]   ;;  %v7274_v41 = vld [vmem:[#allocation11 + $0x664] ss:$24 sps:$4 sm:$0xff]  }
 0x677   :  { %v7277_v42 = vld [vmem:[#allocation11 + $0x66c] ss:$24 sps:$4 sm:$0xff]  }
 0x679   :  { %5213 = vmatpush1.bf16.msra.mxu0 %v7224_v43  ;;  %5342 = vmatpush1.bf16.msra.mxu1 %v7227_v44  ;;  %v2619_v52 = vpop.xlane.xlu1 %2618  ;;  %v7272_v43 = vld [vmem:[#allocation11 + $0x660] ss:$24 sps:$4 sm:$0xff]  }
 0x67a   :  { %7506 = vrcp.f32 %v2619_v52  ;;  %5214 = vmatprep.subr.bf16.mxu0 %v7232_v45  ;;  %5343 = vmatprep.subr.bf16.mxu1 %v7235_v46  ;;  %v7275_v44 = vld [vmem:[#allocation11 + $0x668] ss:$24 sps:$4 sm:$0xff]   ;;  %v7280_v45 = vld [vmem:[#allocation11 + $0x694] ss:$24 sps:$4 sm:$0xff]  }
 0x67b   :  { %v7283_v46 = vld [vmem:[#allocation11 + $0x69c] ss:$24 sps:$4 sm:$0xff]   ;;  %v7278_v52 = vld [vmem:[#allocation11 + $0x690] ss:$24 sps:$4 sm:$0xff]  }
 0x67d   :  { %5215 = vmatpush1.bf16.msra.mxu0 %v7230_v53  ;;  %5344 = vmatpush1.bf16.msra.mxu1 %v7233_v56  ;;  %v7281_v53 = vld [vmem:[#allocation11 + $0x698] ss:$24 sps:$4 sm:$0xff]   ;;  %v7286_v56 = vld [vmem:[#allocation11 + $0x6c4] ss:$24 sps:$4 sm:$0xff]  }
 0x67e   :  { %5216 = vmatprep.subr.bf16.mxu0 %v7238_v23  ;;  %5345 = vmatprep.subr.bf16.mxu1 %v7241_v57  ;;  %v7289_v23 = vld [vmem:[#allocation11 + $0x6cc] ss:$24 sps:$4 sm:$0xff]   ;;  %v7284_v57 = vld [vmem:[#allocation11 + $0x6c0] ss:$24 sps:$4 sm:$0xff]  }
 0x680   :  { %v7505_v5 = vpop.eup %7504 }
 0x681   :  { %v2621_v6 = vmul.f32 %v7505_v5, %v8204_v16  ;;  %5217 = vmatpush1.bf16.msra.mxu0 %v7236_v58  ;;  %5346 = vmatpush1.bf16.msra.mxu1 %v7239_v59  ;;  %v2755_v16 = vrot.slane %v8210_v24, %v2754_v3  ;;  %v7287_v58 = vld [vmem:[#allocation11 + $0x6c8] ss:$24 sps:$4 sm:$0xff]   ;;  %v7292_v59 = vld [vmem:[#allocation11 + $0x6f4] ss:$24 sps:$4 sm:$0xff]   ;;  %v7293_v5 = vld [vmem:[#allocation11 + $0x6f8] ss:$24 sps:$4 sm:$0xff]  }
 0x682   :  { %5218 = vmatprep.subr.bf16.mxu0 %v7244_v0  ;;  %5347 = vmatprep.subr.bf16.mxu1 %v7247_v1  ;;  %v7295_v0 = vld [vmem:[#allocation11 + $0x6fc] ss:$24 sps:$4 sm:$0xff]   ;;  %v7290_v1 = vld [vmem:[#allocation11 + $0x6f0] ss:$24 sps:$4 sm:$0xff]  }
 0x683   :  { %2626 = vst [vmem:[%s8347_s14] sm:$0xff] %v2621_v6  ;;  %v7298_v6 = vld [vmem:[#allocation11 + $0x724] ss:$24 sps:$4 sm:$0xff]  }
 0x684   :  { %v7507_v11 = vpop.eup %7506 }
 0x685   :  { %v2623_v12 = vmul.f32 %v7507_v11, %v8207_v51  ;;  %v3362_v13 = vpop.f32.mrb[24].mxu1  ;;  %5219 = vmatpush1.bf16.msra.mxu0 %v7242_v7  ;;  %5348 = vmatpush1.bf16.msra.mxu1 %v7245_v8  ;;  %v7301_v7 = vld [vmem:[#allocation11 + $0x72c] ss:$24 sps:$4 sm:$0xff]   ;;  %v7296_v8 = vld [vmem:[#allocation11 + $0x720] ss:$24 sps:$4 sm:$0xff]  }
 0x686   :  { %v3363_v34 = vadd.f32 %v3362_v13, %v2751_v9  ;;  %v3364_v17 = vpop.f32.mrb[25].mxu1  ;;  %5220 = vmatprep.subr.bf16.mxu0 %v7250_v10  ;;  %5349 = vmatprep.subr.bf16.mxu1 %v7253_v49  ;;  %v7304_v10 = vld [vmem:[#allocation11 + $0x754] ss:$24 sps:$4 sm:$0xff]   ;;  %v7305_v11 = vld [vmem:[#allocation11 + $0x758] ss:$24 sps:$4 sm:$0xff]  }
 0x687   :  { %2627 = vst [vmem:[%s8347_s14 + $0x8] sm:$0xff] %v2623_v12  ;;  %v3365_v4 = vadd.f32 %v3364_v17, %v2755_v16  ;;  %v3366_v24 = vpop.f32.mrb[26].mxu1  ;;  %v7307_v49 = vld [vmem:[#allocation11 + $0x75c] ss:$24 sps:$4 sm:$0xff]   ;;  %v7313_v13 = vld [vmem:[#allocation11 + $0x78c] ss:$24 sps:$4 sm:$0xff]  }
 0x688   :  { %v3367_v20 = vadd.f32 %v3366_v24, %v2751_v9  ;;  %v3368_v21 = vpop.f32.mrb[27].mxu1  ;;  %v3375_v26 = vmax.f32 %v3363_v34, 0.0  ;;  %v7299_v9 = vld [vmem:[#allocation11 + $0x728] ss:$24 sps:$4 sm:$0xff]   ;;  %v7310_v12 = vld [vmem:[#allocation11 + $0x784] ss:$24 sps:$4 sm:$0xff]  }
 0x689   :  { %v3369_v51 = vadd.f32 %v3368_v21, %v2755_v16  ;;  %5221 = vmatpush1.bf16.msra.mxu0 %v7248_v14  ;;  %5350 = vmatpush1.bf16.msra.mxu1 %v7251_v15  ;;  %v3376_v30 = vmax.f32 %v3365_v4, 0.0  ;;  %v7302_v16 = vld [vmem:[#allocation11 + $0x750] ss:$24 sps:$4 sm:$0xff]   ;;  %v7308_v14 = vld [vmem:[#allocation11 + $0x780] ss:$24 sps:$4 sm:$0xff]  }
 0x68a   :  { %v3381_v27 = vmax.f32 %v3367_v20, 0.0  ;;  %5222 = vmatprep.subr.bf16.mxu0 %v7256_v18  ;;  %5351 = vmatprep.subr.bf16.mxu1 %v7259_v19  ;;  %v7311_v15 = vld [vmem:[#allocation11 + $0x788] ss:$24 sps:$4 sm:$0xff]   ;;  %v7316_v34 = vld [vmem:[#allocation11 + $0x7b4] ss:$24 sps:$4 sm:$0xff]  }
 0x68b   :  { %v3382_v31 = vmax.f32 %v3369_v51, 0.0  ;;  %v7319_v17 = vld [vmem:[#allocation11 + $0x7bc] ss:$24 sps:$4 sm:$0xff]   ;;  %v7314_v18 = vld [vmem:[#allocation11 + $0x7b0] ss:$24 sps:$4 sm:$0xff]  }
 0x68c   :  { %v8250_v32 = vpack.c.bf16 %v3381_v27, %v3375_v26  ;;  %v7317_v19 = vld [vmem:[#allocation11 + $0x7b8] ss:$24 sps:$4 sm:$0xff]   ;;  %v7322_v4 = vld [vmem:[#allocation11 + $0x7e4] ss:$24 sps:$4 sm:$0xff]   ;;  %v7323_v21 = vld [vmem:[#allocation11 + $0x7e8] ss:$24 sps:$4 sm:$0xff]  }
 0x68d   :  { %v8252_v33 = vpack.c.bf16 %v3382_v31, %v3376_v30  ;;  %5223 = vmatpush1.bf16.msra.mxu0 %v7254_v22  ;;  %5352 = vmatpush1.bf16.msra.mxu1 %v7257_v25  ;;  %v7325_v24 = vld [vmem:[#allocation11 + $0x7ec] ss:$24 sps:$4 sm:$0xff]   ;;  %v7320_v20 = vld [vmem:[#allocation11 + $0x7e0] ss:$24 sps:$4 sm:$0xff]   ;;  %v7331_v22 = vld [vmem:[#allocation11 + $0x81c] ss:$24 sps:$4 sm:$0xff]  }
 0x68e   :  { %5235 = vmatprep.subr.bf16.mxu0 %v7262_v28  ;;  %5364 = vmatprep.subr.bf16.mxu1 %v7265_v29  ;;  %v7328_v51 = vld [vmem:[#allocation11 + $0x814] ss:$24 sps:$4 sm:$0xff]   ;;  %v7326_v25 = vld [vmem:[#allocation11 + $0x810] ss:$24 sps:$4 sm:$0xff]   ;;  %v7334_v27 = vld [vmem:[#allocation11 + $0x844] ss:$24 sps:$4 sm:$0xff]  }
 0x68f   :  { %v7329_v26 = vld [vmem:[#allocation11 + $0x818] ss:$24 sps:$4 sm:$0xff]   ;;  %v7337_v28 = vld [vmem:[#allocation11 + $0x84c] ss:$24 sps:$4 sm:$0xff]   ;;  %v7335_v30 = vld [vmem:[#allocation11 + $0x848] ss:$24 sps:$4 sm:$0xff]  }
 0x690   :  { %5225 = vmatmul.mubr.bf16.vlgmr.msra.gmra.mrb[12].mxu0 %v8222_v61  ;;  %5354 = vmatmul.mubr.bf16.vlgmr.msra.gmra.mrb[28].mxu1 %v8222_v61  ;;  %v7332_v29 = vld [vmem:[#allocation11 + $0x840] ss:$24 sps:$4 sm:$0xff]   ;;  %v7340_v31 = vld [vmem:[#allocation11 + $0x874] ss:$24 sps:$4 sm:$0xff]  }
 0x691   :  { %5236 = vmatpush1.bf16.msra.mxu0 %v7260_v35  ;;  %5267 = vmatprep.mubr.bf16.mxu0 %v8252_v33  ;;  %v7343_v35 = vld [vmem:[#allocation11 + $0x87c] ss:$24 sps:$4 sm:$0xff]  }
 0x692   :  { %5365 = vmatpush1.bf16.msra.mxu1 %v7263_v36  ;;  %5396 = vmatprep.mubr.bf16.mxu1 %v8252_v33  ;;  %v7338_v36 = vld [vmem:[#allocation11 + $0x870] ss:$24 sps:$4 sm:$0xff]  }
 0x693   :  { %5237 = vmatprep.subr.bf16.mxu0 %v7268_v37  ;;  %5366 = vmatprep.subr.bf16.mxu1 %v7271_v38  ;;  %v7341_v37 = vld [vmem:[#allocation11 + $0x878] ss:$24 sps:$4 sm:$0xff]   ;;  %v7346_v38 = vld [vmem:[#allocation11 + $0x8a4] ss:$24 sps:$4 sm:$0xff]  }
 0x695   :  { %5238 = vmatpush1.bf16.msra.mxu0 %v7266_v39  ;;  %v7349_v39 = vld [vmem:[#allocation11 + $0x8ac] ss:$24 sps:$4 sm:$0xff]  }
 0x696   :  { %5367 = vmatpush1.bf16.msra.mxu1 %v7269_v40  ;;  %5239 = vmatprep.subr.bf16.mxu0 %v7274_v41  ;;  %v7344_v40 = vld [vmem:[#allocation11 + $0x8a0] ss:$24 sps:$4 sm:$0xff]  }
 0x697   :  { %5368 = vmatprep.subr.bf16.mxu1 %v7277_v42  ;;  %v7347_v41 = vld [vmem:[#allocation11 + $0x8a8] ss:$24 sps:$4 sm:$0xff]   ;;  %v7352_v42 = vld [vmem:[#allocation11 + $0x8d4] ss:$24 sps:$4 sm:$0xff]  }
 0x699   :  { %5240 = vmatpush1.bf16.msra.mxu0 %v7272_v43  ;;  %v7355_v43 = vld [vmem:[#allocation11 + $0x8dc] ss:$24 sps:$4 sm:$0xff]  }
 0x69a   :  { %5369 = vmatpush1.bf16.msra.mxu1 %v7275_v44  ;;  %5241 = vmatprep.subr.bf16.mxu0 %v7280_v45  ;;  %v7350_v44 = vld [vmem:[#allocation11 + $0x8d0] ss:$24 sps:$4 sm:$0xff]  }
 0x69b   :  { %5370 = vmatprep.subr.bf16.mxu1 %v7283_v46  ;;  %v7353_v45 = vld [vmem:[#allocation11 + $0x8d8] ss:$24 sps:$4 sm:$0xff]   ;;  %v7358_v46 = vld [vmem:[#allocation11 + $0x14] ss:$24 sps:$4 sm:$0xff]  }
 0x69d   :  { %5242 = vmatpush1.bf16.msra.mxu0 %v7278_v52  ;;  %v7356_v52 = vld [vmem:[#allocation11 + $0x10] ss:$24 sps:$4 sm:$0xff]  }
 0x69e   :  { %5371 = vmatpush1.bf16.msra.mxu1 %v7281_v53  ;;  %5243 = vmatprep.subr.bf16.mxu0 %v7286_v56  ;;  %v7361_v53 = vld [vmem:[#allocation11 + $0x44] ss:$24 sps:$4 sm:$0xff]   ;;  %v7359_v56 = vld [vmem:[#allocation11 + $0x40] ss:$24 sps:$4 sm:$0xff]  }
 0x69f   :  { %5372 = vmatprep.subr.bf16.mxu1 %v7289_v23  ;;  %v7364_v23 = vld [vmem:[#allocation11 + $0x74] ss:$24 sps:$4 sm:$0xff]  }
 0x6a1   :  { %5244 = vmatpush1.bf16.msra.mxu0 %v7284_v57  ;;  %v7362_v57 = vld [vmem:[#allocation11 + $0x70] ss:$24 sps:$4 sm:$0xff]  }
 0x6a2   :  { %5373 = vmatpush1.bf16.msra.mxu1 %v7287_v58  ;;  %5245 = vmatprep.subr.bf16.mxu0 %v7292_v59  ;;  %v7367_v58 = vld [vmem:[#allocation11 + $0xa4] ss:$24 sps:$4 sm:$0xff]   ;;  %v7365_v59 = vld [vmem:[#allocation11 + $0xa0] ss:$24 sps:$4 sm:$0xff]  }
 0x6a3   :  { %5374 = vmatprep.subr.bf16.mxu1 %v7295_v0  ;;  %v7370_v0 = vld [vmem:[#allocation11 + $0xd4] ss:$24 sps:$4 sm:$0xff]  }
 0x6a5   :  { %5246 = vmatpush1.bf16.msra.mxu0 %v7290_v1  ;;  %v7368_v1 = vld [vmem:[#allocation11 + $0xd0] ss:$24 sps:$4 sm:$0xff]  }
 0x6a6   :  { %5375 = vmatpush1.bf16.msra.mxu1 %v7293_v5  ;;  %5247 = vmatprep.subr.bf16.mxu0 %v7298_v6  ;;  %v7373_v5 = vld [vmem:[#allocation11 + $0x104] ss:$24 sps:$4 sm:$0xff]   ;;  %v7371_v6 = vld [vmem:[#allocation11 + $0x100] ss:$24 sps:$4 sm:$0xff]  }
 0x6a7   :  { %5376 = vmatprep.subr.bf16.mxu1 %v7301_v7  ;;  %v7376_v7 = vld [vmem:[#allocation11 + $0x134] ss:$24 sps:$4 sm:$0xff]  }
 0x6a9   :  { %5248 = vmatpush1.bf16.msra.mxu0 %v7296_v8  ;;  %v7379_v8 = vld [vmem:[#allocation11 + $0x164] ss:$24 sps:$4 sm:$0xff]  }
 0x6aa   :  { %5377 = vmatpush1.bf16.msra.mxu1 %v7299_v9  ;;  %5249 = vmatprep.subr.bf16.mxu0 %v7304_v10  ;;  %v7377_v9 = vld [vmem:[#allocation11 + $0x160] ss:$24 sps:$4 sm:$0xff]   ;;  %v7382_v10 = vld [vmem:[#allocation11 + $0x194] ss:$24 sps:$4 sm:$0xff]  }
 0x6ab   :  { %5378 = vmatprep.subr.bf16.mxu1 %v7307_v49  ;;  %v7380_v49 = vld [vmem:[#allocation11 + $0x190] ss:$24 sps:$4 sm:$0xff]  }
 0x6ad   :  { %5250 = vmatpush1.bf16.msra.mxu0 %v7302_v16  ;;  %v7385_v16 = vld [vmem:[#allocation11 + $0x1c4] ss:$24 sps:$4 sm:$0xff]  }
 0x6ae   :  { %5379 = vmatpush1.bf16.msra.mxu1 %v7305_v11  ;;  %5251 = vmatprep.subr.bf16.mxu0 %v7310_v12  ;;  %v7383_v11 = vld [vmem:[#allocation11 + $0x1c0] ss:$24 sps:$4 sm:$0xff]   ;;  %v7388_v12 = vld [vmem:[#allocation11 + $0x1f4] ss:$24 sps:$4 sm:$0xff]  }
 0x6af   :  { %5380 = vmatprep.subr.bf16.mxu1 %v7313_v13  ;;  %v7386_v13 = vld [vmem:[#allocation11 + $0x1f0] ss:$24 sps:$4 sm:$0xff]  }
 0x6b1   :  { %5252 = vmatpush1.bf16.msra.mxu0 %v7308_v14  ;;  %v7391_v14 = vld [vmem:[#allocation11 + $0x224] ss:$24 sps:$4 sm:$0xff]  }
 0x6b2   :  { %5381 = vmatpush1.bf16.msra.mxu1 %v7311_v15  ;;  %5253 = vmatprep.subr.bf16.mxu0 %v7316_v34  ;;  %v7389_v15 = vld [vmem:[#allocation11 + $0x220] ss:$24 sps:$4 sm:$0xff]   ;;  %v7394_v34 = vld [vmem:[#allocation11 + $0x254] ss:$24 sps:$4 sm:$0xff]  }
 0x6b3   :  { %5382 = vmatprep.subr.bf16.mxu1 %v7319_v17  ;;  %v7392_v17 = vld [vmem:[#allocation11 + $0x250] ss:$24 sps:$4 sm:$0xff]  }
 0x6b5   :  { %5254 = vmatpush1.bf16.msra.mxu0 %v7314_v18  ;;  %v7397_v18 = vld [vmem:[#allocation11 + $0x284] ss:$24 sps:$4 sm:$0xff]  }
 0x6b6   :  { %5383 = vmatpush1.bf16.msra.mxu1 %v7317_v19  ;;  %5255 = vmatprep.subr.bf16.mxu0 %v7322_v4  ;;  %v7395_v19 = vld [vmem:[#allocation11 + $0x280] ss:$24 sps:$4 sm:$0xff]   ;;  %v7400_v4 = vld [vmem:[#allocation11 + $0x2b4] ss:$24 sps:$4 sm:$0xff]  }
 0x6b7   :  { %5384 = vmatprep.subr.bf16.mxu1 %v7325_v24  ;;  %v7398_v24 = vld [vmem:[#allocation11 + $0x2b0] ss:$24 sps:$4 sm:$0xff]  }
 0x6b9   :  { %5256 = vmatpush1.bf16.msra.mxu0 %v7320_v20  ;;  %v7403_v20 = vld [vmem:[#allocation11 + $0x2e4] ss:$24 sps:$4 sm:$0xff]  }
 0x6ba   :  { %5385 = vmatpush1.bf16.msra.mxu1 %v7323_v21  ;;  %5257 = vmatprep.subr.bf16.mxu0 %v7328_v51  ;;  %v7401_v21 = vld [vmem:[#allocation11 + $0x2e0] ss:$24 sps:$4 sm:$0xff]   ;;  %v7406_v51 = vld [vmem:[#allocation11 + $0x314] ss:$24 sps:$4 sm:$0xff]  }
 0x6bb   :  { %5386 = vmatprep.subr.bf16.mxu1 %v7331_v22  ;;  %v7404_v22 = vld [vmem:[#allocation11 + $0x310] ss:$24 sps:$4 sm:$0xff]  }
 0x6bd   :  { %5258 = vmatpush1.bf16.msra.mxu0 %v7326_v25  ;;  %v7409_v25 = vld [vmem:[#allocation11 + $0x344] ss:$24 sps:$4 sm:$0xff]  }
 0x6be   :  { %5387 = vmatpush1.bf16.msra.mxu1 %v7329_v26  ;;  %5259 = vmatprep.subr.bf16.mxu0 %v7334_v27  ;;  %v7407_v26 = vld [vmem:[#allocation11 + $0x340] ss:$24 sps:$4 sm:$0xff]   ;;  %v7412_v27 = vld [vmem:[#allocation11 + $0x374] ss:$24 sps:$4 sm:$0xff]  }
 0x6bf   :  { %5388 = vmatprep.subr.bf16.mxu1 %v7337_v28  ;;  %v7410_v28 = vld [vmem:[#allocation11 + $0x370] ss:$24 sps:$4 sm:$0xff]  }
 0x6c1   :  { %5260 = vmatpush1.bf16.msra.mxu0 %v7332_v29  ;;  %v7415_v29 = vld [vmem:[#allocation11 + $0x3a4] ss:$24 sps:$4 sm:$0xff]  }
 0x6c2   :  { %5389 = vmatpush1.bf16.msra.mxu1 %v7335_v30  ;;  %5261 = vmatprep.subr.bf16.mxu0 %v7340_v31  ;;  %v7413_v30 = vld [vmem:[#allocation11 + $0x3a0] ss:$24 sps:$4 sm:$0xff]   ;;  %v7418_v31 = vld [vmem:[#allocation11 + $0x3d4] ss:$24 sps:$4 sm:$0xff]  }
 0x6c3   :  { %5390 = vmatprep.subr.bf16.mxu1 %v7343_v35  ;;  %v7416_v35 = vld [vmem:[#allocation11 + $0x3d0] ss:$24 sps:$4 sm:$0xff]  }
 0x6c5   :  { %5262 = vmatpush1.bf16.msra.mxu0 %v7338_v36  ;;  %v7421_v36 = vld [vmem:[#allocation11 + $0x404] ss:$24 sps:$4 sm:$0xff]  }
 0x6c6   :  { %5391 = vmatpush1.bf16.msra.mxu1 %v7341_v37  ;;  %5263 = vmatprep.subr.bf16.mxu0 %v7346_v38  ;;  %v7424_v37 = vld [vmem:[#allocation11 + $0x434] ss:$24 sps:$4 sm:$0xff]   ;;  %v7427_v38 = vld [vmem:[#allocation11 + $0x464] ss:$24 sps:$4 sm:$0xff]  }
 0x6c7   :  { %5392 = vmatprep.subr.bf16.mxu1 %v7349_v39  ;;  %v7425_v39 = vld [vmem:[#allocation11 + $0x460] ss:$24 sps:$4 sm:$0xff]  }
 0x6c9   :  { %5264 = vmatpush1.bf16.msra.mxu0 %v7344_v40  ;;  %v7430_v40 = vld [vmem:[#allocation11 + $0x494] ss:$24 sps:$4 sm:$0xff]  }
 0x6ca   :  { %5393 = vmatpush1.bf16.msra.mxu1 %v7347_v41  ;;  %5265 = vmatprep.subr.bf16.mxu0 %v7352_v42  ;;  %v7428_v41 = vld [vmem:[#allocation11 + $0x490] ss:$24 sps:$4 sm:$0xff]   ;;  %v7433_v42 = vld [vmem:[#allocation11 + $0x4c4] ss:$24 sps:$4 sm:$0xff]  }
 0x6cb   :  { %5394 = vmatprep.subr.bf16.mxu1 %v7355_v43  ;;  %v7431_v43 = vld [vmem:[#allocation11 + $0x4c0] ss:$24 sps:$4 sm:$0xff]  }
 0x6cd   :  { %5266 = vmatpush1.bf16.msra.mxu0 %v7350_v44  ;;  %v7436_v44 = vld [vmem:[#allocation11 + $0x4f4] ss:$24 sps:$4 sm:$0xff]  }
 0x6ce   :  { %5395 = vmatpush1.bf16.msra.mxu1 %v7353_v45  ;;  %5407 = vmatprep.subr.bf16.mxu0 %v7358_v46  ;;  %v7434_v45 = vld [vmem:[#allocation11 + $0x4f0] ss:$24 sps:$4 sm:$0xff]   ;;  %v7439_v46 = vld [vmem:[#allocation11 + $0x524] ss:$24 sps:$4 sm:$0xff]  }
 0x6d0   :  { %5268 = vmatmul.mubr.bf16.vlgmr.msra.gmra.mrb[12].mxu0 %v8250_v32 }
 0x6d1   :  { %5397 = vmatmul.mubr.bf16.vlgmr.msra.gmra.mrb[28].mxu1 %v8250_v32  ;;  %5408 = vmatpush1.bf16.msra.mxu0 %v7356_v52  ;;  %v7437_v52 = vld [vmem:[#allocation11 + $0x520] ss:$24 sps:$4 sm:$0xff]  }
 0x6d2   :  { %5439 = vmatprep.mubr.bf16.mxu0 %v8224_v62  ;;  %5409 = vmatprep.subr.bf16.mxu0 %v7361_v53  ;;  %v7374_v62 = vld [vmem:[#allocation11 + $0x130] ss:$24 sps:$4 sm:$0xff]   ;;  %v7442_v53 = vld [vmem:[#allocation11 + $0x554] ss:$24 sps:$4 sm:$0xff]  }
 0x6d5   :  { %5410 = vmatpush1.bf16.msra.mxu0 %v7359_v56  ;;  %v7440_v56 = vld [vmem:[#allocation11 + $0x550] ss:$24 sps:$4 sm:$0xff]  }
 0x6d6   :  { %5411 = vmatprep.subr.bf16.mxu0 %v7364_v23  ;;  %v7445_v23 = vld [vmem:[#allocation11 + $0x584] ss:$24 sps:$4 sm:$0xff]  }
 0x6d9   :  { %5412 = vmatpush1.bf16.msra.mxu0 %v7362_v57  ;;  %v7443_v57 = vld [vmem:[#allocation11 + $0x580] ss:$24 sps:$4 sm:$0xff]  }
 0x6da   :  { %5413 = vmatprep.subr.bf16.mxu0 %v7367_v58  ;;  %v7448_v58 = vld [vmem:[#allocation11 + $0x5b4] ss:$24 sps:$4 sm:$0xff]  }
 0x6dd   :  { %5414 = vmatpush1.bf16.msra.mxu0 %v7365_v59  ;;  %v7446_v59 = vld [vmem:[#allocation11 + $0x5b0] ss:$24 sps:$4 sm:$0xff]  }
 0x6de   :  { %5415 = vmatprep.subr.bf16.mxu0 %v7370_v0  ;;  %v7451_v0 = vld [vmem:[#allocation11 + $0x5e4] ss:$24 sps:$4 sm:$0xff]  }
 0x6e1   :  { %5416 = vmatpush1.bf16.msra.mxu0 %v7368_v1  ;;  %v7449_v1 = vld [vmem:[#allocation11 + $0x5e0] ss:$24 sps:$4 sm:$0xff]  }
 0x6e2   :  { %5417 = vmatprep.subr.bf16.mxu0 %v7373_v5  ;;  %v7454_v5 = vld [vmem:[#allocation11 + $0x614] ss:$24 sps:$4 sm:$0xff]  }
 0x6e5   :  { %5418 = vmatpush1.bf16.msra.mxu0 %v7371_v6  ;;  %v7452_v6 = vld [vmem:[#allocation11 + $0x610] ss:$24 sps:$4 sm:$0xff]  }
 0x6e6   :  { %5419 = vmatprep.subr.bf16.mxu0 %v7376_v7  ;;  %v7457_v7 = vld [vmem:[#allocation11 + $0x644] ss:$24 sps:$4 sm:$0xff]  }
 0x6e9   :  { %5420 = vmatpush1.bf16.msra.mxu0 %v7374_v62  ;;  %v7455_v62 = vld [vmem:[#allocation11 + $0x640] ss:$24 sps:$4 sm:$0xff]  }
 0x6ea   :  { %5421 = vmatprep.subr.bf16.mxu0 %v7379_v8  ;;  %v7460_v8 = vld [vmem:[#allocation11 + $0x674] ss:$24 sps:$4 sm:$0xff]  }
 0x6ed   :  { %5422 = vmatpush1.bf16.msra.mxu0 %v7377_v9  ;;  %v7458_v9 = vld [vmem:[#allocation11 + $0x670] ss:$24 sps:$4 sm:$0xff]  }
 0x6ee   :  { %5423 = vmatprep.subr.bf16.mxu0 %v7382_v10  ;;  %v7463_v10 = vld [vmem:[#allocation11 + $0x6a4] ss:$24 sps:$4 sm:$0xff]  }
 0x6f1   :  { %5424 = vmatpush1.bf16.msra.mxu0 %v7380_v49  ;;  %v7461_v49 = vld [vmem:[#allocation11 + $0x6a0] ss:$24 sps:$4 sm:$0xff]  }
 0x6f2   :  { %5425 = vmatprep.subr.bf16.mxu0 %v7385_v16  ;;  %v7466_v16 = vld [vmem:[#allocation11 + $0x6d4] ss:$24 sps:$4 sm:$0xff]  }
 0x6f5   :  { %5426 = vmatpush1.bf16.msra.mxu0 %v7383_v11  ;;  %v7464_v11 = vld [vmem:[#allocation11 + $0x6d0] ss:$24 sps:$4 sm:$0xff]  }
 0x6f6   :  { %5427 = vmatprep.subr.bf16.mxu0 %v7388_v12  ;;  %v7469_v12 = vld [vmem:[#allocation11 + $0x704] ss:$24 sps:$4 sm:$0xff]  }
 0x6f9   :  { %5428 = vmatpush1.bf16.msra.mxu0 %v7386_v13  ;;  %v7472_v13 = vld [vmem:[#allocation11 + $0x734] ss:$24 sps:$4 sm:$0xff]  }
 0x6fa   :  { %5429 = vmatprep.subr.bf16.mxu0 %v7391_v14  ;;  %v7475_v14 = vld [vmem:[#allocation11 + $0x764] ss:$24 sps:$4 sm:$0xff]  }
 0x6fd   :  { %5430 = vmatpush1.bf16.msra.mxu0 %v7389_v15  ;;  %v7473_v15 = vld [vmem:[#allocation11 + $0x760] ss:$24 sps:$4 sm:$0xff]  }
 0x6fe   :  { %5431 = vmatprep.subr.bf16.mxu0 %v7394_v34  ;;  %v7478_v34 = vld [vmem:[#allocation11 + $0x794] ss:$24 sps:$4 sm:$0xff]  }
 0x701   :  { %5432 = vmatpush1.bf16.msra.mxu0 %v7392_v17  ;;  %v7476_v17 = vld [vmem:[#allocation11 + $0x790] ss:$24 sps:$4 sm:$0xff]  }
 0x702   :  { %5433 = vmatprep.subr.bf16.mxu0 %v7397_v18  ;;  %v7481_v18 = vld [vmem:[#allocation11 + $0x7c4] ss:$24 sps:$4 sm:$0xff]  }
 0x705   :  { %5434 = vmatpush1.bf16.msra.mxu0 %v7395_v19  ;;  %v7479_v19 = vld [vmem:[#allocation11 + $0x7c0] ss:$24 sps:$4 sm:$0xff]  }
 0x706   :  { %5435 = vmatprep.subr.bf16.mxu0 %v7400_v4  ;;  %v7484_v4 = vld [vmem:[#allocation11 + $0x7f4] ss:$24 sps:$4 sm:$0xff]  }
 0x709   :  { %5436 = vmatpush1.bf16.msra.mxu0 %v7398_v24  ;;  %v7482_v24 = vld [vmem:[#allocation11 + $0x7f0] ss:$24 sps:$4 sm:$0xff]  }
 0x70a   :  { %5437 = vmatprep.subr.bf16.mxu0 %v7403_v20  ;;  %v7487_v20 = vld [vmem:[#allocation11 + $0x824] ss:$24 sps:$4 sm:$0xff]  }
 0x70d   :  { %5438 = vmatpush1.bf16.msra.mxu0 %v7401_v21  ;;  %v7485_v21 = vld [vmem:[#allocation11 + $0x820] ss:$24 sps:$4 sm:$0xff]  }
 0x70e   :  { %5450 = vmatprep.subr.bf16.mxu0 %v7406_v51  ;;  %v7490_v51 = vld [vmem:[#allocation11 + $0x854] ss:$24 sps:$4 sm:$0xff]  }
 0x710   :  { %5440 = vmatmul.mubr.bf16.vlgmr.msra.gmra.mrb[16].mxu0 %v8220_v60  ;;  %v7419_v60 = vld [vmem:[#allocation11 + $0x400] ss:$24 sps:$4 sm:$0xff]  }
 0x711   :  { %5451 = vmatpush1.bf16.msra.mxu0 %v7404_v22  ;;  %5482 = vmatprep.mubr.bf16.mxu0 %v8226_v63  ;;  %v7422_v63 = vld [vmem:[#allocation11 + $0x430] ss:$24 sps:$4 sm:$0xff]  }
 0x712   :  { %5452 = vmatprep.subr.bf16.mxu0 %v7409_v25  ;;  %v7488_v22 = vld [vmem:[#allocation11 + $0x850] ss:$24 sps:$4 sm:$0xff]   ;;  %v7493_v25 = vld [vmem:[#allocation11 + $0x884] ss:$24 sps:$4 sm:$0xff]  }
 0x715   :  { %5453 = vmatpush1.bf16.msra.mxu0 %v7407_v26  ;;  %v7491_v26 = vld [vmem:[#allocation11 + $0x880] ss:$24 sps:$4 sm:$0xff]  }
 0x716   :  { %5454 = vmatprep.subr.bf16.mxu0 %v7412_v27  ;;  %v7496_v27 = vld [vmem:[#allocation11 + $0x8b4] ss:$24 sps:$4 sm:$0xff]  }
 0x719   :  { %5455 = vmatpush1.bf16.msra.mxu0 %v7410_v28  ;;  %v7494_v28 = vld [vmem:[#allocation11 + $0x8b0] ss:$24 sps:$4 sm:$0xff]  }
 0x71a   :  { %5456 = vmatprep.subr.bf16.mxu0 %v7415_v29  ;;  %v7499_v29 = vld [vmem:[#allocation11 + $0x8e4] ss:$24 sps:$4 sm:$0xff]  }
 0x71d   :  { %5457 = vmatpush1.bf16.msra.mxu0 %v7413_v30  ;;  %v7497_v30 = vld [vmem:[#allocation11 + $0x8e0] ss:$24 sps:$4 sm:$0xff]  }
 0x71e   :  { %5458 = vmatprep.subr.bf16.mxu0 %v7418_v31  ;;  %v8266_v31 = vld [vmem:[#allocation20] sm:$0x3f] }
 0x721   :  { %5459 = vmatpush1.bf16.msra.mxu0 %v7416_v35  ;;  %v3682_v35 = vrot.slane %v8266_v31, %v8165_v48 }
 0x722   :  { %5460 = vmatprep.subr.bf16.mxu0 %v7421_v36  ;;  %v3690_v36 = vrot.slane %v8266_v31, %v8177_v54 }
 0x725   :  { %5461 = vmatpush1.bf16.msra.mxu0 %v7419_v60  ;;  %v3686_v60 = vrot.slane %v8266_v31, %v8170_v50 }
 0x726   :  { %5462 = vmatprep.subr.bf16.mxu0 %v7424_v37  ;;  %v3694_v37 = vrot.slane %v8266_v31, %v8180_v55 }
 0x729   :  { %5463 = vmatpush1.bf16.msra.mxu0 %v7422_v63 }
 0x72a   :  { %5464 = vmatprep.subr.bf16.mxu0 %v7427_v38 }
 0x72d   :  { %5465 = vmatpush1.bf16.msra.mxu0 %v7425_v39 }
 0x72e   :  { %5466 = vmatprep.subr.bf16.mxu0 %v7430_v40 }
 0x731   :  { %5467 = vmatpush1.bf16.msra.mxu0 %v7428_v41 }
 0x732   :  { %5468 = vmatprep.subr.bf16.mxu0 %v7433_v42 }
 0x735   :  { %5469 = vmatpush1.bf16.msra.mxu0 %v7431_v43 }
 0x736   :  { %5470 = vmatprep.subr.bf16.mxu0 %v7436_v44 }
 0x739   :  { %5471 = vmatpush1.bf16.msra.mxu0 %v7434_v45 }
 0x73a   :  { %5472 = vmatprep.subr.bf16.mxu0 %v7439_v46 }
 0x73d   :  { %5473 = vmatpush1.bf16.msra.mxu0 %v7437_v52 }
 0x73e   :  { %5474 = vmatprep.subr.bf16.mxu0 %v7442_v53 }
 0x741   :  { %5475 = vmatpush1.bf16.msra.mxu0 %v7440_v56 }
 0x742   :  { %5476 = vmatprep.subr.bf16.mxu0 %v7445_v23 }
 0x745   :  { %5477 = vmatpush1.bf16.msra.mxu0 %v7443_v57 }
 0x746   :  { %5478 = vmatprep.subr.bf16.mxu0 %v7448_v58 }
 0x749   :  { %5479 = vmatpush1.bf16.msra.mxu0 %v7446_v59 }
 0x74a   :  { %5480 = vmatprep.subr.bf16.mxu0 %v7451_v0 }
 0x74d   :  { %5481 = vmatpush1.bf16.msra.mxu0 %v7449_v1 }
 0x74e   :  { %5493 = vmatprep.subr.bf16.mxu0 %v7454_v5 }
 0x750   :  { %5483 = vmatmul.mubr.bf16.vlgmr.msra.gmra.mrb[16].mxu0 %v8222_v61  ;;  %v7467_v61 = vld [vmem:[#allocation11 + $0x700] ss:$24 sps:$4 sm:$0xff]  }
 0x751   :  { %5494 = vmatpush1.bf16.msra.mxu0 %v7452_v6  ;;  %5525 = vmatprep.mubr.bf16.mxu0 %v8252_v33  ;;  %v7470_v33 = vld [vmem:[#allocation11 + $0x730] ss:$24 sps:$4 sm:$0xff]  }
 0x752   :  { %5495 = vmatprep.subr.bf16.mxu0 %v7457_v7 }
 0x755   :  { %5496 = vmatpush1.bf16.msra.mxu0 %v7455_v62 }
 0x756   :  { %5497 = vmatprep.subr.bf16.mxu0 %v7460_v8 }
 0x759   :  { %5498 = vmatpush1.bf16.msra.mxu0 %v7458_v9 }
 0x75a   :  { %5499 = vmatprep.subr.bf16.mxu0 %v7463_v10 }
 0x75d   :  { %5500 = vmatpush1.bf16.msra.mxu0 %v7461_v49 }
 0x75e   :  { %5501 = vmatprep.subr.bf16.mxu0 %v7466_v16 }
 0x761   :  { %5502 = vmatpush1.bf16.msra.mxu0 %v7464_v11 }
 0x762   :  { %5503 = vmatprep.subr.bf16.mxu0 %v7469_v12 }
 0x765   :  { %5504 = vmatpush1.bf16.msra.mxu0 %v7467_v61 }
 0x766   :  { %5505 = vmatprep.subr.bf16.mxu0 %v7472_v13 }
 0x769   :  { %5506 = vmatpush1.bf16.msra.mxu0 %v7470_v33 }
 0x76a   :  { %5507 = vmatprep.subr.bf16.mxu0 %v7475_v14 }
 0x76d   :  { %5508 = vmatpush1.bf16.msra.mxu0 %v7473_v15 }
 0x76e   :  { %5509 = vmatprep.subr.bf16.mxu0 %v7478_v34 }
 0x771   :  { %5510 = vmatpush1.bf16.msra.mxu0 %v7476_v17 }
 0x772   :  { %5511 = vmatprep.subr.bf16.mxu0 %v7481_v18 }
 0x775   :  { %5512 = vmatpush1.bf16.msra.mxu0 %v7479_v19 }
 0x776   :  { %5513 = vmatprep.subr.bf16.mxu0 %v7484_v4 }
 0x779   :  { %5514 = vmatpush1.bf16.msra.mxu0 %v7482_v24 }
 0x77a   :  { %5515 = vmatprep.subr.bf16.mxu0 %v7487_v20 }
 0x77d   :  { %5516 = vmatpush1.bf16.msra.mxu0 %v7485_v21 }
 0x77e   :  { %5517 = vmatprep.subr.bf16.mxu0 %v7490_v51 }
 0x781   :  { %5518 = vmatpush1.bf16.msra.mxu0 %v7488_v22 }
 0x782   :  { %5519 = vmatprep.subr.bf16.mxu0 %v7493_v25 }
 0x785   :  { %5520 = vmatpush1.bf16.msra.mxu0 %v7491_v26 }
 0x786   :  { %5521 = vmatprep.subr.bf16.mxu0 %v7496_v27 }
 0x789   :  { %5522 = vmatpush1.bf16.msra.mxu0 %v7494_v28 }
 0x78a   :  { %5523 = vmatprep.subr.bf16.mxu0 %v7499_v29 }
 0x78d   :  { %5524 = vmatpush1.bf16.msra.mxu0 %v7497_v30 }
 0x790   :  { %5526 = vmatmul.mubr.bf16.vlgmr.msra.gmra.mrb[16].mxu0 %v8250_v32 }
 0x7a3   :  { %v5269_v63 = vpop.f32.mrb[12].mxu0 }
 0x7a4   :  { %v6405_v38 = vadd.f32 %v5269_v63, %v3682_v35  ;;  %v5398_v39 = vpop.f32.mrb[28].mxu1  ;;  %v5271_v40 = vpop.f32.mrb[13].mxu0 }
 0x7a5   :  { %v6409_v41 = vadd.f32 %v5398_v39, %v3690_v36  ;;  %v6406_v32 = vadd.f32 %v5271_v40, %v3686_v60  ;;  %v5400_v42 = vpop.f32.mrb[29].mxu1  ;;  %v5273_v43 = vpop.f32.mrb[14].mxu0 }
 0x7a6   :  { %v5536_v44 = vsub.f32 0.0, %v6405_v38  ;;  %v6410_v45 = vadd.f32 %v5400_v42, %v3694_v37  ;;  %v6407_v48 = vadd.f32 %v5273_v43, %v3682_v35  ;;  %v5402_v46 = vpop.f32.mrb[30].mxu1  ;;  %v5275_v52 = vpop.f32.mrb[15].mxu0 }
 0x7a7   :  { %v5538_v54 = vsub.f32 0.0, %v6409_v41  ;;  %v5537_v53 = vsub.f32 0.0, %v6406_v32  ;;  %v6411_v56 = vadd.f32 %v5402_v46, %v3690_v36  ;;  %v6408_v50 = vadd.f32 %v5275_v52, %v3686_v60  ;;  %v5404_v23 = vpop.f32.mrb[31].mxu1 }
 0x7a8   :  { %v5548_v57 = vmul.f32 1.442695, %v5536_v44  ;;  %v5539_v55 = vsub.f32 0.0, %v6410_v45  ;;  %v5542_v58 = vsub.f32 0.0, %v6407_v48  ;;  %v6412_v59 = vadd.f32 %v5404_v23, %v3694_v37 }
 0x7a9   :  { %v5552_v0 = vmul.f32 1.442695, %v5538_v54  ;;  %v5550_v1 = vmul.f32 1.442695, %v5537_v53  ;;  %v5544_v5 = vsub.f32 0.0, %v6411_v56  ;;  %v5543_v6 = vsub.f32 0.0, %v6408_v50 }
 0x7aa   :  { %7508 = vpow2.f32 %v5548_v57  ;;  %v5554_v7 = vmul.f32 1.442695, %v5539_v55  ;;  %v5560_v62 = vmul.f32 1.442695, %v5542_v58  ;;  %v5545_v8 = vsub.f32 0.0, %v6412_v59 }
 0x7ab   :  { %7510 = vpow2.f32 %v5552_v0  ;;  %v5564_v9 = vmul.f32 1.442695, %v5544_v5  ;;  %v5562_v10 = vmul.f32 1.442695, %v5543_v6 }
 0x7ac   :  { %7512 = vpow2.f32 %v5550_v1  ;;  %v5566_v49 = vmul.f32 1.442695, %v5545_v8 }
 0x7ad   :  { %7514 = vpow2.f32 %v5554_v7 }
 0x7ae   :  { %7516 = vpow2.f32 %v5560_v62 }
 0x7af   :  { %7518 = vpow2.f32 %v5564_v9 }
 0x7b0   :  { %7520 = vpow2.f32 %v5562_v10 }
 0x7b1   :  { %7522 = vpow2.f32 %v5566_v49 }
 0x7b4   :  { %v7509_v16 = vpop.eup %7508 }
 0x7b5   :  { %v7511_v11 = vpop.eup %7510  ;;  %v5572_v12 = vadd.f32 1.0, %v7509_v16 }
 0x7b6   :  { %v7513_v61 = vpop.eup %7512  ;;  %v5574_v13 = vadd.f32 1.0, %v7511_v11 }
 0x7b7   :  { %v7515_v33 = vpop.eup %7514  ;;  %7524 = vrcp.f32 %v5572_v12  ;;  %v5573_v14 = vadd.f32 1.0, %v7513_v61 }
 0x7b8   :  { %v7517_v15 = vpop.eup %7516  ;;  %7526 = vrcp.f32 %v5574_v13  ;;  %v5575_v34 = vadd.f32 1.0, %v7515_v33 }
 0x7b9   :  { %v7519_v17 = vpop.eup %7518  ;;  %7528 = vrcp.f32 %v5573_v14  ;;  %v5578_v18 = vadd.f32 1.0, %v7517_v15 }
 0x7ba   :  { %v7521_v19 = vpop.eup %7520  ;;  %7530 = vrcp.f32 %v5575_v34  ;;  %v5580_v4 = vadd.f32 1.0, %v7519_v17 }
 0x7bb   :  { %v7523_v24 = vpop.eup %7522  ;;  %7532 = vrcp.f32 %v5578_v18  ;;  %v5579_v20 = vadd.f32 1.0, %v7521_v19 }
 0x7bc   :  { %7534 = vrcp.f32 %v5580_v4  ;;  %v5581_v21 = vadd.f32 1.0, %v7523_v24 }
 0x7bd   :  { %7536 = vrcp.f32 %v5579_v20 }
 0x7be   :  { %7538 = vrcp.f32 %v5581_v21 }
 0x7c1   :  { %v7525_v51 = vpop.eup %7524 }
 0x7c2   :  { %v7527_v22 = vpop.eup %7526  ;;  %5608 = vst [vmem:[%s8348_s15] sm:$0xff] %v7525_v51 }
 0x7c3   :  { %v7529_v25 = vpop.eup %7528  ;;  %5610 = vst [vmem:[%s8348_s15 + $0x10] sm:$0xff] %v7527_v22 }
 0x7c4   :  { %v7531_v26 = vpop.eup %7530  ;;  %5609 = vst [vmem:[%s8348_s15 + $0x8] sm:$0xff] %v7529_v25 }
 0x7c5   :  { %v7533_v27 = vpop.eup %7532  ;;  %5611 = vst [vmem:[%s8348_s15 + $0x18] sm:$0xff] %v7531_v26 }
 0x7c6   :  { %v7535_v28 = vpop.eup %7534  ;;  %5614 = vst [vmem:[%s8348_s15 + $0x30] sm:$0xff] %v7533_v27 }
 0x7c7   :  { %v7537_v29 = vpop.eup %7536  ;;  %5616 = vst [vmem:[%s8348_s15 + $0x40] sm:$0xff] %v7535_v28 }
 0x7c8   :  { %v7539_v30 = vpop.eup %7538  ;;  %5615 = vst [vmem:[%s8348_s15 + $0x38] sm:$0xff] %v7537_v29 }
 0x7c9   :  { %5617 = vst [vmem:[%s8348_s15 + $0x48] sm:$0xff] %v7539_v30 }
 0x7ca   :  { %7833 = shalt.err (!%p7830_p2)
}
 0x7cb   :  { %s7834_s5 = scalar_lea.hbm %s8346_s13, 256 }
 0x7cc   :  { %p7835_p3 = scmp.ne.s32.totalorder %s8346_s13, %s7834_s5  ;;  %p7838_p4 = scmp.lt.u32.totalorder %s7834_s5, %s8346_s13 }
 0x7ce   :  { %p7840_p5 = pnand %p7838_p4, %p7835_p3 }
 0x7d0   :  { %7843 = shalt.err (!%p7840_p5)
}
 0x7d1   :  { %s8351_s10 = smov 8   ;;  %s8352_s21 = smov 128   ;;  %v3698_v35 = vrot.slane %v8266_v31, %v2750_v2  ;;  %v3702_v36 = vrot.slane %v8266_v31, %v2754_v3 }
 0x7d2   :  { %5631 = dma.vmem_to_hbm [thread:$0]  %s5626_s28, 256, %s8346_s13, [#allocation4], %s8352_s21, %s8352_s21, %s8351_s10  }
 0x863   :  { %v5527_v60 = vpop.f32.mrb[16].mxu0 }
 0x864   :  { %v6413_v37 = vadd.f32 %v5527_v60, %v3698_v35  ;;  %v5529_v63 = vpop.f32.mrb[17].mxu0 }
 0x865   :  { %v6414_v38 = vadd.f32 %v5529_v63, %v3702_v36  ;;  %v5531_v39 = vpop.f32.mrb[18].mxu0 }
 0x866   :  { %v5540_v40 = vsub.f32 0.0, %v6413_v37  ;;  %v6415_v41 = vadd.f32 %v5531_v39, %v3698_v35  ;;  %v5533_v32 = vpop.f32.mrb[19].mxu0 }
 0x867   :  { %v5541_v42 = vsub.f32 0.0, %v6414_v38  ;;  %v6416_v43 = vadd.f32 %v5533_v32, %v3702_v36 }
 0x868   :  { %v5556_v44 = vmul.f32 1.442695, %v5540_v40  ;;  %v5546_v45 = vsub.f32 0.0, %v6415_v41 }
 0x869   :  { %v5558_v48 = vmul.f32 1.442695, %v5541_v42  ;;  %v5547_v46 = vsub.f32 0.0, %v6416_v43 }
 0x86a   :  { %7540 = vpow2.f32 %v5556_v44  ;;  %v5568_v2 = vmul.f32 1.442695, %v5546_v45 }
 0x86b   :  { %7542 = vpow2.f32 %v5558_v48  ;;  %v5570_v47 = vmul.f32 1.442695, %v5547_v46 }
 0x86c   :  { %7544 = vpow2.f32 %v5568_v2 }
 0x86d   :  { %7546 = vpow2.f32 %v5570_v47 }
 0x874   :  { %v7541_v3 = vpop.eup %7540 }
 0x875   :  { %v7543_v31 = vpop.eup %7542  ;;  %v5576_v52 = vadd.f32 1.0, %v7541_v3 }
 0x876   :  { %v7545_v54 = vpop.eup %7544  ;;  %v5577_v53 = vadd.f32 1.0, %v7543_v31 }
 0x877   :  { %v7547_v56 = vpop.eup %7546  ;;  %7548 = vrcp.f32 %v5576_v52  ;;  %v5582_v50 = vadd.f32 1.0, %v7545_v54 }
 0x878   :  { %7550 = vrcp.f32 %v5577_v53  ;;  %v5583_v23 = vadd.f32 1.0, %v7547_v56 }
 0x879   :  { %7552 = vrcp.f32 %v5582_v50 }
 0x87a   :  { %7554 = vrcp.f32 %v5583_v23 }
 0x881   :  { %v7549_v57 = vpop.eup %7548 }
 0x882   :  { %v7551_v55 = vpop.eup %7550  ;;  %5612 = vst [vmem:[%s8348_s15 + $0x20] sm:$0xff] %v7549_v57 }
 0x883   :  { %v7553_v58 = vpop.eup %7552  ;;  %5613 = vst [vmem:[%s8348_s15 + $0x28] sm:$0xff] %v7551_v55 }
 0x884   :  { %v7555_v59 = vpop.eup %7554  ;;  %5618 = vst [vmem:[%s8348_s15 + $0x50] sm:$0xff] %v7553_v58 }
 0x885   :  { %5619 = vst [vmem:[%s8348_s15 + $0x58] sm:$0xff] %v7555_v59 }
 0x886   :  { %7858 = dma.done.wait [#allocation4], 256  }
 0x887   :  { %7859 = vsyncadd [#allocation4], 4294967040 }
 0x888   :  { %5643 = vsyncpa [#allocation3], 1 }
 0x889   :  { %5644 = vsyncpa [#allocation6], 1 }
 0x88a   :  { %5645 = vsyncpa [#allocation9], 1 }
 0x88b   :  { %5646 = vsyncpa [#allocation12], 1 }
 0x88c   :  { %5647 = vsyncpa [#allocation15], 1 }
 0x88d   :  { %5648 = vsyncpa [#allocation18], 1 }
 0x88e   :  { %5649 = vsyncpa [#allocation21], 1 }
 0x88f   :  { %5650 = vsyncpa [#allocation4], 1 }

</bundles_post_ra>
